<compile_context>
chip_gen: v7x
topology: tpu7x:2x2x1
jax: 0.10.0
libtpu: 0.0.40
codegen_flags: <defaults>
</compile_context>

<pallas_src>
import math
from functools import partial

import numpy as np
import jax
import jax.numpy as jnp
from jax.experimental import pallas as pl
from jax.experimental.pallas import tpu as pltpu


# ----------------------------------------------------------------------------
# fixed hyper-parameters of the reduced hybrid model
# (HOP == STRIDE**2 and NFFT == 4*HOP are relied upon by the layout folding)
# ----------------------------------------------------------------------------
K = 8           # conv kernel size (time and frequency branches)
STRIDE = 4      # conv stride
PAD = 2         # conv padding
NFFT = 64
HOP = 16
N_OV = NFFT // HOP            # 4 overlapping frames per hop slot
F = NFFT // 2                 # 32 kept frequency bins (CaC, Nyquist dropped)


def _hann(n):
    i = np.arange(n, dtype=np.float64)
    return 0.5 - 0.5 * np.cos(2.0 * np.pi * i / n)


# ----------------------------------------------------------------------------
# raw parameters (torch Conv1d / ConvTranspose1d layouts)
# ----------------------------------------------------------------------------
def init_params(key, audio_channels=2, sources=2, ch1=16, ch2=32):
    S = sources
    ks = jax.random.split(key, 16)

    def conv_w(k, cout, cin, ksz):
        return jax.random.normal(k, (cout, cin, ksz), jnp.float32) / math.sqrt(cin * ksz)

    def convT_w(k, cin, cout, ksz):
        return jax.random.normal(k, (cin, cout, ksz), jnp.float32) / math.sqrt(cin * ksz)

    def bias(k, n):
        return 0.01 * jax.random.normal(k, (n,), jnp.float32)

    p = {}
    p["tw1"], p["tb1"] = conv_w(ks[0], ch1, audio_channels, K), bias(ks[8], ch1)
    p["tw2"], p["tb2"] = conv_w(ks[1], ch2, ch1, K), bias(ks[9], ch2)
    p["tdw2"], p["tdb2"] = convT_w(ks[2], ch2, ch1, K), bias(ks[10], ch1)
    p["tdw1"], p["tdb1"] = convT_w(ks[3], ch1, S * audio_channels, K), bias(ks[11], S * audio_channels)
    p["fw1"], p["fb1"] = conv_w(ks[4], ch1, 2 * audio_channels, K), bias(ks[12], ch1)
    p["fw2"], p["fb2"] = conv_w(ks[5], ch2, ch1, K), bias(ks[13], ch2)
    p["fdw2"], p["fdb2"] = convT_w(ks[6], ch2, ch1, K), bias(ks[14], ch1)
    p["fdw1"], p["fdb1"] = convT_w(ks[7], ch1, S * 2 * audio_channels, K), bias(ks[15], S * 2 * audio_channels)
    return p


# ----------------------------------------------------------------------------
# host-side weight folding (done once, outside jit): every layer becomes one
# dense lane-friendly matrix acting on hop-phase / phase-major activations.
# ----------------------------------------------------------------------------
def fold_params(params, *, audio_channels=2, sources=2):
    C, S = audio_channels, sources
    SC = S * C
    ch1 = int(params["tw1"].shape[0])
    ch2 = int(params["tw2"].shape[0])
    F1 = (F + 2 * PAD - K) // STRIDE + 1          # 8
    F2 = (F1 + 2 * PAD - K) // STRIDE + 1         # 2
    Fd2 = (F2 - 1) * STRIDE - 2 * PAD + K         # 8

    f64 = lambda a: np.asarray(a, np.float64)
    tw1, tb1 = f64(params["tw1"]), f64(params["tb1"])
    tw2, tb2 = f64(params["tw2"]), f64(params["tb2"])
    tdw2, tdb2 = f64(params["tdw2"]), f64(params["tdb2"])
    tdw1, tdb1 = f64(params["tdw1"]), f64(params["tdb1"])
    fw1, fb1 = f64(params["fw1"]), f64(params["fb1"])
    fw2, fb2 = f64(params["fw2"]), f64(params["fb2"])
    fdw2, fdb2 = f64(params["fdw2"]), f64(params["fdb2"])
    fdw1, fdb1 = f64(params["fdw1"]), f64(params["fdb1"])

    win = _hann(NFFT)
    jj = np.arange(NFFT, dtype=np.float64)
    ff = np.arange(F, dtype=np.float64)
    ang = 2.0 * np.pi * np.outer(ff, jj) / NFFT                       # (F, nfft)
    BAS = np.stack([win[None, :] * np.cos(ang),
                    -win[None, :] * np.sin(ang)])                     # analysis (2,F,nfft)
    wf = np.where(ff == 0, 1.0, 2.0)[:, None]
    IB = np.stack([wf * np.cos(ang), -wf * np.sin(ang)]) * win[None, None, :] / NFFT  # synthesis

    # -- encoder stage 1: time conv1 (4 output phases stacked) + freq conv1
    #    with the STFT analysis folded in; both act on the framed input -------
    Wt1 = np.zeros((STRIDE * ch1, C * NFFT))
    for p1 in range(STRIDE):
        for k in range(K):
            v = STRIDE * p1 + k - PAD                 # sample offset in [-2, 17]
            soff = (v + 2 * HOP) // HOP               # frame slab index (1..3)
            p = v - (soff - 2) * HOP
            for ci in range(C):
                Wt1[p1 * ch1:(p1 + 1) * ch1, ci * NFFT + soff * HOP + p] = tw1[:, ci, k]

    sel1 = np.zeros((F1, K, F))
    for fo in range(F1):
        for k in range(K):
            f = fo * STRIDE + k - PAD
            if 0 <= f < F:
                sel1[fo, k, f] = 1.0
    fw1r = fw1.reshape(ch1, C, 2, K)                  # CaC input channel = c*2 + (re/im)
    Wf1 = np.einsum("ocrk,fkq,rqj->focj", fw1r, sel1, BAS).reshape(F1 * ch1, C * NFFT)

    Wenc1 = np.concatenate([Wt1, Wf1], axis=0)        # (4*ch1 + F1*ch1, C*nfft)
    benc1 = np.concatenate([np.tile(tb1, STRIDE), np.tile(fb1, F1)])

    # -- encoder stage 2 ------------------------------------------------------
    Wt2 = tw2.transpose(0, 2, 1).reshape(ch2, K * ch1)            # col = k*ch1 + ci
    sel2 = np.zeros((F2, K, F1))
    for fo in range(F2):
        for k in range(K):
            f = fo * STRIDE + k - PAD
            if 0 <= f < F1:
                sel2[fo, k, f] = 1.0
    Wf2 = np.einsum("oik,fkg->fogi", fw2, sel2).reshape(F2 * ch2, F1 * ch1)

    # -- decoder stage 2 (phase-stacked transposed convs as dense matrices) ---
    Wtd2 = np.zeros((STRIDE * ch1, 3 * ch2))
    for p1 in range(STRIDE):
        for s in (-1, 0, 1):
            k = -STRIDE * s + p1 + PAD
            if 0 <= k < K:
                Wtd2[p1 * ch1:(p1 + 1) * ch1, (s + 1) * ch2:(s + 2) * ch2] = tdw2[:, :, k].T
    selT2 = np.zeros((Fd2, K, F2))
    for fd in range(Fd2):
        for k in range(K):
            num = fd + PAD - k
            if num % STRIDE == 0 and 0 <= num // STRIDE < F2:
                selT2[fd, k, num // STRIDE] = 1.0
    Wfd2 = np.einsum("iok,dkf->dofi", fdw2, selT2).reshape(Fd2 * ch1, F2 * ch2)

    # -- decoder stage 1: time deconv straight into hop-phase samples ---------
    Wtd1 = np.zeros((SC * HOP, 3 * STRIDE * ch1))
    for p1 in range(STRIDE):
        for k in range(K):
            v = STRIDE * p1 + k - PAD
            d = v // HOP                              # column shift (-1, 0, +1)
            j = v - HOP * d                           # hop phase of the output sample
            col0 = (d + 1) * STRIDE * ch1 + p1 * ch1
            for sc in range(SC):
                Wtd1[sc * HOP + j, col0:col0 + ch1] = tdw1[:, sc, k]
    btd1 = np.repeat(tdb1, HOP)

    # -- decoder stage 1 freq: final deconv folded with the iSTFT basis -------
    selT1 = np.zeros((Fd2, K, F))
    for fi in range(Fd2):
        for k in range(K):
            f = fi * STRIDE + k - PAD
            if 0 <= f < F:
                selT1[fi, k, f] = 1.0
    fdw1r = fdw1.reshape(ch1, SC, 2, K)               # out channel = sc*2 + (re/im)
    Wist = np.einsum("rfj,dkf,isrk->jsdi", IB, selT1, fdw1r)       # (nfft, SC, Fd2, ch1)
    Wist = (Wist.reshape(N_OV, HOP, SC, Fd2 * ch1)
                .transpose(0, 2, 1, 3)
                .reshape(N_OV * SC * HOP, Fd2 * ch1))
    ib_sum = IB.sum(axis=1)                                          # (2, nfft)
    b_fr = np.einsum("rj,sr->js", ib_sum, fdb1.reshape(SC, 2))       # (nfft, SC)
    bist = b_fr.reshape(N_OV, HOP, SC).transpose(0, 2, 1).reshape(-1)

    as_bf16 = lambda a: jnp.asarray(a, jnp.bfloat16)
    as_col = lambda a: jnp.asarray(a, jnp.float32).reshape(-1, 1)
    return {
        "Wenc1": as_bf16(Wenc1), "benc1": as_col(benc1),
        "Wt2": as_bf16(Wt2), "bt2": as_col(tb2),
        "Wf2": as_bf16(Wf2), "bf2": as_col(np.tile(fb2, F2)),
        "Wtd2": as_bf16(Wtd2), "btd2": as_col(np.tile(tdb2, STRIDE)),
        "Wfd2": as_bf16(Wfd2), "bfd2": as_col(np.tile(fdb2, Fd2)),
        "Wtd1": as_bf16(Wtd1), "btd1": as_col(btd1),
        "Wist": as_bf16(Wist), "bist": as_col(bist),
    }


# ----------------------------------------------------------------------------
# single fused kernel: one grid step = one batch element, everything in VMEM.
# ----------------------------------------------------------------------------
def _hdemucs_kernel(x_ref, wenc1_ref, benc1_ref, wt2_ref, bt2_ref,
                    wf2_ref, bf2_ref, wtd2_ref, btd2_ref, wfd2_ref, bfd2_ref,
                    wtd1_ref, btd1_ref, wist_ref, bist_ref, norm_ref, o_ref,
                    *, C, ch1, ch2, SC, Tf):
    f32, bf16 = jnp.float32, jnp.bfloat16
    gelu = partial(jax.nn.gelu, approximate=True)

    # --- per-batch normalization (mean / unbiased std over all samples) -----
    x = x_ref[0]                                            # (C*hop, Tf) hop-phase layout
    n_el = x.shape[0] * x.shape[1]
    m = jnp.mean(x)
    std = jnp.sqrt(jnp.sum((x - m) ** 2) / (n_el - 1))
    xn = (x - m) / (std + 1e-5)

    # --- hop-phase framing (shared by STFT-folded freq conv1 and time conv1):
    # frames[c*nfft + soff*hop + p, t] = xn[c, (t + soff - 2)*hop + p] --------
    zl = jnp.zeros((C * HOP, 2), f32)
    zr = jnp.zeros((C * HOP, 1), f32)
    xp = jnp.concatenate([zl, xn, zr], axis=1)              # (C*hop, Tf+3)
    frames = jnp.concatenate(
        [xp[c * HOP:(c + 1) * HOP, s:s + Tf] for c in range(C) for s in range(N_OV)],
        axis=0)                                             # (C*nfft, Tf)

    # --- encoder stage 1: time conv1 (phase-stacked) + freq conv1 (STFT
    # folded) as ONE MXU contraction of depth C*nfft --------------------------
    enc1 = jnp.dot(wenc1_ref[...], frames.astype(bf16),
                   preferred_element_type=f32) + benc1_ref[...]
    enc1 = gelu(enc1)
    t1 = enc1[:STRIDE * ch1]                                # (4*ch1, Tf) phase-major
    f1 = enc1[STRIDE * ch1:]                                # (F1*ch1, Tf)

    def cat3(a, lo_rows=None, hi_rows=None):
        # [shift -1 | shift 0 | shift +1] column-shifted slabs, zero boundaries
        z = jnp.zeros((a.shape[0], 1), f32)
        apad = jnp.concatenate([z, a, z], axis=1)
        left = apad[:, 0:Tf] if lo_rows is None else apad[lo_rows[0]:lo_rows[1], 0:Tf]
        mid = apad[:, 1:Tf + 1]
        right = apad[:, 2:Tf + 2] if hi_rows is None else apad[hi_rows[0]:hi_rows[1], 2:Tf + 2]
        return jnp.concatenate([left, mid, right], axis=0)

    # --- encoder stage 2 ------------------------------------------------------
    t1cat = cat3(t1, lo_rows=(2 * ch1, 4 * ch1), hi_rows=(0, 2 * ch1))   # (K*ch1, Tf)
    t2 = gelu(jnp.dot(wt2_ref[...], t1cat.astype(bf16),
                      preferred_element_type=f32) + bt2_ref[...])        # (ch2, Tf)
    f2 = gelu(jnp.dot(wf2_ref[...], f1.astype(bf16),
                      preferred_element_type=f32) + bf2_ref[...])        # (F2*ch2, Tf)

    # --- cross-domain fusion (epilogue work under MXU slack, F2 == 2) --------
    f2m = 0.5 * (f2[:ch2] + f2[ch2:])
    shared = t2 + f2m                                                    # (ch2, Tf)
    fsh = f2 + jnp.concatenate([shared, shared], axis=0)                 # (F2*ch2, Tf)

    # --- decoder stage 2 (+ encoder skips) ------------------------------------
    scat = cat3(shared)                                                  # (3*ch2, Tf)
    td2 = gelu(jnp.dot(wtd2_ref[...], scat.astype(bf16),
                       preferred_element_type=f32) + btd2_ref[...])      # (4*ch1, Tf)
    h = td2 + t1
    fd2 = gelu(jnp.dot(wfd2_ref[...], fsh.astype(bf16),
                       preferred_element_type=f32) + bfd2_ref[...])      # (Fd2*ch1, Tf)
    g = fd2 + f1

    # --- decoder stage 1: time branch straight to hop-phase output samples ----
    hcat = cat3(h)                                                       # (12*ch1, Tf)
    t_out = jnp.dot(wtd1_ref[...], hcat.astype(bf16),
                    preferred_element_type=f32) + btd1_ref[...]          # (SC*hop, Tf)

    # --- freq branch: final deconv folded with iSTFT synthesis, then
    # overlap-add as shifted VPU adds, COLA normalization, center trim --------
    fr = jnp.dot(wist_ref[...], g.astype(bf16),
                 preferred_element_type=f32) + bist_ref[...]             # (n_ov*SC*hop, Tf)
    blk = SC * HOP
    y = jnp.concatenate([fr[0:blk], jnp.zeros((blk, N_OV), f32)], axis=1)
    for s in range(1, N_OV):
        piece = jnp.concatenate(
            [jnp.zeros((blk, s), f32),
             fr[s * blk:(s + 1) * blk],
             jnp.zeros((blk, N_OV - s), f32)], axis=1)                   # (SC*hop, Tf+n_ov)
        y = y + piece
    y = y * norm_ref[...]
    f_out = y[:, 2:2 + Tf]                                               # (SC*hop, Tf)

    # --- sum branches + de-normalize, lane-dense (Tf) store -------------------
    o_ref[0] = (t_out + f_out) * std + m


# ----------------------------------------------------------------------------
# forward wrapper: one pallas_call over the batch
# ----------------------------------------------------------------------------
def hdemucs_forward(folded, mix, *, sources=2, audio_channels=2):
    B, C, T = mix.shape
    assert C == audio_channels
    assert T % HOP == 0
    S = sources
    SC = S * C
    Tf = T // HOP
    ch1 = folded["Wt2"].shape[1] // K
    ch2 = folded["Wt2"].shape[0]

    # hop-phase input layout: x2d[b, c*hop + p, t] = mix[b, c, t*hop + p]
    x2d = jnp.transpose(mix.reshape(B, C, Tf, HOP), (0, 1, 3, 2)).reshape(B, C * HOP, Tf)

    # COLA / overlap-add normalization (trace-time constant, numpy)
    win = _hann(NFFT)
    w2 = (win * win).reshape(N_OV, HOP)
    U = Tf + N_OV
    sumw = np.zeros((HOP, U))
    for s in range(N_OV):
        sumw[:, s:s + Tf] += w2[s][:, None]
    norm = jnp.asarray(np.tile(1.0 / (sumw + 1e-8), (SC, 1)), jnp.float32)   # (SC*hop, U)

    def full_spec(arr):
        nd = arr.ndim
        return pl.BlockSpec(tuple(arr.shape), lambda b, _nd=nd: (0,) * _nd)

    wkeys = ["Wenc1", "benc1", "Wt2", "bt2", "Wf2", "bf2", "Wtd2", "btd2",
             "Wfd2", "bfd2", "Wtd1", "btd1", "Wist", "bist"]
    wvals = [folded[k] for k in wkeys]

    out = pl.pallas_call(
        partial(_hdemucs_kernel, C=C, ch1=ch1, ch2=ch2, SC=SC, Tf=Tf),
        out_shape=jax.ShapeDtypeStruct((B, SC * HOP, Tf), jnp.float32),
        grid=(B,),
        in_specs=[pl.BlockSpec((1, C * HOP, Tf), lambda b: (b, 0, 0))]
                 + [full_spec(v) for v in wvals]
                 + [full_spec(norm)],
        out_specs=pl.BlockSpec((1, SC * HOP, Tf), lambda b: (b, 0, 0)),
        compiler_params=pltpu.CompilerParams(dimension_semantics=("parallel",)),
    )(x2d, *wvals, norm)

    # un-phase: (B, SC, hop, Tf) -> (B, S, C, T)
    y = jnp.transpose(out.reshape(B, SC, HOP, Tf), (0, 1, 3, 2)).reshape(B, S, C, T)
    return y


if __name__ == "__main__":
    key = jax.random.PRNGKey(0)
    kp, kx = jax.random.split(key)

    B, C, T = 2, 2, 2048        # batch, audio_channels, samples
    S = 2                       # len(sources)

    params = init_params(kp, audio_channels=C, sources=S)
    folded = fold_params(params, audio_channels=C, sources=S)
    mix = jax.random.normal(kx, (B, C, T), jnp.float32)

    fwd = jax.jit(partial(hdemucs_forward, sources=S, audio_channels=C))
    out = jax.block_until_ready(fwd(folded, mix))

    assert out.shape == (B, S, C, T), out.shape
    assert bool(jnp.all(jnp.isfinite(out)))
    print("KERNEL_OK")
</pallas_src>

<mosaic_0001>
module attributes {stable_mosaic.version = 11 : i64} {
  func.func @_hdemucs_kernel(%arg0: i32, %arg1: memref<1x32x128xf32, #tpu.memory_space<vmem>>, %arg2: memref<192x128xbf16, #tpu.memory_space<vmem>>, %arg3: memref<192x1xf32, #tpu.memory_space<vmem>>, %arg4: memref<32x128xbf16, #tpu.memory_space<vmem>>, %arg5: memref<32x1xf32, #tpu.memory_space<vmem>>, %arg6: memref<64x128xbf16, #tpu.memory_space<vmem>>, %arg7: memref<64x1xf32, #tpu.memory_space<vmem>>, %arg8: memref<64x96xbf16, #tpu.memory_space<vmem>>, %arg9: memref<64x1xf32, #tpu.memory_space<vmem>>, %arg10: memref<128x64xbf16, #tpu.memory_space<vmem>>, %arg11: memref<128x1xf32, #tpu.memory_space<vmem>>, %arg12: memref<64x192xbf16, #tpu.memory_space<vmem>>, %arg13: memref<64x1xf32, #tpu.memory_space<vmem>>, %arg14: memref<256x128xbf16, #tpu.memory_space<vmem>>, %arg15: memref<256x1xf32, #tpu.memory_space<vmem>>, %arg16: memref<64x132xf32, #tpu.memory_space<vmem>>, %arg17: memref<1x64x128xf32, #tpu.memory_space<vmem>>) attributes {dimension_semantics = [#tpu.dimension_semantics<parallel>], iteration_bounds = array<i64: 2>, scalar_prefetch = 0 : i64, scratch_operands = 0 : i64, tpu.core_type = #tpu.core_type<tc>, window_params = [{transform_indices = @transform_0, window_bounds = array<i64: 1, 32, 128>}, {pipeline_mode = #tpu.pipeline_mode<synchronous>, transform_indices = @transform_1, window_bounds = array<i64: 192, 128>}, {pipeline_mode = #tpu.pipeline_mode<synchronous>, transform_indices = @transform_2, window_bounds = array<i64: 192, 1>}, {pipeline_mode = #tpu.pipeline_mode<synchronous>, transform_indices = @transform_3, window_bounds = array<i64: 32, 128>}, {pipeline_mode = #tpu.pipeline_mode<synchronous>, transform_indices = @transform_4, window_bounds = array<i64: 32, 1>}, {pipeline_mode = #tpu.pipeline_mode<synchronous>, transform_indices = @transform_5, window_bounds = array<i64: 64, 128>}, {pipeline_mode = #tpu.pipeline_mode<synchronous>, transform_indices = @transform_6, window_bounds = array<i64: 64, 1>}, {pipeline_mode = #tpu.pipeline_mode<synchronous>, transform_indices = @transform_7, window_bounds = array<i64: 64, 96>}, {pipeline_mode = #tpu.pipeline_mode<synchronous>, transform_indices = @transform_8, window_bounds = array<i64: 64, 1>}, {pipeline_mode = #tpu.pipeline_mode<synchronous>, transform_indices = @transform_9, window_bounds = array<i64: 128, 64>}, {pipeline_mode = #tpu.pipeline_mode<synchronous>, transform_indices = @transform_10, window_bounds = array<i64: 128, 1>}, {pipeline_mode = #tpu.pipeline_mode<synchronous>, transform_indices = @transform_11, window_bounds = array<i64: 64, 192>}, {pipeline_mode = #tpu.pipeline_mode<synchronous>, transform_indices = @transform_12, window_bounds = array<i64: 64, 1>}, {pipeline_mode = #tpu.pipeline_mode<synchronous>, transform_indices = @transform_13, window_bounds = array<i64: 256, 128>}, {pipeline_mode = #tpu.pipeline_mode<synchronous>, transform_indices = @transform_14, window_bounds = array<i64: 256, 1>}, {pipeline_mode = #tpu.pipeline_mode<synchronous>, transform_indices = @transform_15, window_bounds = array<i64: 64, 132>}, {transform_indices = @transform_16, window_bounds = array<i64: 1, 64, 128>}]} {
    %c0 = arith.constant 0 : index
    %c0_0 = arith.constant 0 : index
    %c0_1 = arith.constant 0 : index
    %0 = vector.load %arg1[%c0, %c0_0, %c0_1] : memref<1x32x128xf32, #tpu.memory_space<vmem>>, vector<1x32x128xf32>
    %1 = vector.shape_cast %0 : vector<1x32x128xf32> to vector<32x128xf32>
    %2 = vector.shape_cast %1 : vector<32x128xf32> to vector<1x32x128xf32>
    %cst = arith.constant dense<0.000000e+00> : vector<1xf32>
    %3 = vector.multi_reduction <add>, %2, %cst [1, 2] : vector<1x32x128xf32> to vector<1xf32>
    %4 = vector.shape_cast %3 : vector<1xf32> to vector<1x1x1xf32>
    %5 = vector.extract %4[0, 0, 0] : f32 from vector<1x1x1xf32>
    %cst_2 = arith.constant 4.096000e+03 : f32
    %6 = arith.divf %5, %cst_2 : f32
    %7 = vector.broadcast %6 : f32 to vector<32x128xf32>
    %8 = arith.subf %1, %7 : vector<32x128xf32>
    %9 = arith.mulf %8, %8 : vector<32x128xf32>
    %10 = vector.shape_cast %9 : vector<32x128xf32> to vector<1x32x128xf32>
    %cst_3 = arith.constant dense<0.000000e+00> : vector<1xf32>
    %11 = vector.multi_reduction <add>, %10, %cst_3 [1, 2] : vector<1x32x128xf32> to vector<1xf32>
    %12 = vector.shape_cast %11 : vector<1xf32> to vector<1x1x1xf32>
    %13 = vector.extract %12[0, 0, 0] : f32 from vector<1x1x1xf32>
    %cst_4 = arith.constant 4.095000e+03 : f32
    %14 = arith.divf %13, %cst_4 : f32
    %15 = math.sqrt %14 : f32
    %16 = vector.broadcast %6 : f32 to vector<32x128xf32>
    %17 = arith.subf %1, %16 : vector<32x128xf32>
    %cst_5 = arith.constant 9.99999974E-6 : f32
    %18 = arith.addf %15, %cst_5 : f32
    %19 = vector.broadcast %18 : f32 to vector<32x128xf32>
    %20 = arith.divf %17, %19 : vector<32x128xf32>
    %cst_6 = arith.constant 0.000000e+00 : f32
    %21 = vector.broadcast %cst_6 : f32 to vector<32x2xf32>
    %cst_7 = arith.constant 0.000000e+00 : f32
    %22 = vector.broadcast %cst_7 : f32 to vector<32x1xf32>
    %23 = tpu.concatenate %21, %20, %22 in 1 : vector<32x2xf32>, vector<32x128xf32>, vector<32x1xf32> -> vector<32x131xf32>
    %24 = vector.extract_strided_slice %23 {offsets = [0, 0], sizes = [16, 128], strides = [1, 1]} : vector<32x131xf32> to vector<16x128xf32>
    %25 = vector.extract_strided_slice %23 {offsets = [0, 1], sizes = [16, 128], strides = [1, 1]} : vector<32x131xf32> to vector<16x128xf32>
    %26 = vector.extract_strided_slice %23 {offsets = [0, 2], sizes = [16, 128], strides = [1, 1]} : vector<32x131xf32> to vector<16x128xf32>
    %27 = vector.extract_strided_slice %23 {offsets = [0, 3], sizes = [16, 128], strides = [1, 1]} : vector<32x131xf32> to vector<16x128xf32>
    %28 = vector.extract_strided_slice %23 {offsets = [16, 0], sizes = [16, 128], strides = [1, 1]} : vector<32x131xf32> to vector<16x128xf32>
    %29 = vector.extract_strided_slice %23 {offsets = [16, 1], sizes = [16, 128], strides = [1, 1]} : vector<32x131xf32> to vector<16x128xf32>
    %30 = vector.extract_strided_slice %23 {offsets = [16, 2], sizes = [16, 128], strides = [1, 1]} : vector<32x131xf32> to vector<16x128xf32>
    %31 = vector.extract_strided_slice %23 {offsets = [16, 3], sizes = [16, 128], strides = [1, 1]} : vector<32x131xf32> to vector<16x128xf32>
    %32 = tpu.concatenate %24, %25, %26, %27, %28, %29, %30, %31 in 0 : vector<16x128xf32>, vector<16x128xf32>, vector<16x128xf32>, vector<16x128xf32>, vector<16x128xf32>, vector<16x128xf32>, vector<16x128xf32>, vector<16x128xf32> -> vector<128x128xf32>
    %c0_8 = arith.constant 0 : index
    %c0_9 = arith.constant 0 : index
    %33 = vector.load %arg2[%c0_8, %c0_9] : memref<192x128xbf16, #tpu.memory_space<vmem>>, vector<192x128xbf16>
    %34 = arith.truncf %32 : vector<128x128xf32> to vector<128x128xbf16>
    %cst_10 = arith.constant dense<0.000000e+00> : vector<192x128xf32>
    %35 = tpu.matmul %33, %34, %cst_10 {dimension_numbers = #tpu.dot_dimension_numbers<[1], [0], [0], [1], [0, 0, 1, 1], [], []>} : vector<192x128xbf16>, vector<128x128xbf16>, vector<192x128xf32> -> vector<192x128xf32>
    %c0_11 = arith.constant 0 : index
    %c0_12 = arith.constant 0 : index
    %36 = vector.load %arg3[%c0_11, %c0_12] : memref<192x1xf32, #tpu.memory_space<vmem>>, vector<192x1xf32>
    %37 = vector.broadcast %36 : vector<192x1xf32> to vector<192x128xf32>
    %38 = arith.addf %35, %37 : vector<192x128xf32>
    %39 = arith.mulf %38, %38 : vector<192x128xf32>
    %40 = arith.mulf %38, %39 : vector<192x128xf32>
    %cst_13 = arith.constant 4.471500e-02 : f32
    %41 = vector.broadcast %cst_13 : f32 to vector<192x128xf32>
    %42 = arith.mulf %41, %40 : vector<192x128xf32>
    %43 = arith.addf %38, %42 : vector<192x128xf32>
    %cst_14 = arith.constant 0.797884583 : f32
    %44 = vector.broadcast %cst_14 : f32 to vector<192x128xf32>
    %45 = arith.mulf %44, %43 : vector<192x128xf32>
    %46 = math.tanh %45 : vector<192x128xf32>
    %cst_15 = arith.constant 1.000000e+00 : f32
    %47 = vector.broadcast %cst_15 : f32 to vector<192x128xf32>
    %48 = arith.addf %47, %46 : vector<192x128xf32>
    %cst_16 = arith.constant 5.000000e-01 : f32
    %49 = vector.broadcast %cst_16 : f32 to vector<192x128xf32>
    %50 = arith.mulf %49, %48 : vector<192x128xf32>
    %51 = arith.mulf %38, %50 : vector<192x128xf32>
    %52 = vector.extract_strided_slice %51 {offsets = [0, 0], sizes = [64, 128], strides = [1, 1]} : vector<192x128xf32> to vector<64x128xf32>
    %53 = vector.extract_strided_slice %51 {offsets = [64, 0], sizes = [128, 128], strides = [1, 1]} : vector<192x128xf32> to vector<128x128xf32>
    %cst_17 = arith.constant 0.000000e+00 : f32
    %54 = vector.broadcast %cst_17 : f32 to vector<64x1xf32>
    %55 = tpu.concatenate %54, %52, %54 in 1 : vector<64x1xf32>, vector<64x128xf32>, vector<64x1xf32> -> vector<64x130xf32>
    %56 = vector.extract_strided_slice %55 {offsets = [32, 0], sizes = [32, 128], strides = [1, 1]} : vector<64x130xf32> to vector<32x128xf32>
    %57 = vector.extract_strided_slice %55 {offsets = [0, 1], sizes = [64, 128], strides = [1, 1]} : vector<64x130xf32> to vector<64x128xf32>
    %58 = vector.extract_strided_slice %55 {offsets = [0, 2], sizes = [32, 128], strides = [1, 1]} : vector<64x130xf32> to vector<32x128xf32>
    %59 = tpu.concatenate %56, %57, %58 in 0 : vector<32x128xf32>, vector<64x128xf32>, vector<32x128xf32> -> vector<128x128xf32>
    %c0_18 = arith.constant 0 : index
    %c0_19 = arith.constant 0 : index
    %60 = vector.load %arg4[%c0_18, %c0_19] : memref<32x128xbf16, #tpu.memory_space<vmem>>, vector<32x128xbf16>
    %61 = arith.truncf %59 : vector<128x128xf32> to vector<128x128xbf16>
    %cst_20 = arith.constant dense<0.000000e+00> : vector<32x128xf32>
    %62 = tpu.matmul %60, %61, %cst_20 {dimension_numbers = #tpu.dot_dimension_numbers<[1], [0], [0], [1], [0, 0, 1, 1], [], []>} : vector<32x128xbf16>, vector<128x128xbf16>, vector<32x128xf32> -> vector<32x128xf32>
    %c0_21 = arith.constant 0 : index
    %c0_22 = arith.constant 0 : index
    %63 = vector.load %arg5[%c0_21, %c0_22] : memref<32x1xf32, #tpu.memory_space<vmem>>, vector<32x1xf32>
    %64 = vector.broadcast %63 : vector<32x1xf32> to vector<32x128xf32>
    %65 = arith.addf %62, %64 : vector<32x128xf32>
    %66 = arith.mulf %65, %65 : vector<32x128xf32>
    %67 = arith.mulf %65, %66 : vector<32x128xf32>
    %cst_23 = arith.constant 4.471500e-02 : f32
    %68 = vector.broadcast %cst_23 : f32 to vector<32x128xf32>
    %69 = arith.mulf %68, %67 : vector<32x128xf32>
    %70 = arith.addf %65, %69 : vector<32x128xf32>
    %cst_24 = arith.constant 0.797884583 : f32
    %71 = vector.broadcast %cst_24 : f32 to vector<32x128xf32>
    %72 = arith.mulf %71, %70 : vector<32x128xf32>
    %73 = math.tanh %72 : vector<32x128xf32>
    %cst_25 = arith.constant 1.000000e+00 : f32
    %74 = vector.broadcast %cst_25 : f32 to vector<32x128xf32>
    %75 = arith.addf %74, %73 : vector<32x128xf32>
    %cst_26 = arith.constant 5.000000e-01 : f32
    %76 = vector.broadcast %cst_26 : f32 to vector<32x128xf32>
    %77 = arith.mulf %76, %75 : vector<32x128xf32>
    %78 = arith.mulf %65, %77 : vector<32x128xf32>
    %c0_27 = arith.constant 0 : index
    %c0_28 = arith.constant 0 : index
    %79 = vector.load %arg6[%c0_27, %c0_28] : memref<64x128xbf16, #tpu.memory_space<vmem>>, vector<64x128xbf16>
    %80 = arith.truncf %53 : vector<128x128xf32> to vector<128x128xbf16>
    %cst_29 = arith.constant dense<0.000000e+00> : vector<64x128xf32>
    %81 = tpu.matmul %79, %80, %cst_29 {dimension_numbers = #tpu.dot_dimension_numbers<[1], [0], [0], [1], [0, 0, 1, 1], [], []>} : vector<64x128xbf16>, vector<128x128xbf16>, vector<64x128xf32> -> vector<64x128xf32>
    %c0_30 = arith.constant 0 : index
    %c0_31 = arith.constant 0 : index
    %82 = vector.load %arg7[%c0_30, %c0_31] : memref<64x1xf32, #tpu.memory_space<vmem>>, vector<64x1xf32>
    %83 = vector.broadcast %82 : vector<64x1xf32> to vector<64x128xf32>
    %84 = arith.addf %81, %83 : vector<64x128xf32>
    %85 = arith.mulf %84, %84 : vector<64x128xf32>
    %86 = arith.mulf %84, %85 : vector<64x128xf32>
    %cst_32 = arith.constant 4.471500e-02 : f32
    %87 = vector.broadcast %cst_32 : f32 to vector<64x128xf32>
    %88 = arith.mulf %87, %86 : vector<64x128xf32>
    %89 = arith.addf %84, %88 : vector<64x128xf32>
    %cst_33 = arith.constant 0.797884583 : f32
    %90 = vector.broadcast %cst_33 : f32 to vector<64x128xf32>
    %91 = arith.mulf %90, %89 : vector<64x128xf32>
    %92 = math.tanh %91 : vector<64x128xf32>
    %cst_34 = arith.constant 1.000000e+00 : f32
    %93 = vector.broadcast %cst_34 : f32 to vector<64x128xf32>
    %94 = arith.addf %93, %92 : vector<64x128xf32>
    %cst_35 = arith.constant 5.000000e-01 : f32
    %95 = vector.broadcast %cst_35 : f32 to vector<64x128xf32>
    %96 = arith.mulf %95, %94 : vector<64x128xf32>
    %97 = arith.mulf %84, %96 : vector<64x128xf32>
    %98 = vector.extract_strided_slice %97 {offsets = [0, 0], sizes = [32, 128], strides = [1, 1]} : vector<64x128xf32> to vector<32x128xf32>
    %99 = vector.extract_strided_slice %97 {offsets = [32, 0], sizes = [32, 128], strides = [1, 1]} : vector<64x128xf32> to vector<32x128xf32>
    %100 = arith.addf %98, %99 : vector<32x128xf32>
    %cst_36 = arith.constant 5.000000e-01 : f32
    %101 = vector.broadcast %cst_36 : f32 to vector<32x128xf32>
    %102 = arith.mulf %101, %100 : vector<32x128xf32>
    %103 = arith.addf %78, %102 : vector<32x128xf32>
    %104 = tpu.concatenate %103, %103 in 0 : vector<32x128xf32>, vector<32x128xf32> -> vector<64x128xf32>
    %105 = arith.addf %97, %104 : vector<64x128xf32>
    %cst_37 = arith.constant 0.000000e+00 : f32
    %106 = vector.broadcast %cst_37 : f32 to vector<32x1xf32>
    %107 = tpu.concatenate %106, %103, %106 in 1 : vector<32x1xf32>, vector<32x128xf32>, vector<32x1xf32> -> vector<32x130xf32>
    %108 = vector.extract_strided_slice %107 {offsets = [0, 0], sizes = [32, 128], strides = [1, 1]} : vector<32x130xf32> to vector<32x128xf32>
    %109 = vector.extract_strided_slice %107 {offsets = [0, 1], sizes = [32, 128], strides = [1, 1]} : vector<32x130xf32> to vector<32x128xf32>
    %110 = vector.extract_strided_slice %107 {offsets = [0, 2], sizes = [32, 128], strides = [1, 1]} : vector<32x130xf32> to vector<32x128xf32>
    %111 = tpu.concatenate %108, %109, %110 in 0 : vector<32x128xf32>, vector<32x128xf32>, vector<32x128xf32> -> vector<96x128xf32>
    %c0_38 = arith.constant 0 : index
    %c0_39 = arith.constant 0 : index
    %112 = vector.load %arg8[%c0_38, %c0_39] : memref<64x96xbf16, #tpu.memory_space<vmem>>, vector<64x96xbf16>
    %113 = arith.truncf %111 : vector<96x128xf32> to vector<96x128xbf16>
    %cst_40 = arith.constant dense<0.000000e+00> : vector<64x128xf32>
    %114 = tpu.matmul %112, %113, %cst_40 {dimension_numbers = #tpu.dot_dimension_numbers<[1], [0], [0], [1], [0, 0, 1, 1], [], []>} : vector<64x96xbf16>, vector<96x128xbf16>, vector<64x128xf32> -> vector<64x128xf32>
    %c0_41 = arith.constant 0 : index
    %c0_42 = arith.constant 0 : index
    %115 = vector.load %arg9[%c0_41, %c0_42] : memref<64x1xf32, #tpu.memory_space<vmem>>, vector<64x1xf32>
    %116 = vector.broadcast %115 : vector<64x1xf32> to vector<64x128xf32>
    %117 = arith.addf %114, %116 : vector<64x128xf32>
    %118 = arith.mulf %117, %117 : vector<64x128xf32>
    %119 = arith.mulf %117, %118 : vector<64x128xf32>
    %cst_43 = arith.constant 4.471500e-02 : f32
    %120 = vector.broadcast %cst_43 : f32 to vector<64x128xf32>
    %121 = arith.mulf %120, %119 : vector<64x128xf32>
    %122 = arith.addf %117, %121 : vector<64x128xf32>
    %cst_44 = arith.constant 0.797884583 : f32
    %123 = vector.broadcast %cst_44 : f32 to vector<64x128xf32>
    %124 = arith.mulf %123, %122 : vector<64x128xf32>
    %125 = math.tanh %124 : vector<64x128xf32>
    %cst_45 = arith.constant 1.000000e+00 : f32
    %126 = vector.broadcast %cst_45 : f32 to vector<64x128xf32>
    %127 = arith.addf %126, %125 : vector<64x128xf32>
    %cst_46 = arith.constant 5.000000e-01 : f32
    %128 = vector.broadcast %cst_46 : f32 to vector<64x128xf32>
    %129 = arith.mulf %128, %127 : vector<64x128xf32>
    %130 = arith.mulf %117, %129 : vector<64x128xf32>
    %131 = arith.addf %130, %52 : vector<64x128xf32>
    %c0_47 = arith.constant 0 : index
    %c0_48 = arith.constant 0 : index
    %132 = vector.load %arg10[%c0_47, %c0_48] : memref<128x64xbf16, #tpu.memory_space<vmem>>, vector<128x64xbf16>
    %133 = arith.truncf %105 : vector<64x128xf32> to vector<64x128xbf16>
    %cst_49 = arith.constant dense<0.000000e+00> : vector<128x128xf32>
    %134 = tpu.matmul %132, %133, %cst_49 {dimension_numbers = #tpu.dot_dimension_numbers<[1], [0], [0], [1], [0, 0, 1, 1], [], []>} : vector<128x64xbf16>, vector<64x128xbf16>, vector<128x128xf32> -> vector<128x128xf32>
    %c0_50 = arith.constant 0 : index
    %c0_51 = arith.constant 0 : index
    %135 = vector.load %arg11[%c0_50, %c0_51] : memref<128x1xf32, #tpu.memory_space<vmem>>, vector<128x1xf32>
    %136 = vector.broadcast %135 : vector<128x1xf32> to vector<128x128xf32>
    %137 = arith.addf %134, %136 : vector<128x128xf32>
    %138 = arith.mulf %137, %137 : vector<128x128xf32>
    %139 = arith.mulf %137, %138 : vector<128x128xf32>
    %cst_52 = arith.constant 4.471500e-02 : f32
    %140 = vector.broadcast %cst_52 : f32 to vector<128x128xf32>
    %141 = arith.mulf %140, %139 : vector<128x128xf32>
    %142 = arith.addf %137, %141 : vector<128x128xf32>
    %cst_53 = arith.constant 0.797884583 : f32
    %143 = vector.broadcast %cst_53 : f32 to vector<128x128xf32>
    %144 = arith.mulf %143, %142 : vector<128x128xf32>
    %145 = math.tanh %144 : vector<128x128xf32>
    %cst_54 = arith.constant 1.000000e+00 : f32
    %146 = vector.broadcast %cst_54 : f32 to vector<128x128xf32>
    %147 = arith.addf %146, %145 : vector<128x128xf32>
    %cst_55 = arith.constant 5.000000e-01 : f32
    %148 = vector.broadcast %cst_55 : f32 to vector<128x128xf32>
    %149 = arith.mulf %148, %147 : vector<128x128xf32>
    %150 = arith.mulf %137, %149 : vector<128x128xf32>
    %151 = arith.addf %150, %53 : vector<128x128xf32>
    %cst_56 = arith.constant 0.000000e+00 : f32
    %152 = vector.broadcast %cst_56 : f32 to vector<64x1xf32>
    %153 = tpu.concatenate %152, %131, %152 in 1 : vector<64x1xf32>, vector<64x128xf32>, vector<64x1xf32> -> vector<64x130xf32>
    %154 = vector.extract_strided_slice %153 {offsets = [0, 0], sizes = [64, 128], strides = [1, 1]} : vector<64x130xf32> to vector<64x128xf32>
    %155 = vector.extract_strided_slice %153 {offsets = [0, 1], sizes = [64, 128], strides = [1, 1]} : vector<64x130xf32> to vector<64x128xf32>
    %156 = vector.extract_strided_slice %153 {offsets = [0, 2], sizes = [64, 128], strides = [1, 1]} : vector<64x130xf32> to vector<64x128xf32>
    %157 = tpu.concatenate %154, %155, %156 in 0 : vector<64x128xf32>, vector<64x128xf32>, vector<64x128xf32> -> vector<192x128xf32>
    %c0_57 = arith.constant 0 : index
    %c0_58 = arith.constant 0 : index
    %158 = vector.load %arg12[%c0_57, %c0_58] : memref<64x192xbf16, #tpu.memory_space<vmem>>, vector<64x192xbf16>
    %159 = arith.truncf %157 : vector<192x128xf32> to vector<192x128xbf16>
    %cst_59 = arith.constant dense<0.000000e+00> : vector<64x128xf32>
    %160 = tpu.matmul %158, %159, %cst_59 {dimension_numbers = #tpu.dot_dimension_numbers<[1], [0], [0], [1], [0, 0, 1, 1], [], []>} : vector<64x192xbf16>, vector<192x128xbf16>, vector<64x128xf32> -> vector<64x128xf32>
    %c0_60 = arith.constant 0 : index
    %c0_61 = arith.constant 0 : index
    %161 = vector.load %arg13[%c0_60, %c0_61] : memref<64x1xf32, #tpu.memory_space<vmem>>, vector<64x1xf32>
    %162 = vector.broadcast %161 : vector<64x1xf32> to vector<64x128xf32>
    %163 = arith.addf %160, %162 : vector<64x128xf32>
    %c0_62 = arith.constant 0 : index
    %c0_63 = arith.constant 0 : index
    %164 = vector.load %arg14[%c0_62, %c0_63] : memref<256x128xbf16, #tpu.memory_space<vmem>>, vector<256x128xbf16>
    %165 = arith.truncf %151 : vector<128x128xf32> to vector<128x128xbf16>
    %cst_64 = arith.constant dense<0.000000e+00> : vector<256x128xf32>
    %166 = tpu.matmul %164, %165, %cst_64 {dimension_numbers = #tpu.dot_dimension_numbers<[1], [0], [0], [1], [0, 0, 1, 1], [], []>} : vector<256x128xbf16>, vector<128x128xbf16>, vector<256x128xf32> -> vector<256x128xf32>
    %c0_65 = arith.constant 0 : index
    %c0_66 = arith.constant 0 : index
    %167 = vector.load %arg15[%c0_65, %c0_66] : memref<256x1xf32, #tpu.memory_space<vmem>>, vector<256x1xf32>
    %168 = vector.broadcast %167 : vector<256x1xf32> to vector<256x128xf32>
    %169 = arith.addf %166, %168 : vector<256x128xf32>
    %170 = vector.extract_strided_slice %169 {offsets = [0, 0], sizes = [64, 128], strides = [1, 1]} : vector<256x128xf32> to vector<64x128xf32>
    %cst_67 = arith.constant 0.000000e+00 : f32
    %171 = vector.broadcast %cst_67 : f32 to vector<64x4xf32>
    %172 = tpu.concatenate %170, %171 in 1 : vector<64x128xf32>, vector<64x4xf32> -> vector<64x132xf32>
    %cst_68 = arith.constant 0.000000e+00 : f32
    %173 = vector.broadcast %cst_68 : f32 to vector<64x1xf32>
    %174 = vector.extract_strided_slice %169 {offsets = [64, 0], sizes = [64, 128], strides = [1, 1]} : vector<256x128xf32> to vector<64x128xf32>
    %cst_69 = arith.constant 0.000000e+00 : f32
    %175 = vector.broadcast %cst_69 : f32 to vector<64x3xf32>
    %176 = tpu.concatenate %173, %174, %175 in 1 : vector<64x1xf32>, vector<64x128xf32>, vector<64x3xf32> -> vector<64x132xf32>
    %177 = arith.addf %172, %176 : vector<64x132xf32>
    %cst_70 = arith.constant 0.000000e+00 : f32
    %178 = vector.broadcast %cst_70 : f32 to vector<64x2xf32>
    %179 = vector.extract_strided_slice %169 {offsets = [128, 0], sizes = [64, 128], strides = [1, 1]} : vector<256x128xf32> to vector<64x128xf32>
    %cst_71 = arith.constant 0.000000e+00 : f32
    %180 = vector.broadcast %cst_71 : f32 to vector<64x2xf32>
    %181 = tpu.concatenate %178, %179, %180 in 1 : vector<64x2xf32>, vector<64x128xf32>, vector<64x2xf32> -> vector<64x132xf32>
    %182 = arith.addf %177, %181 : vector<64x132xf32>
    %cst_72 = arith.constant 0.000000e+00 : f32
    %183 = vector.broadcast %cst_72 : f32 to vector<64x3xf32>
    %184 = vector.extract_strided_slice %169 {offsets = [192, 0], sizes = [64, 128], strides = [1, 1]} : vector<256x128xf32> to vector<64x128xf32>
    %cst_73 = arith.constant 0.000000e+00 : f32
    %185 = vector.broadcast %cst_73 : f32 to vector<64x1xf32>
    %186 = tpu.concatenate %183, %184, %185 in 1 : vector<64x3xf32>, vector<64x128xf32>, vector<64x1xf32> -> vector<64x132xf32>
    %187 = arith.addf %182, %186 : vector<64x132xf32>
    %c0_74 = arith.constant 0 : index
    %c0_75 = arith.constant 0 : index
    %188 = vector.load %arg16[%c0_74, %c0_75] : memref<64x132xf32, #tpu.memory_space<vmem>>, vector<64x132xf32>
    %189 = arith.mulf %187, %188 : vector<64x132xf32>
    %190 = vector.extract_strided_slice %189 {offsets = [0, 2], sizes = [64, 128], strides = [1, 1]} : vector<64x132xf32> to vector<64x128xf32>
    %191 = arith.addf %163, %190 : vector<64x128xf32>
    %192 = vector.broadcast %15 : f32 to vector<64x128xf32>
    %193 = arith.mulf %191, %192 : vector<64x128xf32>
    %194 = vector.broadcast %6 : f32 to vector<64x128xf32>
    %195 = arith.addf %193, %194 : vector<64x128xf32>
    %c0_76 = arith.constant 0 : index
    %c0_77 = arith.constant 0 : index
    %c0_78 = arith.constant 0 : index
    %196 = vector.load %arg17[%c0_76, %c0_77, %c0_78] : memref<1x64x128xf32, #tpu.memory_space<vmem>>, vector<1x64x128xf32>
    %197 = vector.shape_cast %196 : vector<1x64x128xf32> to vector<64x128xf32>
    %198 = vector.shape_cast %195 : vector<64x128xf32> to vector<1x64x128xf32>
    tpu.vector_store %arg17[%c0_76, %c0_77, %c0_78], %198 {strides = array<i32>} : memref<1x64x128xf32, #tpu.memory_space<vmem>>, vector<1x64x128xf32>,
    return
  }
  func.func @transform_0(%arg0: i32) -> (i32, i32, i32) {
    %c0_i32 = arith.constant 0 : i32
    %c0_i32_0 = arith.constant 0 : i32
    %c0_i32_1 = arith.constant 0 : i32
    return %arg0, %c0_i32, %c0_i32_0 : i32, i32, i32
  }
  func.func @transform_1(%arg0: i32) -> (i32, i32) {
    %c0_i32 = arith.constant 0 : i32
    %c0_i32_0 = arith.constant 0 : i32
    %c0_i32_1 = arith.constant 0 : i32
    return %c0_i32, %c0_i32_0 : i32, i32
  }
  func.func @transform_2(%arg0: i32) -> (i32, i32) {
    %c0_i32 = arith.constant 0 : i32
    %c0_i32_0 = arith.constant 0 : i32
    %c0_i32_1 = arith.constant 0 : i32
    return %c0_i32, %c0_i32_0 : i32, i32
  }
  func.func @transform_3(%arg0: i32) -> (i32, i32) {
    %c0_i32 = arith.constant 0 : i32
    %c0_i32_0 = arith.constant 0 : i32
    %c0_i32_1 = arith.constant 0 : i32
    return %c0_i32, %c0_i32_0 : i32, i32
  }
  func.func @transform_4(%arg0: i32) -> (i32, i32) {
    %c0_i32 = arith.constant 0 : i32
    %c0_i32_0 = arith.constant 0 : i32
    %c0_i32_1 = arith.constant 0 : i32
    return %c0_i32, %c0_i32_0 : i32, i32
  }
  func.func @transform_5(%arg0: i32) -> (i32, i32) {
    %c0_i32 = arith.constant 0 : i32
    %c0_i32_0 = arith.constant 0 : i32
    %c0_i32_1 = arith.constant 0 : i32
    return %c0_i32, %c0_i32_0 : i32, i32
  }
  func.func @transform_6(%arg0: i32) -> (i32, i32) {
    %c0_i32 = arith.constant 0 : i32
    %c0_i32_0 = arith.constant 0 : i32
    %c0_i32_1 = arith.constant 0 : i32
    return %c0_i32, %c0_i32_0 : i32, i32
  }
  func.func @transform_7(%arg0: i32) -> (i32, i32) {
    %c0_i32 = arith.constant 0 : i32
    %c0_i32_0 = arith.constant 0 : i32
    %c0_i32_1 = arith.constant 0 : i32
    return %c0_i32, %c0_i32_0 : i32, i32
  }
  func.func @transform_8(%arg0: i32) -> (i32, i32) {
    %c0_i32 = arith.constant 0 : i32
    %c0_i32_0 = arith.constant 0 : i32
    %c0_i32_1 = arith.constant 0 : i32
    return %c0_i32, %c0_i32_0 : i32, i32
  }
  func.func @transform_9(%arg0: i32) -> (i32, i32) {
    %c0_i32 = arith.constant 0 : i32
    %c0_i32_0 = arith.constant 0 : i32
    %c0_i32_1 = arith.constant 0 : i32
    return %c0_i32, %c0_i32_0 : i32, i32
  }
  func.func @transform_10(%arg0: i32) -> (i32, i32) {
    %c0_i32 = arith.constant 0 : i32
    %c0_i32_0 = arith.constant 0 : i32
    %c0_i32_1 = arith.constant 0 : i32
    return %c0_i32, %c0_i32_0 : i32, i32
  }
  func.func @transform_11(%arg0: i32) -> (i32, i32) {
    %c0_i32 = arith.constant 0 : i32
    %c0_i32_0 = arith.constant 0 : i32
    %c0_i32_1 = arith.constant 0 : i32
    return %c0_i32, %c0_i32_0 : i32, i32
  }
  func.func @transform_12(%arg0: i32) -> (i32, i32) {
    %c0_i32 = arith.constant 0 : i32
    %c0_i32_0 = arith.constant 0 : i32
    %c0_i32_1 = arith.constant 0 : i32
    return %c0_i32, %c0_i32_0 : i32, i32
  }
  func.func @transform_13(%arg0: i32) -> (i32, i32) {
    %c0_i32 = arith.constant 0 : i32
    %c0_i32_0 = arith.constant 0 : i32
    %c0_i32_1 = arith.constant 0 : i32
    return %c0_i32, %c0_i32_0 : i32, i32
  }
  func.func @transform_14(%arg0: i32) -> (i32, i32) {
    %c0_i32 = arith.constant 0 : i32
    %c0_i32_0 = arith.constant 0 : i32
    %c0_i32_1 = arith.constant 0 : i32
    return %c0_i32, %c0_i32_0 : i32, i32
  }
  func.func @transform_15(%arg0: i32) -> (i32, i32) {
    %c0_i32 = arith.constant 0 : i32
    %c0_i32_0 = arith.constant 0 : i32
    %c0_i32_1 = arith.constant 0 : i32
    return %c0_i32, %c0_i32_0 : i32, i32
  }
  func.func @transform_16(%arg0: i32) -> (i32, i32, i32) {
    %c0_i32 = arith.constant 0 : i32
    %c0_i32_0 = arith.constant 0 : i32
    %c0_i32_1 = arith.constant 0 : i32
    return %arg0, %c0_i32, %c0_i32_0 : i32, i32, i32
  }
}

</mosaic_0001>

<bundles_post_ra>
// kernel: hdemucs_forward.1
= control target key start
LH: loop header
LB: loop body
LE: loop exit
PB: predicated region body
PF: predicated region fallthrough
CT: control target
= control target key end

     0   :  { %s4781_s21 = smov 0   ;;  %s6571_s0 = inlined_call_operand.vmem [shape: f32[2,32,128], index: 0, kind: input, shape index: {}]   ;;  %s6572_s1 = inlined_call_operand.vmem [shape: bf16[192,128], index: 1, kind: input, shape index: {}]   ;;  %s6573_s2 = inlined_call_operand.vmem [shape: f32[192,1], index: 2, kind: input, shape index: {}]   ;;  %s6574_s3 = inlined_call_operand.vmem [shape: bf16[32,128], index: 3, kind: input, shape index: {}]   ;;  %s6575_s4 = inlined_call_operand.vmem [shape: f32[32,1], index: 4, kind: input, shape index: {}]   ;;  %s6576_s5 = inlined_call_operand.vmem [shape: bf16[64,128], index: 5, kind: input, shape index: {}]   ;;  %s6577_s6 = inlined_call_operand.vmem [shape: f32[64,1], index: 6, kind: input, shape index: {}]   ;;  %s6578_s7 = inlined_call_operand.vmem [shape: bf16[64,96], index: 7, kind: input, shape index: {}]   ;;  %s6579_s8 = inlined_call_operand.vmem [shape: f32[64,1], index: 8, kind: input, shape index: {}]   ;;  %s6580_s9 = inlined_call_operand.vmem [shape: bf16[128,64], index: 9, kind: input, shape index: {}]   ;;  %s6581_s10 = inlined_call_operand.vmem [shape: f32[128,1], index: 10, kind: input, shape index: {}]   ;;  %s6582_s11 = inlined_call_operand.vmem [shape: bf16[64,192], index: 11, kind: input, shape index: {}]   ;;  %s6583_s12 = inlined_call_operand.vmem [shape: f32[64,1], index: 12, kind: input, shape index: {}]   ;;  %s6584_s13 = inlined_call_operand.vmem [shape: bf16[256,128], index: 13, kind: input, shape index: {}]   ;;  %s6585_s14 = inlined_call_operand.vmem [shape: f32[256,1], index: 14, kind: input, shape index: {}]   ;;  %s6586_s15 = inlined_call_operand.vmem [shape: f32[64,132], index: 15, kind: input, shape index: {}]   ;;  %s6587_s16 = inlined_call_operand.vmem [shape: f32[2,64,128], index: 16, kind: output, shape index: {}]  }
   0x1   :  { %6607 = sst [smem:[#allocation11_spill]] %s6571_s0 }
   0x2 LB: > { %s3763_s22 = sadd.s32 4294967295, %s4687_s21   ;;  %p3767_p0 = scmp.ge.s32.totalorder %s4687_s21, 1  ;;  %s4687_s21 = sphi %s4781_s21, %s26_s21  }
   0x3   : > { %p462_p1 = scmp.lt.s32.totalorder %s4687_s21, 3 }
   0x5   : > { %p463_p2 = pnand %p3767_p0, %p462_p1 }
   0x7   : > { %466 = sbr.rel (%p463_p2) target bundleno = 2800 (0xaf0), region = 84 }
   0xe   : > { %p512_p3 = scmp.lt.s32.totalorder %s3763_s22, 1  ;;  %s6608_s26 = sld [smem:[#allocation11_spill]]  ;;  %vm598_vm2 = vcmask 15360   ;;  %vm619_vm5 = vcmask 1039360   ;;  %vm632_vm6 = vcmask 1031168   ;;  %vm645_vm7 = vcmask 1022976  }
   0xf   : > { %s6588_s19 = smov 2   ;;  %vm3784_vm3 = vmneg %vm598_vm2  ;;  %s6597_s20 = smov 127   ;;  %v4500_v50 = vld [vmem:[%s6572_s1 + $0x8] sm:$0xff]   ;;  %vm1315_vm8 = vcmask 7168   ;;  %vm2274_vm11 = vcmask 523264   ;;  %vm1960_vm12 = vcmask 785408  }
  0x10   : > { %s6637_s22 = smov (!%p512_p3, %s3763_s22), 1  ;;  %vm4807_vm4 = vmpackc.low %vm3784_vm3, %vm3784_vm3  ;;  %s4692_s24 = smov 125   ;;  %vm3546_vm13 = vcmask 23552  }
  0x11   : > { %s3894_s23 = sshll.u32 %s6637_s22, 5  ;;  %s4694_s25 = smov 1   ;;  %vm3796_vm9 = vmneg %vm1315_vm8 }
  0x12   : > { %vm5084_vm10 = vmpackc.low %vm3796_vm9, %vm3796_vm9 }
  0x14   : > { %s516_s27 = scalar_lea.vmem %s6608_s26, %s3894_s23  ;;  %s6590_s23 = smov 126  }
  0x15   : > { %v523_v0 = vld [vmem:[%s516_s27] sm:$0xff]  ;;  %v524_v1 = vld [vmem:[%s516_s27 + $0x8] sm:$0xff]  ;;  %v525_v2 = vld [vmem:[%s516_s27 + $0x10] sm:$0xff]  ;;  %s6622_s26 = smov 126  }
  0x16   : > { %v526_v3 = vld [vmem:[%s516_s27 + $0x18] sm:$0xff]  ;;  %v527_v4 = vadd.f32 %v524_v1, %v523_v0 }
  0x18   : > { %v528_v5 = vadd.f32 %v527_v4, %v525_v2  ;;  %v4499_v4 = vld [vmem:[%s6572_s1] sm:$0xff]  }
  0x19   : > { %4000 = vmatprep.mubr.bf16.mxu0 %v4499_v4 }
  0x1a   : > { %v529_v6 = vadd.f32 %v528_v5, %v526_v3  ;;  %v722_v5 = vld [vmem:[%s6573_s2] sm:$0xff] }
  0x1c   : > { %530 = vadd.xlane.f32.xlu0 %v529_v6  ;;  %v6592_v6 = vmov 0  }
  0x1d   : > { %4267 = vset.pattern.permute.xlu1 %v6592_v6  ;;  %4268 = vset.pattern.permute.xlu0 %v6592_v6 }
  0xa9   : > { %v531_v7 = vpop.xlane.xlu0 %530 }
  0xaa   : > { %v532_v8 = vrot.slane %v531_v7, 4 }
  0xac   : > { %v533_v9 = vadd.f32 %v532_v8, %v531_v7  ;;  %v723_v7 = vld [vmem:[%s6573_s2 + $0x8] sm:$0xff]  ;;  %v724_v8 = vld [vmem:[%s6573_s2 + $0x10] sm:$0xff] }
  0xae   : > { %v534_v10 = vrot.slane %v533_v9, 2 }
  0xb0   : > { %v535_v11 = vadd.f32 %v534_v10, %v533_v9  ;;  %v726_v9 = vld [vmem:[%s6573_s2 + $0x20] sm:$0xff]  ;;  %v725_v10 = vld [vmem:[%s6573_s2 + $0x18] sm:$0xff] }
  0xb2   : > { %v536_v12 = vrot.slane %v535_v11, 1 }
  0xb4   : > { %v537_v13 = vadd.f32 %v536_v12, %v535_v11  ;;  %v728_v11 = vld [vmem:[%s6573_s2 + $0x30] sm:$0xff]  ;;  %v727_v12 = vld [vmem:[%s6573_s2 + $0x28] sm:$0xff] }
  0xb6   : > { %4176 = vpush %v537_v13  ;;  %v729_v13 = vld [vmem:[%s6573_s2 + $0x38] sm:$0xff] }
  0xe7   : > { %s4177_s28 = spop %4176 }
  0xe8   : > { %s541_s29 = smul.f32 0.00024414063, %s4177_s28 }
  0xea   : > { %v4795_v14 = vstv %s541_s29  ;;  %s6632_s29 = smov 127  }
  0xeb   : > { %6609 = vst [vmem:[#allocation2_spill] sm:$0xff] %v4795_v14  ;;  %v543_v15 = vsub.f32 %v523_v0, %v4795_v14  ;;  %v544_v16 = vsub.f32 %v524_v1, %v4795_v14  ;;  %v545_v17 = vsub.f32 %v525_v2, %v4795_v14  ;;  %v546_v18 = vsub.f32 %v526_v3, %v4795_v14 }
  0xed   : > { %v547_v19 = vmul.f32 %v543_v15, %v543_v15  ;;  %v548_v20 = vmul.f32 %v544_v16, %v544_v16  ;;  %v549_v21 = vmul.f32 %v545_v17, %v545_v17  ;;  %v550_v23 = vmul.f32 %v546_v18, %v546_v18 }
  0xef   : > { %v551_v22 = vadd.f32 %v548_v20, %v547_v19 }
  0xf1   : > { %v552_v24 = vadd.f32 %v551_v22, %v549_v21 }
  0xf3   : > { %v553_v25 = vadd.f32 %v552_v24, %v550_v23 }
  0xf5   : > { %554 = vadd.xlane.f32.xlu0 %v553_v25 }
 0x182   : > { %v555_v26 = vpop.xlane.xlu0 %554 }
 0x183   : > { %v556_v27 = vrot.slane %v555_v26, 4 }
 0x185   : > { %v557_v28 = vadd.f32 %v556_v27, %v555_v26 }
 0x187   : > { %v558_v29 = vrot.slane %v557_v28, 2 }
 0x189   : > { %v559_v30 = vadd.f32 %v558_v29, %v557_v28 }
 0x18b   : > { %v560_v31 = vrot.slane %v559_v30, 1 }
 0x18d   : > { %v561_v32 = vadd.f32 %v560_v31, %v559_v30 }
 0x18f   : > { %4178 = vpush %v561_v32 }
 0x1c0   : > { %s4179_s30 = spop %4178 }
 0x1c1   : > { %s565_s0 = smul.f32 0.00024420026, %s4179_s30 }
 0x1c3   : > { %v566_v33 = vstv %s565_s0 }
 0x1c4   : > { %4557 = vrsqrt.f32 %v566_v33  ;;  %vm569_vm0 = vcmp.eq.f32.partialorder %v566_v33, inf  ;;  %v572_v36 = vand.u32 2147483648, %v566_v33  ;;  %vm571_vm1 = vcmp.eq.f32.partialorder %v566_v33, 0.0 }
 0x1ce   : > { %v4558_v34 = vpop.eup %4557 }
 0x1cf   : > { %v568_v35 = vmul.f32 %v4558_v34, %v566_v33 }
 0x1d1   : > { %v570_v37 = vsel %vm569_vm0, %v566_v33, %v568_v35 }
 0x1d2   : > { %v573_v38 = vsel %vm571_vm1, %v572_v36, %v570_v37 }
 0x1d3   : > { %4180 = vpush %v573_v38 }
 0x204   : > { %s4801_s17 = spop %4180 }
 0x205   : > { %s575_s18 = sadd.f32 1e-05, %s4801_s17 }
 0x207   : > { %v576_v39 = vstv %s575_s18 }
 0x208   : > { %4559 = vrcp.f32 %v576_v39 }
 0x212   : > { %v4560_v40 = vpop.eup %4559 }
 0x213   : > { %v578_v41 = vmul.f32 %v4560_v40, %v543_v15  ;;  %v579_v42 = vmul.f32 %v4560_v40, %v544_v16  ;;  %v580_v44 = vmul.f32 %v4560_v40, %v545_v17  ;;  %v581_v45 = vmul.f32 %v4560_v40, %v546_v18 }
 0x215   : > { %v4197_v43 = vpack.i.bf16 %v579_v42, %v578_v41  ;;  %v4202_v46 = vpack.i.bf16 %v581_v45, %v580_v44 }
 0x217   : > { %4198 = vrot.lane.b32.xlu1 %v4197_v43, %s6588_s19 }
 0x21b   : > { %4203 = vrot.lane.b32.xlu1 %v4202_v46, %s6588_s19 }
 0x289   : > { %v4199_v47 = vpop.permute.xlu1 %4198 }
 0x28a   : > { %v4201_v48 = vunpack.i.h.bf16 %v4199_v47  ;;  %v4200_v49 = vunpack.i.l.bf16 %v4199_v47 }
 0x28c   : > { %v3787_v51 = vpack.c.bf16 %v4201_v48, %v4200_v49  ;;  %v600_v52 = vsel %vm598_vm2, 0.0, %v4201_v48  ;;  %v604_v53 = vsel %vm598_vm2, %v4201_v48, 0.0  ;;  %v599_v54 = vsel %vm598_vm2, 0.0, %v4200_v49 }
 0x28d   : > { %v4204_v55 = vpop.permute.xlu1 %4203  ;;  %v4212_v56 = vpack.i.bf16 %v604_v53, %v600_v52  ;;  %v603_v57 = vsel %vm598_vm2, %v4200_v49, 0.0 }
 0x28e   : > { %v4206_v58 = vunpack.i.h.bf16 %v4204_v55  ;;  %v4205_v59 = vunpack.i.l.bf16 %v4204_v55  ;;  %3984 = vmatprep.subr.msk.bf16.mxu0 %vm4807_vm4, %v3787_v51  ;;  %v4207_v60 = vpack.i.bf16 %v603_v57, %v599_v54 }
 0x28f   : > { %4213 = vrot.lane.b32.xlu1 %v4212_v56, %s6597_s20  ;;  %3985 = vmatpush3.bf16.msk.msra.mxu0 %vm4807_vm4, %v3787_v51 }
 0x290   : > { %4208 = vrot.lane.b32.xlu0 %v4207_v60, %s6597_s20  ;;  %v602_v61 = vsel %vm598_vm2, 0.0, %v4206_v58  ;;  %v606_v62 = vsel %vm598_vm2, %v4206_v58, 0.0  ;;  %v4823_v0 = vpack.c.bf16 %v4206_v58, %v4205_v59  ;;  %v601_v1 = vsel %vm598_vm2, 0.0, %v4205_v59 }
 0x291   : > { %v4242_v63 = vpack.i.bf16 %v606_v62, %v602_v61  ;;  %v605_v2 = vsel %vm598_vm2, %v4205_v59, 0.0 }
 0x292   : > { %v4237_v3 = vpack.i.bf16 %v605_v2, %v601_v1 }
 0x293   : > { %4218 = vrot.lane.b32.xlu1 %v4207_v60, %s6590_s23 }
 0x294   : > { %4243 = vrot.lane.b32.xlu0 %v4242_v63, %s6597_s20 }
 0x297   : > { %4223 = vrot.lane.b32.xlu1 %v4212_v56, %s6590_s23 }
 0x298   : > { %4253 = vrot.lane.b32.xlu0 %v4242_v63, %s6590_s23 }
 0x29b   : > { %4228 = vrot.lane.b32.xlu1 %v4207_v60, %s4692_s24 }
 0x29c   : > { %4263 = vrot.lane.b32.xlu0 %v4242_v63, %s4692_s24 }
 0x29f   : > { %4233 = vrot.lane.b32.xlu1 %v4212_v56, %s4692_s24 }
 0x2a0   : > { %753 = vperm.xlu0 %4268, %v723_v7  }
 0x2a3   : > { %4238 = vrot.lane.b32.xlu1 %v4237_v3, %s6597_s20 }
 0x2a4   : > { %768 = vperm.xlu0 %4268, %v726_v9   ;;  %v4503_v9 = vld [vmem:[%s6572_s1 + $0x20] sm:$0xff]  }
 0x2a7   : > { %4248 = vrot.lane.b32.xlu1 %v4237_v3, %s6590_s23 }
 0x2a8   : > { %778 = vperm.xlu0 %4268, %v728_v11   ;;  %v4505_v11 = vld [vmem:[%s6572_s1 + $0x30] sm:$0xff]  }
 0x2ab   : > { %4258 = vrot.lane.b32.xlu1 %v4237_v3, %s4692_s24 }
 0x2af   : > { %748 = vperm.xlu1 %4267, %v722_v5  }
 0x2b3   : > { %758 = vperm.xlu1 %4267, %v724_v8   ;;  %v4502_v8 = vld [vmem:[%s6572_s1 + $0x18] sm:$0xff]  }
 0x2b7   : > { %763 = vperm.xlu1 %4267, %v725_v10   ;;  %v4504_v10 = vld [vmem:[%s6572_s1 + $0x28] sm:$0xff]  }
 0x2bb   : > { %773 = vperm.xlu1 %4267, %v727_v12   ;;  %v4506_v12 = vld [vmem:[%s6572_s1 + $0x38] sm:$0xff]  }
 0x2bf   : > { %783 = vperm.xlu1 %4267, %v729_v13   ;;  %v4507_v13 = vld [vmem:[%s6572_s1 + $0x40] sm:$0xff]  }
 0x301   : > { %v4214_v15 = vpop.permute.xlu1 %4213 }
 0x302   : > { %v4216_v16 = vunpack.i.h.bf16 %v4214_v15  ;;  %v4215_v17 = vunpack.i.l.bf16 %v4214_v15  ;;  %v4209_v18 = vpop.permute.xlu0 %4208  ;;  %v4508_v15 = vld [vmem:[%s6572_s1 + $0x48] sm:$0xff]  }
 0x303   : > { %v4211_v19 = vunpack.i.h.bf16 %v4209_v18  ;;  %v4210_v20 = vunpack.i.l.bf16 %v4209_v18 }
 0x304   : > { %v621_v21 = vsel %vm619_vm5, %v4215_v17, %v4216_v16  ;;  %v4509_v16 = vld [vmem:[%s6572_s1 + $0x50] sm:$0xff]   ;;  %v4510_v17 = vld [vmem:[%s6572_s1 + $0x58] sm:$0xff]  }
 0x305   : > { %v4219_v22 = vpop.permute.xlu1 %4218  ;;  %v620_v23 = vsel %vm619_vm5, %v4210_v20, %v4211_v19 }
 0x306   : > { %v715_v24 = vpack.c.bf16 %v621_v21, %v620_v23  ;;  %v4221_v25 = vunpack.i.h.bf16 %v4219_v22  ;;  %v4220_v26 = vunpack.i.l.bf16 %v4219_v22  ;;  %v4244_v34 = vpop.permute.xlu0 %4243 }
 0x307   : > { %v4246_v45 = vunpack.i.h.bf16 %v4244_v34  ;;  %v4245_v46 = vunpack.i.l.bf16 %v4244_v34 }
 0x308   : > { %3986 = vmatprep.subr.bf16.mxu0 %v715_v24  ;;  %v633_v30 = vsel %vm632_vm6, %v4220_v26, %v4221_v25 }
 0x309   : > { %3987 = vmatpush3.bf16.msra.mxu0 %v715_v24  ;;  %v4224_v27 = vpop.permute.xlu1 %4223  ;;  %v663_v56 = vsel %vm619_vm5, %v4245_v46, %v4246_v45 }
 0x30a   : > { %v4226_v28 = vunpack.i.h.bf16 %v4224_v27  ;;  %v4225_v29 = vunpack.i.l.bf16 %v4224_v27  ;;  %v4254_v42 = vpop.permute.xlu0 %4253 }
 0x30b   : > { %v4256_v51 = vunpack.i.h.bf16 %v4254_v42  ;;  %v4255_v52 = vunpack.i.l.bf16 %v4254_v42 }
 0x30c   : > { %v634_v31 = vsel %vm632_vm6, %v4225_v29, %v4226_v28 }
 0x30d   : > { %v4229_v32 = vpop.permute.xlu1 %4228  ;;  %v716_v33 = vpack.c.bf16 %v634_v31, %v633_v30  ;;  %v675_v61 = vsel %vm632_vm6, %v4255_v52, %v4256_v51 }
 0x30e   : > { %v4231_v35 = vunpack.i.h.bf16 %v4229_v32  ;;  %v4230_v36 = vunpack.i.l.bf16 %v4229_v32  ;;  %v4264_v57 = vpop.permute.xlu0 %4263 }
 0x30f   : > { %3988 = vmatprep.subr.bf16.mxu0 %v716_v33  ;;  %v4266_v62 = vunpack.i.h.bf16 %v4264_v57  ;;  %v4265_v63 = vunpack.i.l.bf16 %v4264_v57 }
 0x310   : > { %3989 = vmatpush3.bf16.msra.mxu0 %v716_v33  ;;  %v646_v40 = vsel %vm645_vm7, %v4230_v36, %v4231_v35 }
 0x311   : > { %v4234_v37 = vpop.permute.xlu1 %4233  ;;  %v687_v5 = vsel %vm645_vm7, %v4265_v63, %v4266_v62 }
 0x312   : > { %v4236_v38 = vunpack.i.h.bf16 %v4234_v37  ;;  %v4235_v39 = vunpack.i.l.bf16 %v4234_v37 }
 0x314   : > { %v647_v41 = vsel %vm645_vm7, %v4235_v39, %v4236_v38 }
 0x315   : > { %v4239_v43 = vpop.permute.xlu1 %4238  ;;  %v717_v44 = vpack.c.bf16 %v647_v41, %v646_v40 }
 0x316   : > { %v4241_v47 = vunpack.i.h.bf16 %v4239_v43  ;;  %v4240_v48 = vunpack.i.l.bf16 %v4239_v43 }
 0x317   : > { %3990 = vmatprep.subr.bf16.mxu0 %v717_v44 }
 0x318   : > { %3991 = vmatpush3.bf16.msra.mxu0 %v717_v44  ;;  %v662_v49 = vsel %vm619_vm5, %v4240_v48, %v4241_v47 }
 0x319   : > { %v4249_v53 = vpop.permute.xlu1 %4248  ;;  %3992 = vmatprep.subr.msk.bf16.mxu0 %vm4807_vm4, %v4823_v0  ;;  %v719_v58 = vpack.c.bf16 %v663_v56, %v662_v49 }
 0x31a   : > { %v4251_v54 = vunpack.i.h.bf16 %v4249_v53  ;;  %v4250_v55 = vunpack.i.l.bf16 %v4249_v53 }
 0x31c   : > { %3993 = vmatpush3.bf16.msk.msra.mxu0 %vm4807_vm4, %v4823_v0  ;;  %v674_v59 = vsel %vm632_vm6, %v4250_v55, %v4251_v54  ;;  %v4501_v0 = vld [vmem:[%s6572_s1 + $0x10] sm:$0xff]  }
 0x31d   : > { %v4259_v60 = vpop.permute.xlu1 %4258  ;;  %3994 = vmatprep.subr.bf16.mxu0 %v719_v58  ;;  %v720_v3 = vpack.c.bf16 %v675_v61, %v674_v59 }
 0x31e   : > { %v4261_v1 = vunpack.i.h.bf16 %v4259_v60  ;;  %v4260_v2 = vunpack.i.l.bf16 %v4259_v60 }
 0x31f   : > { %v754_v20 = vpop.permute.xlu0 %753 }
 0x320   : > { %3995 = vmatpush3.bf16.msra.mxu0 %v719_v58  ;;  %v686_v4 = vsel %vm645_vm7, %v4260_v2, %v4261_v1 }
 0x321   : > { %3996 = vmatprep.subr.bf16.mxu0 %v720_v3  ;;  %v721_v7 = vpack.c.bf16 %v687_v5, %v686_v4 }
 0x323   : > { %v769_v25 = vpop.permute.xlu0 %768 }
 0x324   : > { %3997 = vmatpush3.bf16.msra.mxu0 %v720_v3 }
 0x325   : > { %3998 = vmatprep.subr.bf16.mxu0 %v721_v7 }
 0x327   : > { %v779_v41 = vpop.permute.xlu0 %778 }
 0x328   : > { %3999 = vmatpush3.bf16.msra.mxu0 %v721_v7 }
 0x32b   : > { %4001 = vmatmul.mubr.bf16.vlgmr.msra.gmra.mrb[0].mxu0 %v4500_v50 }
 0x32c   : > { %4004 = vmatprep.mubr.bf16.mxu0 %v4501_v0 }
 0x32e   : > { %v749_v18 = vpop.permute.xlu1 %748 }
 0x332   : > { %v759_v19 = vpop.permute.xlu1 %758 }
 0x333   : > { %4005 = vmatmul.mubr.bf16.gmra.mrb[4].mxu0 %v4502_v8 }
 0x334   : > { %4008 = vmatprep.mubr.bf16.mxu0 %v4503_v9 }
 0x336   : > { %v764_v21 = vpop.permute.xlu1 %763 }
 0x33a   : > { %v774_v31 = vpop.permute.xlu1 %773 }
 0x33b   : > { %4009 = vmatmul.mubr.bf16.gmra.mrb[8].mxu0 %v4504_v10 }
 0x33c   : > { %4012 = vmatprep.mubr.bf16.mxu0 %v4505_v11 }
 0x33e   : > { %v784_v48 = vpop.permute.xlu1 %783 }
 0x343   : > { %4013 = vmatmul.mubr.bf16.gmra.mrb[12].mxu0 %v4506_v12 }
 0x344   : > { %4016 = vmatprep.mubr.bf16.mxu0 %v4507_v13 }
 0x34b   : > { %4017 = vmatmul.mubr.bf16.gmra.mrb[16].mxu0 %v4508_v15 }
 0x34c   : > { %4020 = vmatprep.mubr.bf16.mxu0 %v4509_v16 }
 0x353   : > { %4021 = vmatmul.mubr.bf16.gmra.mrb[20].mxu0 %v4510_v17 }
 0x3fe   : > { %v4002_v22 = vpop.f32.mrb[0].mxu0 }
 0x3ff   : > { %v4913_v23 = vadd.f32 %v4002_v22, %v759_v19  ;;  %v972_v24 = vpop.f32.mrb[1].mxu0 }
 0x400   : > { %v4915_v26 = vadd.f32 %v972_v24, %v749_v18  ;;  %v4003_v27 = vpop.f32.mrb[2].mxu0 }
 0x401   : > { %v1069_v28 = vmul.f32 %v4913_v23, %v4913_v23  ;;  %v4919_v29 = vadd.f32 %v4003_v27, %v764_v21  ;;  %v975_v30 = vpop.f32.mrb[3].mxu0 }
 0x402   : > { %v1067_v32 = vmul.f32 %v4915_v26, %v4915_v26  ;;  %v4923_v33 = vadd.f32 %v975_v30, %v754_v20 }
 0x403   : > { %v1093_v34 = vmul.f32 %v1069_v28, %v4913_v23  ;;  %v1070_v35 = vmul.f32 %v4919_v29, %v4919_v29 }
 0x404   : > { %v1091_v36 = vmul.f32 %v1067_v32, %v4915_v26  ;;  %v1068_v37 = vmul.f32 %v4923_v33, %v4923_v33 }
 0x405   : > { %v1117_v38 = vmul.f32 0.044715, %v1093_v34  ;;  %v1094_v39 = vmul.f32 %v1070_v35, %v4919_v29 }
 0x406   : > { %v1115_v40 = vmul.f32 0.044715, %v1091_v36  ;;  %v1092_v42 = vmul.f32 %v1068_v37, %v4923_v33  ;;  %v4006_v43 = vpop.f32.mrb[4].mxu0 }
 0x407   : > { %v1141_v44 = vadd.f32 %v1117_v38, %v4913_v23  ;;  %v1118_v45 = vmul.f32 0.044715, %v1094_v39  ;;  %v4934_v46 = vadd.f32 %v4006_v43, %v779_v41  ;;  %v988_v47 = vpop.f32.mrb[5].mxu0 }
 0x408   : > { %v1139_v49 = vadd.f32 %v1115_v40, %v4915_v26  ;;  %v1116_v51 = vmul.f32 0.044715, %v1092_v42  ;;  %v4937_v52 = vadd.f32 %v988_v47, %v769_v25  ;;  %v4007_v53 = vpop.f32.mrb[6].mxu0 }
 0x409   : > { %v1165_v54 = vmul.f32 0.7978846, %v1141_v44  ;;  %v1142_v55 = vadd.f32 %v1118_v45, %v4919_v29  ;;  %v1073_v56 = vmul.f32 %v4934_v46, %v4934_v46  ;;  %v4942_v57 = vadd.f32 %v4007_v53, %v784_v48  ;;  %v991_v58 = vpop.f32.mrb[7].mxu0 }
 0x40a   : > { %v1163_v59 = vmul.f32 0.7978846, %v1139_v49  ;;  %v1140_v60 = vadd.f32 %v1116_v51, %v4923_v33  ;;  %v1071_v61 = vmul.f32 %v4937_v52, %v4937_v52  ;;  %v4947_v62 = vadd.f32 %v991_v58, %v774_v31 }
 0x40b   : > { %4561 = vtanh.f32 %v1165_v54  ;;  %v1166_v63 = vmul.f32 0.7978846, %v1142_v55  ;;  %v1097_v1 = vmul.f32 %v1073_v56, %v4934_v46  ;;  %v1074_v2 = vmul.f32 %v4942_v57, %v4942_v57 }
 0x40c   : > { %4563 = vtanh.f32 %v1163_v59  ;;  %v1164_v3 = vmul.f32 0.7978846, %v1140_v60  ;;  %v1095_v4 = vmul.f32 %v1071_v61, %v4937_v52  ;;  %v1072_v5 = vmul.f32 %v4947_v62, %v4947_v62 }
 0x40d   : > { %4565 = vtanh.f32 %v1166_v63  ;;  %v1121_v7 = vmul.f32 0.044715, %v1097_v1  ;;  %v1098_v50 = vmul.f32 %v1074_v2, %v4942_v57  ;;  %v733_v63 = vld [vmem:[%s6573_s2 + $0x58] sm:$0xff]  ;;  %v732_v1 = vld [vmem:[%s6573_s2 + $0x50] sm:$0xff]  ;;  %v735_v2 = vld [vmem:[%s6573_s2 + $0x68] sm:$0xff] }
 0x40e   : > { %4567 = vtanh.f32 %v1164_v3  ;;  %v1119_v0 = vmul.f32 0.044715, %v1095_v4  ;;  %v1096_v8 = vmul.f32 %v1072_v5, %v4947_v62  ;;  %v4991_v58 = vpop.f32.mrb[8].mxu0  ;;  %v734_v3 = vld [vmem:[%s6573_s2 + $0x60] sm:$0xff] }
 0x40f   : > { %v1145_v9 = vadd.f32 %v1121_v7, %v4934_v46  ;;  %v1122_v10 = vmul.f32 0.044715, %v1098_v50  ;;  %v737_v7 = vld [vmem:[%s6573_s2 + $0x78] sm:$0xff] }
 0x410   : > { %v1143_v11 = vadd.f32 %v1119_v0, %v4937_v52  ;;  %v1120_v12 = vmul.f32 0.044715, %v1096_v8  ;;  %v736_v0 = vld [vmem:[%s6573_s2 + $0x70] sm:$0xff] }
 0x411   : > { %v1169_v13 = vmul.f32 0.7978846, %v1145_v9  ;;  %v1146_v15 = vadd.f32 %v1122_v10, %v4942_v57  ;;  %v739_v9 = vld [vmem:[%s6573_s2 + $0x88] sm:$0xff]  ;;  %v738_v10 = vld [vmem:[%s6573_s2 + $0x80] sm:$0xff] }
 0x412   : > { %v1167_v16 = vmul.f32 0.7978846, %v1143_v11  ;;  %v1144_v17 = vadd.f32 %v1120_v12, %v4947_v62 }
 0x413   : > { %4569 = vtanh.f32 %v1169_v13  ;;  %v1170_v18 = vmul.f32 0.7978846, %v1146_v15  ;;  %v741_v13 = vld [vmem:[%s6573_s2 + $0x98] sm:$0xff] }
 0x414   : > { %4571 = vtanh.f32 %v1167_v16  ;;  %v1168_v19 = vmul.f32 0.7978846, %v1144_v17  ;;  %v740_v16 = vld [vmem:[%s6573_s2 + $0x90] sm:$0xff] }
 0x415   : > { %v4562_v20 = vpop.eup %4561  ;;  %4573 = vtanh.f32 %v1170_v18  ;;  %v743_v18 = vld [vmem:[%s6573_s2 + $0xa8] sm:$0xff] }
 0x416   : > { %v4564_v21 = vpop.eup %4563  ;;  %4575 = vtanh.f32 %v1168_v19  ;;  %v1213_v22 = vadd.f32 1.0, %v4562_v20  ;;  %v742_v19 = vld [vmem:[%s6573_s2 + $0xa0] sm:$0xff] }
 0x417   : > { %v4566_v24 = vpop.eup %4565  ;;  %v1211_v25 = vadd.f32 1.0, %v4564_v21 }
 0x418   : > { %v4568_v27 = vpop.eup %4567  ;;  %v1214_v28 = vadd.f32 1.0, %v4566_v24  ;;  %v1237_v30 = vmul.f32 0.5, %v1213_v22 }
 0x419   : > { %v1212_v31 = vadd.f32 1.0, %v4568_v27  ;;  %v1235_v32 = vmul.f32 0.5, %v1211_v25 }
 0x41a   : > { %v1238_v34 = vmul.f32 0.5, %v1214_v28  ;;  %v4962_v36 = vmul.f32 %v1237_v30, %v4913_v23 }
 0x41b   : > { %v1236_v35 = vmul.f32 0.5, %v1212_v31  ;;  %v4968_v39 = vmul.f32 %v1235_v32, %v4915_v26 }
 0x41c   : > { %v4965_v37 = vmul.f32 %v1238_v34, %v4919_v29 }
 0x41d   : > { %v4570_v38 = vpop.eup %4569  ;;  %6613 = vst [vmem:[#allocation4_spill] sm:$0xff] %v4968_v39  ;;  %v4971_v40 = vmul.f32 %v1236_v35, %v4923_v33 }
 0x41e   : > { %6612 = vst [vmem:[#allocation3_spill] sm:$0xff] %v4965_v37  ;;  %v4572_v41 = vpop.eup %4571  ;;  %v4274_v42 = vpack.i.bf16 %v4965_v37, %v4962_v36  ;;  %v1217_v43 = vadd.f32 1.0, %v4570_v38 }
 0x41f   : > { %6614 = vst [vmem:[#allocation5_spill] sm:$0xff] %v4971_v40  ;;  %v4574_v44 = vpop.eup %4573  ;;  %v4269_v23 = vpack.i.bf16 %v4971_v40, %v4968_v39  ;;  %v1215_v45 = vadd.f32 1.0, %v4572_v41 }
 0x420   : > { %v4576_v47 = vpop.eup %4575  ;;  %4275 = vrot.lane.b32.xlu1 %v4274_v42, %s4694_s25  ;;  %v1218_v29 = vadd.f32 1.0, %v4574_v44  ;;  %v1241_v26 = vmul.f32 0.5, %v1217_v43 }
 0x421   : > { %4270 = vrot.lane.b32.xlu0 %v4269_v23, %s4694_s25  ;;  %v1216_v33 = vadd.f32 1.0, %v4576_v47  ;;  %v1239_v48 = vmul.f32 0.5, %v1215_v45 }
 0x422   : > { %v1242_v49 = vmul.f32 0.5, %v1218_v29  ;;  %v4980_v53 = vmul.f32 %v1241_v26, %v4934_v46  ;;  %v731_v46 = vld [vmem:[%s6573_s2 + $0x48] sm:$0xff] }
 0x423   : > { %v1240_v51 = vmul.f32 0.5, %v1216_v33  ;;  %v4986_v55 = vmul.f32 %v1239_v48, %v4937_v52  ;;  %v5002_v52 = vpop.f32.mrb[9].mxu0 }
 0x424   : > { %6615 = vst [vmem:[#allocation6_spill] sm:$0xff] %v4980_v53  ;;  %v4983_v54 = vmul.f32 %v1242_v49, %v4942_v57  ;;  %v730_v57 = vld [vmem:[%s6573_s2 + $0x40] sm:$0xff]  ;;  %v5007_v61 = vpop.f32.mrb[10].mxu0 }
 0x425   : > { %6617 = vst [vmem:[#allocation8_spill] sm:$0xff] %v4986_v55  ;;  %v4989_v56 = vmul.f32 %v1240_v51, %v4947_v62  ;;  %v5009_v62 = vpop.f32.mrb[11].mxu0 }
 0x426   : > { %6616 = vst [vmem:[#allocation7_spill] sm:$0xff] %v4983_v54  ;;  %v4284_v59 = vpack.i.bf16 %v4983_v54, %v4980_v53  ;;  %v5023_v4 = vpop.f32.mrb[12].mxu0 }
 0x427   : > { %6618 = vst [vmem:[#allocation9_spill] sm:$0xff] %v4989_v56  ;;  %v4279_v60 = vpack.i.bf16 %v4989_v56, %v4986_v55  ;;  %v5025_v5 = vpop.f32.mrb[13].mxu0 }
 0x428   : > { %4285 = vrot.lane.b32.xlu1 %v4284_v59, %s4694_s25  ;;  %v5030_v50 = vpop.f32.mrb[14].mxu0 }
 0x429   : > { %4280 = vrot.lane.b32.xlu0 %v4279_v60, %s4694_s25  ;;  %v5035_v8 = vpop.f32.mrb[15].mxu0 }
 0x42a   : > { %v5043_v11 = vpop.f32.mrb[16].mxu0 }
 0x42b   : > { %v5045_v12 = vpop.f32.mrb[17].mxu0 }
 0x42c   : > { %793 = vperm.xlu1 %4267, %v731_v46   ;;  %v5050_v15 = vpop.f32.mrb[18].mxu0  ;;  %v6619_v46 = vmov 0 }
 0x42d   : > { %788 = vperm.xlu0 %4268, %v730_v57   ;;  %v5055_v17 = vpop.f32.mrb[19].mxu0  ;;  %v6620_v46 = vsel %vm5084_vm10, 4294967295, %v6619_v46 }
 0x42e   : > { %v5063_v20 = vpop.f32.mrb[20].mxu0  ;;  %6621 = vst [vmem:[#allocation10_spill] sm:$0xff] %v6620_v46 }
 0x42f   : > { %v5065_v21 = vpop.f32.mrb[21].mxu0 }
 0x430   : > { %803 = vperm.xlu1 %4267, %v733_v63   ;;  %v5067_v22 = vpop.f32.mrb[22].mxu0 }
 0x431   : > { %798 = vperm.xlu0 %4268, %v732_v1   ;;  %v5069_v24 = vpop.f32.mrb[23].mxu0 }
 0x434   : > { %813 = vperm.xlu1 %4267, %v735_v2  }
 0x435   : > { %808 = vperm.xlu0 %4268, %v734_v3  }
 0x438   : > { %823 = vperm.xlu1 %4267, %v737_v7  }
 0x439   : > { %818 = vperm.xlu0 %4268, %v736_v0  }
 0x43c   : > { %833 = vperm.xlu1 %4267, %v739_v9  }
 0x43d   : > { %828 = vperm.xlu0 %4268, %v738_v10  }
 0x440   : > { %843 = vperm.xlu1 %4267, %v741_v13  }
 0x441   : > { %838 = vperm.xlu0 %4268, %v740_v16  }
 0x444   : > { %853 = vperm.xlu1 %4267, %v743_v18  }
 0x445   : > { %848 = vperm.xlu0 %4268, %v742_v19  }
 0x492   : > { %v4276_v25 = vpop.permute.xlu1 %4275 }
 0x493   : > { %v4278_v27 = vunpack.i.h.bf16 %v4276_v25  ;;  %v4277_v28 = vunpack.i.l.bf16 %v4276_v25  ;;  %v4271_v30 = vpop.permute.xlu0 %4270 }
 0x494   : > { %v4273_v31 = vunpack.i.h.bf16 %v4271_v30  ;;  %v4272_v32 = vunpack.i.l.bf16 %v4271_v30  ;;  %v1570_v30 = vld [vmem:[%s6577_s6 + $0x8] sm:$0xff] }
 0x495   : > { %v1319_v34 = vsel %vm1315_vm8, 0.0, %v4278_v27  ;;  %v1327_v35 = vsel %vm1315_vm8, %v4278_v27, 0.0  ;;  %v1318_v38 = vsel %vm1315_vm8, 0.0, %v4277_v28  ;;  %v1326_v41 = vsel %vm1315_vm8, %v4277_v28, 0.0  ;;  %v745_v27 = vld [vmem:[%s6573_s2 + $0xb8] sm:$0xff]  ;;  %v744_v28 = vld [vmem:[%s6573_s2 + $0xb0] sm:$0xff] }
 0x496   : > { %v4299_v42 = vpack.i.bf16 %v1327_v35, %v1319_v34  ;;  %v4289_v43 = vpack.i.bf16 %v1326_v41, %v1318_v38  ;;  %v1317_v44 = vsel %vm1315_vm8, 0.0, %v4273_v31  ;;  %v1325_v23 = vsel %vm1315_vm8, %v4273_v31, 0.0  ;;  %v1569_v31 = vld [vmem:[%s6577_s6] sm:$0xff]  ;;  %v1433_v35 = vld [vmem:[%s6575_s4 + $0x8] sm:$0xff] }
 0x497   : > { %v1316_v45 = vsel %vm1315_vm8, 0.0, %v4272_v32  ;;  %v1324_v47 = vsel %vm1315_vm8, %v4272_v32, 0.0  ;;  %v4304_v26 = vpack.i.bf16 %v1325_v23, %v1317_v44  ;;  %v1574_v32 = vld [vmem:[%s6577_s6 + $0x28] sm:$0xff]  ;;  %v1573_v34 = vld [vmem:[%s6577_s6 + $0x20] sm:$0xff]  ;;  %v1576_v44 = vld [vmem:[%s6577_s6 + $0x38] sm:$0xff] }
 0x498   : > { %4300 = vrot.lane.b32.xlu1 %v4299_v42, %s6597_s20  ;;  %4290 = vrot.lane.b32.xlu0 %v4289_v43, %s6597_s20  ;;  %v4294_v33 = vpack.i.bf16 %v1324_v47, %v1316_v45  ;;  %v4511_v38 = vld [vmem:[%s6574_s3] sm:$0xff]   ;;  %v1575_v23 = vld [vmem:[%s6577_s6 + $0x30] sm:$0xff] }
 0x499   : > { %v1432_v41 = vld [vmem:[%s6575_s4] sm:$0xff]  ;;  %4040 = vmatprep.mubr.bf16.mxu1 %v4511_v38  ;;  %v1435_v45 = vld [vmem:[%s6575_s4 + $0x18] sm:$0xff]  ;;  %v1434_v47 = vld [vmem:[%s6575_s4 + $0x10] sm:$0xff] }
 0x49a   : > { %v4286_v29 = vpop.permute.xlu1 %4285 }
 0x49b   : > { %v4288_v48 = vunpack.i.h.bf16 %v4286_v29  ;;  %v4287_v49 = vunpack.i.l.bf16 %v4286_v29  ;;  %v4281_v51 = vpop.permute.xlu0 %4280 }
 0x49c   : > { %v4283_v59 = vunpack.i.h.bf16 %v4281_v51  ;;  %v4282_v60 = vunpack.i.l.bf16 %v4281_v51  ;;  %4305 = vrot.lane.b32.xlu1 %v4304_v26, %s6597_s20  ;;  %4295 = vrot.lane.b32.xlu0 %v4294_v33, %s6597_s20 }
 0x49d   : > { %v1323_v57 = vsel %vm1315_vm8, 0.0, %v4288_v48  ;;  %v1331_v63 = vsel %vm1315_vm8, %v4288_v48, 0.0  ;;  %v1322_v1 = vsel %vm1315_vm8, 0.0, %v4287_v49  ;;  %v1330_v2 = vsel %vm1315_vm8, %v4287_v49, 0.0 }
 0x49e   : > { %v3799_v3 = vpack.c.bf16 %v4283_v59, %v4282_v60  ;;  %v4324_v7 = vpack.i.bf16 %v1331_v63, %v1323_v57  ;;  %v4309_v0 = vpack.i.bf16 %v1330_v2, %v1322_v1  ;;  %v1321_v9 = vsel %vm1315_vm8, 0.0, %v4283_v59 }
 0x49f   : > { %v1329_v10 = vsel %vm1315_vm8, %v4283_v59, 0.0  ;;  %v3804_v13 = vpack.c.bf16 %v4288_v48, %v4287_v49  ;;  %v1320_v16 = vsel %vm1315_vm8, 0.0, %v4282_v60  ;;  %v1328_v18 = vsel %vm1315_vm8, %v4282_v60, 0.0 }
 0x4a0   : > { %4024 = vmatprep.subr.msk.bf16.mxu1 %vm5084_vm10, %v3799_v3  ;;  %4325 = vrot.lane.b32.xlu1 %v4324_v7, %s6597_s20  ;;  %v4329_v19 = vpack.i.bf16 %v1329_v10, %v1321_v9  ;;  %v4314_v25 = vpack.i.bf16 %v1328_v18, %v1320_v16 }
 0x4a1   : > { %4310 = vrot.lane.b32.xlu0 %v4309_v0, %s6597_s20  ;;  %4025 = vmatpush3.bf16.msk.msra.mxu1 %vm5084_vm10, %v3799_v3 }
 0x4a2   : > { %4026 = vmatprep.subr.msk.bf16.mxu1 %vm5084_vm10, %v3804_v13 }
 0x4a4   : > { %4330 = vrot.lane.b32.xlu1 %v4329_v19, %s6597_s20 }
 0x4a5   : > { %4315 = vrot.lane.b32.xlu0 %v4314_v25, %s6597_s20  ;;  %4027 = vmatpush3.bf16.msk.msra.mxu1 %vm5084_vm10, %v3804_v13 }
 0x4a8   : > { %4335 = vrot.lane.b32.xlu1 %v4304_v26, %s6590_s23 }
 0x4a9   : > { %4320 = vrot.lane.b32.xlu0 %v4294_v33, %s6590_s23 }
 0x4ab   : > { %v794_v29 = vpop.permute.xlu1 %793 }
 0x4ac   : > { %863 = vperm.xlu1 %4267, %v745_v27   ;;  %v789_v26 = vpop.permute.xlu0 %788  ;;  %v5158_v57 = vadd.f32 %v5009_v62, %v794_v29 }
 0x4ad   : > { %858 = vperm.xlu0 %4268, %v744_v28   ;;  %v5161_v63 = vadd.f32 %v5002_v52, %v789_v26 }
 0x4ae   : > { %v1076_v3 = vmul.f32 %v5158_v57, %v5158_v57 }
 0x4af   : > { %v804_v33 = vpop.permute.xlu1 %803  ;;  %v1075_v0 = vmul.f32 %v5161_v63, %v5161_v63 }
 0x4b0   : > { %4345 = vrot.lane.b32.xlu1 %v4299_v42, %s6590_s23  ;;  %v1572_v42 = vld [vmem:[%s6577_s6 + $0x18] sm:$0xff]  ;;  %v799_v48 = vpop.permute.xlu0 %798  ;;  %v5166_v7 = vadd.f32 %v5007_v61, %v804_v33  ;;  %v1100_v62 = vmul.f32 %v1076_v3, %v5158_v57 }
 0x4b1   : > { %4340 = vrot.lane.b32.xlu0 %v4289_v43, %s6590_s23  ;;  %v1571_v43 = vld [vmem:[%s6577_s6 + $0x10] sm:$0xff]  ;;  %v5171_v9 = vadd.f32 %v4991_v58, %v799_v48  ;;  %v1099_v16 = vmul.f32 %v1075_v0, %v5161_v63  ;;  %s6634_s23 = smov 2  }
 0x4b2   : > { %v1078_v52 = vmul.f32 %v5166_v7, %v5166_v7  ;;  %v1124_v18 = vmul.f32 0.044715, %v1100_v62 }
 0x4b3   : > { %v814_v49 = vpop.permute.xlu1 %813  ;;  %v1077_v61 = vmul.f32 %v5171_v9, %v5171_v9  ;;  %v1123_v25 = vmul.f32 0.044715, %v1099_v16 }
 0x4b4   : > { %1584 = vperm.xlu1 %4267, %v1570_v30   ;;  %v809_v51 = vpop.permute.xlu0 %808  ;;  %v1102_v19 = vmul.f32 %v1078_v52, %v5166_v7  ;;  %v5184_v27 = vadd.f32 %v5035_v8, %v814_v49 }
 0x4b5   : > { %1579 = vperm.xlu0 %4268, %v1569_v31   ;;  %v1101_v58 = vmul.f32 %v1077_v61, %v5171_v9  ;;  %v5187_v28 = vadd.f32 %v5025_v5, %v809_v51 }
 0x4b7   : > { %v824_v59 = vpop.permute.xlu1 %823  ;;  %v1125_v38 = vmul.f32 0.044715, %v1101_v58  ;;  %v1079_v8 = vmul.f32 %v5187_v28, %v5187_v28 }
 0x4b8   : > { %1604 = vperm.xlu1 %4267, %v1574_v32   ;;  %v819_v60 = vpop.permute.xlu0 %818  ;;  %v1148_v32 = vadd.f32 %v1124_v18, %v5158_v57 }
 0x4b9   : > { %1599 = vperm.xlu0 %4268, %v1573_v34   ;;  %v1126_v34 = vmul.f32 0.044715, %v1102_v19  ;;  %v1149_v48 = vadd.f32 %v1125_v38, %v5171_v9  ;;  %v1103_v51 = vmul.f32 %v1079_v8, %v5187_v28 }
 0x4ba   : > { %v1172_v5 = vmul.f32 0.7978846, %v1148_v32 }
 0x4bb   : > { %v834_v1 = vpop.permute.xlu1 %833 }
 0x4bc   : > { %1443 = vperm.xlu1 %4267, %v1433_v35   ;;  %v829_v2 = vpop.permute.xlu0 %828  ;;  %v1147_v35 = vadd.f32 %v1123_v25, %v5161_v63  ;;  %v5212_v19 = vadd.f32 %v5055_v17, %v834_v1  ;;  %4577 = vtanh.f32 %v1172_v5 }
 0x4bd   : > { %1438 = vperm.xlu0 %4268, %v1432_v41   ;;  %v1080_v41 = vmul.f32 %v5184_v27, %v5184_v27 }
 0x4be   : > { %v1171_v33 = vmul.f32 0.7978846, %v1147_v35  ;;  %v1084_v5 = vmul.f32 %v5212_v19, %v5212_v19 }
 0x4bf   : > { %v844_v10 = vpop.permute.xlu1 %843  ;;  %v1104_v49 = vmul.f32 %v1080_v41, %v5184_v27  ;;  %v1173_v41 = vmul.f32 0.7978846, %v1149_v48 }
 0x4c0   : > { %1594 = vperm.xlu1 %4267, %v1572_v42   ;;  %v5176_v13 = vpop.permute.xlu0 %838  ;;  %4579 = vtanh.f32 %v1171_v33 }
 0x4c1   : > { %1589 = vperm.xlu0 %4268, %v1571_v43   ;;  %v1128_v8 = vmul.f32 0.044715, %v1104_v49 }
 0x4c3   : > { %v5189_v30 = vpop.permute.xlu1 %853 }
 0x4c4   : > { %1614 = vperm.xlu1 %4267, %v1576_v44   ;;  %v5191_v31 = vpop.permute.xlu0 %848  ;;  %v1150_v44 = vadd.f32 %v1126_v34, %v5166_v7 }
 0x4c5   : > { %1609 = vperm.xlu0 %4268, %v1575_v23   ;;  %v5201_v23 = vadd.f32 %v5030_v50, %v824_v59  ;;  %v5209_v59 = vadd.f32 %v5023_v4, %v819_v60  ;;  %v1127_v4 = vmul.f32 0.044715, %v1103_v51  ;;  %v5221_v60 = vadd.f32 %v5045_v12, %v829_v2 }
 0x4c6   : > { %v1174_v18 = vmul.f32 0.7978846, %v1150_v44  ;;  %v5227_v44 = vadd.f32 %v5050_v15, %v844_v10  ;;  %v1152_v12 = vadd.f32 %v1128_v8, %v5184_v27  ;;  %v5232_v2 = vadd.f32 %v5043_v11, %v5176_v13  ;;  %v4578_v8 = vpop.eup %4577 }
 0x4c7   : > { %v1082_v50 = vmul.f32 %v5201_v23, %v5201_v23  ;;  %v1081_v17 = vmul.f32 %v5209_v59, %v5209_v59  ;;  %v1083_v15 = vmul.f32 %v5221_v60, %v5221_v60 }
 0x4c8   : > { %1453 = vperm.xlu1 %4267, %v1435_v45   ;;  %4581 = vtanh.f32 %v1174_v18  ;;  %v1086_v11 = vmul.f32 %v5227_v44, %v5227_v44 }
 0x4c9   : > { %1448 = vperm.xlu0 %4268, %v1434_v47   ;;  %4583 = vtanh.f32 %v1173_v41 }
 0x50a   : > { %v4301_v42 = vpop.permute.xlu1 %4300  ;;  %v4291_v43 = vpop.permute.xlu0 %4290 }
 0x50b   : > { %v4303_v45 = vunpack.i.h.bf16 %v4301_v42  ;;  %v4302_v47 = vunpack.i.l.bf16 %v4301_v42  ;;  %v4293_v29 = vunpack.i.h.bf16 %v4291_v43  ;;  %v4292_v26 = vunpack.i.l.bf16 %v4291_v43 }
 0x50c   : > { %v1106_v43 = vmul.f32 %v1082_v50, %v5201_v23 }
 0x50d   : > { %v1382_v32 = vsel %vm619_vm5, %v4292_v26, %v4293_v29  ;;  %v1383_v34 = vsel %vm619_vm5, %v4302_v47, %v4303_v45 }
 0x50e   : > { %v4306_v3 = vpop.permute.xlu1 %4305  ;;  %v4296_v0 = vpop.permute.xlu0 %4295  ;;  %v1427_v1 = vpack.c.bf16 %v1383_v34, %v1382_v32 }
 0x50f   : > { %v4308_v62 = vunpack.i.h.bf16 %v4306_v3  ;;  %v4307_v52 = vunpack.i.l.bf16 %v4306_v3  ;;  %v4298_v16 = vunpack.i.h.bf16 %v4296_v0  ;;  %v4297_v61 = vunpack.i.l.bf16 %v4296_v0 }
 0x510   : > { %v1151_v3 = vadd.f32 %v1127_v4, %v5187_v28  ;;  %v5250_v4 = vadd.f32 %v5069_v24, %v5189_v30 }
 0x511   : > { %v1380_v25 = vsel %vm619_vm5, %v4297_v61, %v4298_v16  ;;  %v1381_v58 = vsel %vm619_vm5, %v4307_v52, %v4308_v62  ;;  %v1130_v62 = vmul.f32 0.044715, %v1106_v43  ;;  %v1105_v52 = vmul.f32 %v1081_v17, %v5209_v59  ;;  %v4580_v43 = vpop.eup %4579 }
 0x512   : > { %v4326_v35 = vpop.permute.xlu1 %4325  ;;  %v1426_v38 = vpack.c.bf16 %v1381_v58, %v1380_v25  ;;  %v1108_v16 = vmul.f32 %v1084_v5, %v5212_v19  ;;  %v1085_v58 = vmul.f32 %v5232_v2, %v5232_v2  ;;  %v1176_v5 = vmul.f32 0.7978846, %v1152_v12  ;;  %v4582_v30 = vpop.eup %4581 }
 0x513   : > { %v4311_v42 = vpop.permute.xlu0 %4310  ;;  %v4328_v45 = vunpack.i.h.bf16 %v4326_v35  ;;  %v4327_v47 = vunpack.i.l.bf16 %v4326_v35  ;;  %v1175_v12 = vmul.f32 0.7978846, %v1151_v3 }
 0x514   : > { %4028 = vmatprep.subr.bf16.mxu1 %v1426_v38  ;;  %v4313_v29 = vunpack.i.h.bf16 %v4311_v42  ;;  %v4312_v26 = vunpack.i.l.bf16 %v4311_v42  ;;  %v1107_v42 = vmul.f32 %v1083_v15, %v5221_v60  ;;  %4585 = vtanh.f32 %v1176_v5 }
 0x515   : > { %4029 = vmatpush3.bf16.msra.mxu1 %v1426_v38  ;;  %v1387_v25 = vsel %vm619_vm5, %v4327_v47, %v4328_v45  ;;  %v5254_v45 = vadd.f32 %v5065_v21, %v5191_v31  ;;  %v1088_v31 = vmul.f32 %v5250_v4, %v5250_v4  ;;  %4587 = vtanh.f32 %v1175_v12 }
 0x516   : > { %v4331_v33 = vpop.permute.xlu1 %4330  ;;  %4030 = vmatprep.subr.bf16.mxu1 %v1427_v1  ;;  %v1386_v50 = vsel %vm619_vm5, %v4312_v26, %v4313_v29  ;;  %v1129_v29 = vmul.f32 0.044715, %v1105_v52  ;;  %v1110_v26 = vmul.f32 %v1086_v11, %v5227_v44  ;;  %v1131_v21 = vmul.f32 0.044715, %v1107_v42 }
 0x517   : > { %v4333_v48 = vunpack.i.h.bf16 %v4331_v33  ;;  %v4332_v49 = vunpack.i.l.bf16 %v4331_v33  ;;  %v4316_v51 = vpop.permute.xlu0 %4315  ;;  %v1429_v47 = vpack.c.bf16 %v1387_v25, %v1386_v50  ;;  %v1087_v15 = vmul.f32 %v5254_v45, %v5254_v45 }
 0x518   : > { %v4318_v10 = vunpack.i.h.bf16 %v4316_v51  ;;  %v4317_v0 = vunpack.i.l.bf16 %v4316_v51  ;;  %v1154_v51 = vadd.f32 %v1130_v62, %v5201_v23  ;;  %v1153_v41 = vadd.f32 %v1129_v29, %v5209_v59 }
 0x519   : > { %4031 = vmatpush3.bf16.msra.mxu1 %v1427_v1  ;;  %v1385_v61 = vsel %vm619_vm5, %v4332_v49, %v4333_v48  ;;  %v1132_v48 = vmul.f32 0.044715, %v1108_v16  ;;  %v1109_v49 = vmul.f32 %v1085_v58, %v5232_v2  ;;  %v1155_v62 = vadd.f32 %v1131_v21, %v5221_v60 }
 0x51a   : > { %v4336_v13 = vpop.permute.xlu1 %4335  ;;  %v1384_v18 = vsel %vm619_vm5, %v4317_v0, %v4318_v10  ;;  %v1134_v0 = vmul.f32 0.044715, %v1110_v26  ;;  %v1178_v3 = vmul.f32 0.7978846, %v1154_v51  ;;  %v1177_v11 = vmul.f32 0.7978846, %v1153_v41 }
 0x51b   : > { %v4338_v32 = vunpack.i.h.bf16 %v4336_v13  ;;  %v4337_v34 = vunpack.i.l.bf16 %v4336_v13  ;;  %v4321_v35 = vpop.permute.xlu0 %4320  ;;  %v1428_v38 = vpack.c.bf16 %v1385_v61, %v1384_v18  ;;  %v1156_v52 = vadd.f32 %v1132_v48, %v5212_v19 }
 0x51c   : > { %v4323_v17 = vunpack.i.h.bf16 %v4321_v35  ;;  %v4322_v1 = vunpack.i.l.bf16 %v4321_v35  ;;  %v1133_v16 = vmul.f32 0.044715, %v1109_v49  ;;  %v1112_v61 = vmul.f32 %v1088_v31, %v5250_v4 }
 0x51d   : > { %4032 = vmatprep.subr.bf16.mxu1 %v1428_v38  ;;  %v1413_v24 = vsel %vm632_vm6, %v4337_v34, %v4338_v32  ;;  %v1111_v13 = vmul.f32 %v1087_v15, %v5254_v45  ;;  %v1220_v18 = vadd.f32 1.0, %v4578_v8  ;;  %v1158_v50 = vadd.f32 %v1134_v0, %v5227_v44  ;;  %v4584_v34 = vpop.eup %4583 }
 0x51e   : > { %4033 = vmatpush3.bf16.msra.mxu1 %v1428_v38  ;;  %v1412_v33 = vsel %vm632_vm6, %v4322_v1, %v4323_v17  ;;  %v1219_v25 = vadd.f32 1.0, %v4580_v43  ;;  %v1180_v58 = vmul.f32 0.7978846, %v1156_v52  ;;  %v1157_v32 = vadd.f32 %v1133_v16, %v5232_v2  ;;  %v4586_v29 = vpop.eup %4585 }
 0x51f   : > { %4034 = vmatprep.subr.bf16.mxu1 %v1429_v47  ;;  %v1430_v10 = vpack.c.bf16 %v1413_v24, %v1412_v33  ;;  %4589 = vtanh.f32 %v1178_v3  ;;  %v1179_v35 = vmul.f32 0.7978846, %v1155_v62  ;;  %v1136_v38 = vmul.f32 0.044715, %v1112_v61  ;;  %v4588_v41 = vpop.eup %4587 }
 0x520   : > { %4591 = vtanh.f32 %v1177_v11  ;;  %v1135_v42 = vmul.f32 0.044715, %v1111_v13  ;;  %v1244_v17 = vmul.f32 0.5, %v1220_v18  ;;  %v1182_v1 = vmul.f32 0.7978846, %v1158_v50 }
 0x521   : > { %v1243_v5 = vmul.f32 0.5, %v1219_v25  ;;  %4593 = vtanh.f32 %v1180_v58  ;;  %v1221_v26 = vadd.f32 1.0, %v4584_v34  ;;  %v1222_v33 = vadd.f32 1.0, %v4582_v30 }
 0x522   : > { %4035 = vmatpush3.bf16.msra.mxu1 %v1429_v47  ;;  %v1181_v47 = vmul.f32 0.7978846, %v1157_v32  ;;  %4595 = vtanh.f32 %v1179_v35  ;;  %v1160_v43 = vadd.f32 %v1136_v38, %v5250_v4  ;;  %v1159_v49 = vadd.f32 %v1135_v42, %v5254_v45 }
 0x523   : > { %4036 = vmatprep.subr.bf16.mxu1 %v1430_v10  ;;  %v5281_v51 = vmul.f32 %v1244_v17, %v5158_v57  ;;  %4597 = vtanh.f32 %v1182_v1  ;;  %v5286_v30 = vmul.f32 %v1243_v5, %v5161_v63  ;;  %v1224_v31 = vadd.f32 1.0, %v4586_v29 }
 0x524   : > { %4599 = vtanh.f32 %v1181_v47  ;;  %v1184_v0 = vmul.f32 0.7978846, %v1160_v43  ;;  %v1183_v62 = vmul.f32 0.7978846, %v1159_v49  ;;  %v1223_v25 = vadd.f32 1.0, %v4588_v41 }
 0x525   : > { %v1561_v35 = vpack.c.bf16 %v5281_v51, %v5286_v30  ;;  %v1248_v47 = vmul.f32 0.5, %v1224_v31 }
 0x526   : > { %4037 = vmatpush3.bf16.msra.mxu1 %v1430_v10  ;;  %v1245_v10 = vmul.f32 0.5, %v1221_v26  ;;  %4601 = vtanh.f32 %v1184_v0  ;;  %v1247_v43 = vmul.f32 0.5, %v1223_v25 }
 0x527   : > { %4603 = vtanh.f32 %v1183_v62  ;;  %v5311_v31 = vmul.f32 %v1248_v47, %v5184_v27 }
 0x528   : > { %v5298_v17 = vmul.f32 %v1245_v10, %v5171_v9 }
 0x529   : > { %v4590_v13 = vpop.eup %4589 }
 0x52a   : > { %v4592_v58 = vpop.eup %4591  ;;  %v1226_v49 = vadd.f32 1.0, %v4590_v13 }
 0x52b   : > { %v864_v8 = vpop.permute.xlu1 %863  ;;  %v4594_v1 = vpop.eup %4593 }
 0x52c   : > { %v5274_v24 = vadd.f32 %v5067_v22, %v864_v8  ;;  %v859_v48 = vpop.permute.xlu0 %858  ;;  %v4596_v8 = vpop.eup %4595 }
 0x52d   : > { %v5278_v12 = vadd.f32 %v5063_v20, %v859_v48  ;;  %v1246_v20 = vmul.f32 0.5, %v1222_v33  ;;  %v4512_v33 = vld [vmem:[%s6574_s3 + $0x8] sm:$0xff]   ;;  %v1225_v48 = vadd.f32 1.0, %v4592_v58  ;;  %v4598_v41 = vpop.eup %4597 }
 0x52e   : > { %v1090_v21 = vmul.f32 %v5274_v24, %v5274_v24  ;;  %v1230_v62 = vadd.f32 1.0, %v4598_v41 }
 0x52f   : > { %v1089_v22 = vmul.f32 %v5278_v12, %v5278_v12  ;;  %v4346_v15 = vpop.permute.xlu1 %4345  ;;  %v5302_v29 = vmul.f32 %v1246_v20, %v5166_v7  ;;  %v4600_v7 = vpop.eup %4599  ;;  %v5316_v20 = vmul.f32 %v1247_v43, %v5187_v28  ;;  %v1249_v0 = vmul.f32 0.5, %v1225_v48 }
 0x530   : > { %v1114_v57 = vmul.f32 %v1090_v21, %v5274_v24  ;;  %v4348_v52 = vunpack.i.h.bf16 %v4346_v15  ;;  %v4347_v16 = vunpack.i.l.bf16 %v4346_v15  ;;  %v4341_v3 = vpop.permute.xlu0 %4340  ;;  %v4513_v21 = vld [vmem:[%s6576_s5] sm:$0xff]   ;;  %v1228_v15 = vadd.f32 1.0, %v4594_v1  ;;  %v4602_v27 = vpop.eup %4601 }
 0x531   : > { %v1113_v61 = vmul.f32 %v1089_v22, %v5278_v12  ;;  %v4343_v63 = vunpack.i.h.bf16 %v4341_v3  ;;  %v4342_v11 = vunpack.i.l.bf16 %v4341_v3  ;;  %v1227_v22 = vadd.f32 1.0, %v4596_v8  ;;  %v4604_v28 = vpop.eup %4603 }
 0x532   : > { %v1138_v18 = vmul.f32 0.044715, %v1114_v57  ;;  %v1415_v50 = vsel %vm632_vm6, %v4347_v16, %v4348_v52  ;;  %v1562_v10 = vpack.c.bf16 %v5302_v29, %v5298_v17  ;;  %v1250_v57 = vmul.f32 0.5, %v1226_v49  ;;  %v4517_v49 = vld [vmem:[%s6580_s9] sm:$0xff]  }
 0x533   : > { %v1137_v32 = vmul.f32 0.044715, %v1113_v61  ;;  %v1414_v34 = vsel %vm632_vm6, %v4342_v11, %v4343_v63  ;;  %v1251_v52 = vmul.f32 0.5, %v1227_v22  ;;  %v1252_v16 = vmul.f32 0.5, %v1228_v15 }
 0x534   : > { %v1162_v38 = vadd.f32 %v1138_v18, %v5274_v24  ;;  %v1431_v42 = vpack.c.bf16 %v1415_v50, %v1414_v34  ;;  %v1229_v3 = vadd.f32 1.0, %v4600_v7  ;;  %v1563_v61 = vpack.c.bf16 %v5311_v31, %v5316_v20 }
 0x535   : > { %v1161_v5 = vadd.f32 %v1137_v32, %v5278_v12  ;;  %v5321_v63 = vmul.f32 %v1249_v0, %v5209_v59  ;;  %v5324_v11 = vmul.f32 %v1250_v57, %v5201_v23  ;;  %v5327_v13 = vmul.f32 %v1251_v52, %v5221_v60 }
 0x536   : > { %v1186_v26 = vmul.f32 0.7978846, %v1162_v38  ;;  %4038 = vmatprep.subr.bf16.mxu1 %v1431_v42  ;;  %v5330_v18 = vmul.f32 %v1252_v16, %v5212_v19  ;;  %v1253_v50 = vmul.f32 0.5, %v1229_v3  ;;  %v1254_v25 = vmul.f32 0.5, %v1230_v62 }
 0x537   : > { %v1185_v9 = vmul.f32 0.7978846, %v1161_v5  ;;  %4039 = vmatpush3.bf16.msra.mxu1 %v1431_v42  ;;  %v1564_v32 = vpack.c.bf16 %v5324_v11, %v5321_v63  ;;  %v1231_v59 = vadd.f32 1.0, %v4604_v28  ;;  %v1232_v34 = vadd.f32 1.0, %v4602_v27 }
 0x538   : > { %4605 = vtanh.f32 %v1186_v26  ;;  %4044 = vmatprep.subr.bf16.mxu1 %v1561_v35  ;;  %v1565_v23 = vpack.c.bf16 %v5330_v18, %v5327_v13  ;;  %v5337_v60 = vmul.f32 %v1253_v50, %v5232_v2  ;;  %v5340_v19 = vmul.f32 %v1254_v25, %v5227_v44 }
 0x539   : > { %4607 = vtanh.f32 %v1185_v9  ;;  %v1255_v38 = vmul.f32 0.5, %v1231_v59  ;;  %v1256_v42 = vmul.f32 0.5, %v1232_v34  ;;  %v1580_v9 = vpop.permute.xlu0 %1579 }
 0x53a   : > { %4041 = vmatmul.mubr.bf16.vlgmr.msra.gmra.mrb[0].mxu1 %v4512_v33  ;;  %v1566_v47 = vpack.c.bf16 %v5340_v19, %v5337_v60 }
 0x53b   : > { %4045 = vmatpush3.bf16.msra.mxu1 %v1561_v35  ;;  %4060 = vmatprep.mubr.bf16.mxu1 %v4513_v21  ;;  %v5345_v8 = vmul.f32 %v1255_v38, %v5254_v45  ;;  %v5348_v26 = vmul.f32 %v1256_v42, %v5250_v4  ;;  %v4514_v4 = vld [vmem:[%s6576_s5 + $0x8] sm:$0xff]   ;;  %v1585_v21 = vpop.permute.xlu1 %1584 }
 0x53c   : > { %4046 = vmatprep.subr.bf16.mxu1 %v1562_v10 }
 0x53d   : > { %v1567_v44 = vpack.c.bf16 %v5348_v26, %v5345_v8  ;;  %v1600_v41 = vpop.permute.xlu0 %1599 }
 0x53f   : > { %4047 = vmatpush3.bf16.msra.mxu1 %v1562_v10  ;;  %v5373_v7 = vpop.permute.xlu1 %1604 }
 0x540   : > { %4048 = vmatprep.subr.bf16.mxu1 %v1563_v61 }
 0x541   : > { %v1439_v15 = vpop.permute.xlu0 %1438 }
 0x542   : > { %v4606_v58 = vpop.eup %4605 }
 0x543   : > { %v4608_v35 = vpop.eup %4607  ;;  %4049 = vmatpush3.bf16.msra.mxu1 %v1563_v61  ;;  %v1234_v5 = vadd.f32 1.0, %v4606_v58  ;;  %v1444_v52 = vpop.permute.xlu1 %1443 }
 0x544   : > { %4050 = vmatprep.subr.bf16.mxu1 %v1564_v32  ;;  %v1233_v1 = vadd.f32 1.0, %v4608_v35 }
 0x545   : > { %v1258_v33 = vmul.f32 0.5, %v1234_v5  ;;  %v1590_v16 = vpop.permute.xlu0 %1589 }
 0x546   : > { %v1257_v2 = vmul.f32 0.5, %v1233_v1 }
 0x547   : > { %4051 = vmatpush3.bf16.msra.mxu1 %v1564_v32  ;;  %v5356_v48 = vmul.f32 %v1258_v33, %v5274_v24  ;;  %v4516_v24 = vld [vmem:[%s6576_s5 + $0x18] sm:$0xff]   ;;  %v1595_v3 = vpop.permute.xlu1 %1594 }
 0x548   : > { %4052 = vmatprep.subr.bf16.mxu1 %v1565_v23  ;;  %v5353_v43 = vmul.f32 %v1257_v2, %v5278_v12  ;;  %v4515_v12 = vld [vmem:[%s6576_s5 + $0x10] sm:$0xff]  }
 0x549   : > { %v1610_v62 = vpop.permute.xlu0 %1609 }
 0x54a   : > { %v1568_v45 = vpack.c.bf16 %v5356_v48, %v5353_v43 }
 0x54b   : > { %4053 = vmatpush3.bf16.msra.mxu1 %v1565_v23  ;;  %v1615_v27 = vpop.permute.xlu1 %1614 }
 0x54c   : > { %4054 = vmatprep.subr.bf16.mxu1 %v1566_v47 }
 0x54d   : > { %v1449_v61 = vpop.permute.xlu0 %1448 }
 0x54f   : > { %4055 = vmatpush3.bf16.msra.mxu1 %v1566_v47  ;;  %v1454_v25 = vpop.permute.xlu1 %1453 }
 0x550   : > { %4056 = vmatprep.subr.bf16.mxu1 %v1567_v44 }
 0x553   : > { %4057 = vmatpush3.bf16.msra.mxu1 %v1567_v44 }
 0x554   : > { %4058 = vmatprep.subr.bf16.mxu1 %v1568_v45 }
 0x557   : > { %4059 = vmatpush3.bf16.msra.mxu1 %v1568_v45 }
 0x55a   : > { %4061 = vmatmul.mubr.bf16.vlgmr.msra.gmra.mrb[4].mxu1 %v4514_v4 }
 0x55b   : > { %4064 = vmatprep.mubr.bf16.mxu1 %v4515_v12 }
 0x562   : > { %4065 = vmatmul.mubr.bf16.gmra.mrb[8].mxu1 %v4516_v24 }
 0x563   : > { %4096 = vmatprep.mubr.msk.bf16.mxu1 %vm2274_vm11, %v4517_v49 }
 0x60d   : > { %v4042_v22 = vpop.f32.mrb[0].mxu1 }
 0x60e   : > { %v1502_v10 = vpop.f32.mrb[1].mxu1  ;;  %v5375_v28 = vadd.f32 %v4042_v22, %v1449_v61 }
 0x60f   : > { %v4043_v0 = vpop.f32.mrb[2].mxu1  ;;  %v5377_v50 = vadd.f32 %v1502_v10, %v1439_v15 }
 0x610   : > { %v1505_v57 = vpop.f32.mrb[3].mxu1  ;;  %v1519_v58 = vmul.f32 %v5375_v28, %v5375_v28  ;;  %v5381_v32 = vadd.f32 %v4043_v0, %v1454_v25 }
 0x611   : > { %v1517_v59 = vmul.f32 %v5377_v50, %v5377_v50  ;;  %v5385_v34 = vadd.f32 %v1505_v57, %v1444_v52 }
 0x612   : > { %v1523_v35 = vmul.f32 %v1519_v58, %v5375_v28  ;;  %v1520_v23 = vmul.f32 %v5381_v32, %v5381_v32 }
 0x613   : > { %v1521_v38 = vmul.f32 %v1517_v59, %v5377_v50  ;;  %v1518_v42 = vmul.f32 %v5385_v34, %v5385_v34 }
 0x614   : > { %v1527_v1 = vmul.f32 0.044715, %v1523_v35  ;;  %v1524_v5 = vmul.f32 %v1520_v23, %v5381_v32 }
 0x615   : > { %v1525_v2 = vmul.f32 0.044715, %v1521_v38  ;;  %v1522_v45 = vmul.f32 %v1518_v42, %v5385_v34 }
 0x616   : > { %v1531_v15 = vadd.f32 %v1527_v1, %v5375_v28  ;;  %v1528_v10 = vmul.f32 0.044715, %v1524_v5 }
 0x617   : > { %v1529_v52 = vadd.f32 %v1525_v2, %v5377_v50  ;;  %v1526_v61 = vmul.f32 0.044715, %v1522_v45 }
 0x618   : > { %v1535_v35 = vmul.f32 0.7978846, %v1531_v15 }
 0x619   : > { %v1533_v1 = vmul.f32 0.7978846, %v1529_v52  ;;  %v1530_v45 = vadd.f32 %v1526_v61, %v5385_v34 }
 0x61a   : > { %4609 = vtanh.f32 %v1535_v35 }
 0x61b   : > { %4611 = vtanh.f32 %v1533_v1 }
 0x62d   : > { %v4062_v47 = vpop.f32.mrb[4].mxu1 }
 0x62e   : > { %v5394_v33 = vadd.f32 %v4062_v47, %v1590_v16  ;;  %v1675_v44 = vpop.f32.mrb[5].mxu1 }
 0x62f   : > { %v5397_v4 = vadd.f32 %v1675_v44, %v1580_v9  ;;  %v4063_v12 = vpop.f32.mrb[6].mxu1 }
 0x630   : > { %v1708_v24 = vmul.f32 %v5394_v33, %v5394_v33  ;;  %v5401_v49 = vadd.f32 %v4063_v12, %v1595_v3  ;;  %v1678_v22 = vpop.f32.mrb[7].mxu1 }
 0x631   : > { %v1706_v0 = vmul.f32 %v5397_v4, %v5397_v4  ;;  %v5406_v57 = vadd.f32 %v1678_v22, %v1585_v21  ;;  %v1532_v21 = vadd.f32 %v1528_v10, %v5381_v32 }
 0x632   : > { %v1716_v9 = vmul.f32 %v1708_v24, %v5394_v33  ;;  %v1709_v16 = vmul.f32 %v5401_v49, %v5401_v49 }
 0x633   : > { %v1714_v3 = vmul.f32 %v1706_v0, %v5397_v4  ;;  %v1707_v25 = vmul.f32 %v5406_v57, %v5406_v57 }
 0x634   : > { %v1724_v58 = vmul.f32 0.044715, %v1716_v9  ;;  %v1717_v59 = vmul.f32 %v1709_v16, %v5401_v49 }
 0x635   : > { %v1722_v23 = vmul.f32 0.044715, %v1714_v3  ;;  %v1715_v38 = vmul.f32 %v1707_v25, %v5406_v57  ;;  %v4066_v42 = vpop.f32.mrb[8].mxu1 }
 0x636   : > { %v1732_v5 = vadd.f32 %v1724_v58, %v5394_v33  ;;  %v1725_v47 = vmul.f32 0.044715, %v1717_v59  ;;  %v5419_v2 = vadd.f32 %v4066_v42, %v1610_v62  ;;  %v1691_v44 = vpop.f32.mrb[9].mxu1  ;;  %v1536_v42 = vmul.f32 0.7978846, %v1532_v21 }
 0x637   : > { %v1730_v12 = vadd.f32 %v1722_v23, %v5397_v4  ;;  %v1723_v24 = vmul.f32 0.044715, %v1715_v38  ;;  %v5423_v22 = vadd.f32 %v1691_v44, %v1600_v41  ;;  %v4067_v15 = vpop.f32.mrb[10].mxu1 }
 0x638   : > { %v1740_v10 = vmul.f32 0.7978846, %v1732_v5  ;;  %v1733_v0 = vadd.f32 %v1725_v47, %v5401_v49  ;;  %v1712_v52 = vmul.f32 %v5419_v2, %v5419_v2  ;;  %v5428_v9 = vadd.f32 %v4067_v15, %v1615_v27  ;;  %v1694_v16 = vpop.f32.mrb[11].mxu1 }
 0x639   : > { %v1738_v62 = vmul.f32 0.7978846, %v1730_v12  ;;  %v1731_v3 = vadd.f32 %v1723_v24, %v5406_v57  ;;  %v1710_v61 = vmul.f32 %v5423_v22, %v5423_v22  ;;  %v5434_v25 = vadd.f32 %v1694_v16, %v5373_v7 }
 0x63a   : > { %v1741_v41 = vmul.f32 0.7978846, %v1733_v0  ;;  %v1720_v58 = vmul.f32 %v1712_v52, %v5419_v2  ;;  %v1713_v59 = vmul.f32 %v5428_v9, %v5428_v9  ;;  %4613 = vtanh.f32 %v1740_v10 }
 0x63b   : > { %v1739_v27 = vmul.f32 0.7978846, %v1731_v3  ;;  %v1718_v23 = vmul.f32 %v1710_v61, %v5423_v22  ;;  %v1711_v38 = vmul.f32 %v5434_v25, %v5434_v25  ;;  %v1534_v47 = vmul.f32 0.7978846, %v1530_v45 }
 0x63c   : > { %v1728_v5 = vmul.f32 0.044715, %v1720_v58  ;;  %v1721_v7 = vmul.f32 %v1713_v59, %v5428_v9  ;;  %4615 = vtanh.f32 %v1738_v62  ;;  %v4610_v62 = vpop.eup %4609 }
 0x63d   : > { %v1726_v35 = vmul.f32 0.044715, %v1718_v23  ;;  %v1719_v44 = vmul.f32 %v1711_v38, %v5434_v25  ;;  %4617 = vtanh.f32 %v1741_v41  ;;  %v4612_v3 = vpop.eup %4611 }
 0x63e   : > { %v1736_v12 = vadd.f32 %v1728_v5, %v5419_v2  ;;  %v1729_v1 = vmul.f32 0.044715, %v1721_v7  ;;  %4619 = vtanh.f32 %v1739_v27 }
 0x63f   : > { %v1734_v24 = vadd.f32 %v1726_v35, %v5423_v22  ;;  %v1727_v15 = vmul.f32 0.044715, %v1719_v44  ;;  %4621 = vtanh.f32 %v1536_v42  ;;  %v1543_v44 = vadd.f32 1.0, %v4610_v62 }
 0x640   : > { %v1744_v0 = vmul.f32 0.7978846, %v1736_v12  ;;  %v1737_v21 = vadd.f32 %v1729_v1, %v5428_v9  ;;  %4623 = vtanh.f32 %v1534_v47 }
 0x641   : > { %v1742_v10 = vmul.f32 0.7978846, %v1734_v24  ;;  %v1735_v45 = vadd.f32 %v1727_v15, %v5434_v25  ;;  %v1541_v15 = vadd.f32 1.0, %v4612_v3 }
 0x642   : > { %4625 = vtanh.f32 %v1744_v0  ;;  %v1745_v52 = vmul.f32 0.7978846, %v1737_v21 }
 0x643   : > { %4627 = vtanh.f32 %v1742_v10  ;;  %v1743_v16 = vmul.f32 0.7978846, %v1735_v45 }
 0x644   : > { %4629 = vtanh.f32 %v1745_v52  ;;  %v4614_v61 = vpop.eup %4613 }
 0x645   : > { %4631 = vtanh.f32 %v1743_v16  ;;  %v1756_v27 = vadd.f32 1.0, %v4614_v61 }
 0x646   : > { %v4616_v41 = vpop.eup %4615 }
 0x647   : > { %v4618_v58 = vpop.eup %4617  ;;  %v1754_v38 = vadd.f32 1.0, %v4616_v41  ;;  %v1764_v12 = vmul.f32 0.5, %v1756_v27 }
 0x648   : > { %v4620_v59 = vpop.eup %4619  ;;  %v1757_v5 = vadd.f32 1.0, %v4618_v58  ;;  %v1547_v58 = vmul.f32 0.5, %v1543_v44 }
 0x649   : > { %v4622_v23 = vpop.eup %4621  ;;  %v1755_v47 = vadd.f32 1.0, %v4620_v59  ;;  %v1762_v0 = vmul.f32 0.5, %v1754_v38  ;;  %v1772_v59 = vmul.f32 %v1764_v12, %v5394_v33 }
 0x64a   : > { %v4624_v42 = vpop.eup %4623  ;;  %v1544_v45 = vadd.f32 1.0, %v4622_v23  ;;  %v1765_v52 = vmul.f32 0.5, %v1757_v5 }
 0x64b   : > { %v1542_v61 = vadd.f32 1.0, %v4624_v42  ;;  %v1763_v14 = vmul.f32 0.5, %v1755_v47  ;;  %v1770_v3 = vmul.f32 %v1762_v0, %v5397_v4 }
 0x64c   : > { %v4626_v7 = vpop.eup %4625  ;;  %v1548_v23 = vmul.f32 0.5, %v1544_v45  ;;  %v1773_v5 = vmul.f32 %v1765_v52, %v5401_v49 }
 0x64d   : > { %v4628_v35 = vpop.eup %4627  ;;  %v1760_v1 = vadd.f32 1.0, %v4626_v7  ;;  %v1545_v7 = vmul.f32 0.5, %v1541_v15  ;;  %v1546_v47 = vmul.f32 0.5, %v1542_v61  ;;  %v1771_v44 = vmul.f32 %v1763_v14, %v5406_v57 }
 0x64e   : > { %v4630_v24 = vpop.eup %4629  ;;  %v1758_v21 = vadd.f32 1.0, %v4628_v35  ;;  %v1552_v15 = vmul.f32 %v1548_v23, %v5381_v32  ;;  %v4522_v23 = vld [vmem:[%s6580_s9 + $0x28] sm:$0xff]  }
 0x64f   : > { %v4632_v10 = vpop.eup %4631  ;;  %v1768_v16 = vmul.f32 0.5, %v1760_v1  ;;  %v1761_v6 = vadd.f32 1.0, %v4630_v24  ;;  %v1549_v4 = vmul.f32 %v1545_v7, %v5377_v50 }
 0x650   : > { %v1766_v41 = vmul.f32 0.5, %v1758_v21  ;;  %v1759_v56 = vadd.f32 1.0, %v4632_v10 }
 0x651   : > { %v1776_v62 = vmul.f32 %v1768_v16, %v5419_v2  ;;  %v1769_v27 = vmul.f32 0.5, %v1761_v6  ;;  %v1551_v6 = vmul.f32 %v1547_v58, %v5375_v28 }
 0x652   : > { %v1774_v38 = vmul.f32 %v1766_v41, %v5423_v22  ;;  %v1767_v35 = vmul.f32 0.5, %v1759_v56 }
 0x653   : > { %v1780_v1 = vadd.f32 %v1776_v62, %v1772_v59  ;;  %v1777_v42 = vmul.f32 %v1769_v27, %v5428_v9  ;;  %v1550_v9 = vmul.f32 %v1546_v47, %v5385_v34 }
 0x654   : > { %v1778_v24 = vadd.f32 %v1774_v38, %v1770_v3  ;;  %v1775_v33 = vmul.f32 %v1767_v35, %v5434_v25 }
 0x655   : > { %v1781_v2 = vadd.f32 %v1777_v42, %v1773_v5  ;;  %v1784_v12 = vmul.f32 0.5, %v1780_v1  ;;  %v4524_v1 = vld [vmem:[%s6580_s9 + $0x38] sm:$0xff]  }
 0x656   : > { %v1779_v22 = vadd.f32 %v1775_v33, %v1771_v44  ;;  %v1782_v56 = vmul.f32 0.5, %v1778_v24 }
 0x657   : > { %v1785_v49 = vmul.f32 0.5, %v1781_v2  ;;  %v1788_v0 = vadd.f32 %v1784_v12, %v1551_v6 }
 0x658   : > { %v1783_v21 = vmul.f32 0.5, %v1779_v22  ;;  %v1786_v10 = vadd.f32 %v1782_v56, %v1549_v4 }
 0x659   : > { %v1789_v14 = vadd.f32 %v1785_v49, %v1552_v15  ;;  %v1792_v57 = vadd.f32 %v1788_v0, %v1772_v59  ;;  %v1796_v45 = vadd.f32 %v1788_v0, %v1776_v62  ;;  %v4518_v59 = vld [vmem:[%s6580_s9 + $0x8] sm:$0xff]   ;;  %v4519_v62 = vld [vmem:[%s6580_s9 + $0x10] sm:$0xff]  }
 0x65a   : > { %v1787_v25 = vadd.f32 %v1783_v21, %v1550_v9  ;;  %v1790_v52 = vadd.f32 %v1786_v10, %v1770_v3  ;;  %v1794_v28 = vadd.f32 %v1786_v10, %v1774_v38  ;;  %v4520_v3 = vld [vmem:[%s6580_s9 + $0x18] sm:$0xff]   ;;  %v4521_v38 = vld [vmem:[%s6580_s9 + $0x20] sm:$0xff]  }
 0x65b   : > { %v4354_v16 = vpack.i.bf16 %v1789_v14, %v1788_v0  ;;  %v1793_v61 = vadd.f32 %v1789_v14, %v1773_v5  ;;  %v1797_v41 = vadd.f32 %v1789_v14, %v1777_v42  ;;  %v4523_v5 = vld [vmem:[%s6580_s9 + $0x30] sm:$0xff]  }
 0x65c   : > { %v4349_v50 = vpack.i.bf16 %v1787_v25, %v1786_v10  ;;  %v1791_v58 = vadd.f32 %v1787_v25, %v1771_v44  ;;  %v1795_v27 = vadd.f32 %v1787_v25, %v1775_v33  ;;  %v4525_v25 = vld [vmem:[%s6578_s7] sm:$0xff]  }
 0x65d   : > { %4355 = vrot.lane.b32.xlu1 %v4354_v16, %s4694_s25  ;;  %v2135_v32 = vpack.c.bf16 %v1793_v61, %v1792_v57  ;;  %v2137_v7 = vpack.c.bf16 %v1797_v41, %v1796_v45  ;;  %4080 = vmatprep.mubr.msk.bf16.mxu0 %vm1960_vm12, %v4525_v25  ;;  %v1895_v16 = vld [vmem:[%s6579_s8 + $0x18] sm:$0xff]  ;;  %v1894_v61 = vld [vmem:[%s6579_s8 + $0x10] sm:$0xff]  ;;  %v1897_v41 = vld [vmem:[%s6579_s8 + $0x28] sm:$0xff] }
 0x65e   : > { %4350 = vrot.lane.b32.xlu0 %v4349_v50, %s4694_s25  ;;  %v2134_v34 = vpack.c.bf16 %v1791_v58, %v1790_v52  ;;  %v2136_v35 = vpack.c.bf16 %v1795_v27, %v1794_v28  ;;  %v1893_v52 = vld [vmem:[%s6579_s8 + $0x8] sm:$0xff]  ;;  %v1892_v28 = vld [vmem:[%s6579_s8] sm:$0xff]  ;;  %v1899_v58 = vld [vmem:[%s6579_s8 + $0x38] sm:$0xff] }
 0x65f   : > { %v1896_v50 = vld [vmem:[%s6579_s8 + $0x20] sm:$0xff]  ;;  %v1898_v27 = vld [vmem:[%s6579_s8 + $0x30] sm:$0xff] }
 0x660   : > { %4088 = vmatprep.subr.bf16.mxu1 %v2134_v34 }
 0x661   : > { %4089 = vmatpush3.bf16.msra.mxu1 %v2134_v34  ;;  %v2141_v34 = vld [vmem:[%s6581_s10 + $0x18] sm:$0xff] }
 0x662   : > { %4090 = vmatprep.subr.bf16.mxu1 %v2135_v32 }
 0x665   : > { %4091 = vmatpush3.bf16.msra.mxu1 %v2135_v32  ;;  %v2139_v32 = vld [vmem:[%s6581_s10 + $0x8] sm:$0xff] }
 0x666   : > { %4092 = vmatprep.subr.bf16.mxu1 %v2136_v35 }
 0x669   : > { %4093 = vmatpush3.bf16.msra.mxu1 %v2136_v35  ;;  %v2140_v35 = vld [vmem:[%s6581_s10 + $0x10] sm:$0xff] }
 0x66a   : > { %4094 = vmatprep.subr.bf16.mxu1 %v2137_v7 }
 0x66d   : > { %4095 = vmatpush3.bf16.msra.mxu1 %v2137_v7  ;;  %v2138_v7 = vld [vmem:[%s6581_s10] sm:$0xff] }
 0x670   : > { %4097 = vmatmul.mubr.msk.bf16.vlgmr.msra.gmra.mrb[12].mxu1 %vm2274_vm11, %v4518_v59  ;;  %v2143_v59 = vld [vmem:[%s6581_s10 + $0x28] sm:$0xff] }
 0x671   : > { %4100 = vmatprep.mubr.msk.bf16.mxu1 %vm2274_vm11, %v4519_v62  ;;  %v2142_v62 = vld [vmem:[%s6581_s10 + $0x20] sm:$0xff] }
 0x678   : > { %4101 = vmatmul.mubr.msk.bf16.gmra.mrb[16].mxu1 %vm2274_vm11, %v4520_v3  ;;  %v2145_v3 = vld [vmem:[%s6581_s10 + $0x38] sm:$0xff] }
 0x679   : > { %4104 = vmatprep.mubr.msk.bf16.mxu1 %vm2274_vm11, %v4521_v38  ;;  %v2144_v38 = vld [vmem:[%s6581_s10 + $0x30] sm:$0xff] }
 0x680   : > { %4105 = vmatmul.mubr.msk.bf16.gmra.mrb[20].mxu1 %vm2274_vm11, %v4522_v23  ;;  %v2147_v23 = vld [vmem:[%s6581_s10 + $0x48] sm:$0xff] }
 0x681   : > { %4108 = vmatprep.mubr.msk.bf16.mxu1 %vm2274_vm11, %v4523_v5  ;;  %v2146_v5 = vld [vmem:[%s6581_s10 + $0x40] sm:$0xff] }
 0x688   : > { %4109 = vmatmul.mubr.msk.bf16.gmra.mrb[24].mxu1 %vm2274_vm11, %v4524_v1  ;;  %v2149_v1 = vld [vmem:[%s6581_s10 + $0x58] sm:$0xff] }
 0x6cf   : > { %v4356_v42 = vpop.permute.xlu1 %4355 }
 0x6d0   : > { %v4351_v47 = vpop.permute.xlu0 %4350  ;;  %v4358_v44 = vunpack.i.h.bf16 %v4356_v42  ;;  %v4357_v24 = vunpack.i.l.bf16 %v4356_v42  ;;  %v2148_v42 = vld [vmem:[%s6581_s10 + $0x50] sm:$0xff] }
 0x6d1   : > { %v4353_v33 = vunpack.i.h.bf16 %v4351_v47  ;;  %v4352_v6 = vunpack.i.l.bf16 %v4351_v47  ;;  %v2151_v47 = vld [vmem:[%s6581_s10 + $0x68] sm:$0xff] }
 0x6d2   : > { %v3822_v0 = vpack.c.bf16 %v4358_v44, %v4357_v24  ;;  %v1817_v9 = vsel %vm1315_vm8, 0.0, %v4358_v44  ;;  %v1821_v21 = vsel %vm1315_vm8, %v4358_v44, 0.0  ;;  %v1816_v10 = vsel %vm1315_vm8, 0.0, %v4357_v24  ;;  %v2150_v44 = vld [vmem:[%s6581_s10 + $0x60] sm:$0xff] }
 0x6d3   : > { %v3817_v2 = vpack.c.bf16 %v4353_v33, %v4352_v6  ;;  %v1815_v12 = vsel %vm1315_vm8, 0.0, %v4353_v33  ;;  %v1819_v4 = vsel %vm1315_vm8, %v4353_v33, 0.0  ;;  %v1814_v22 = vsel %vm1315_vm8, 0.0, %v4352_v6  ;;  %v2152_v33 = vld [vmem:[%s6581_s10 + $0x70] sm:$0xff] }
 0x6d4   : > { %v4369_v56 = vpack.i.bf16 %v1819_v4, %v1815_v12  ;;  %v1818_v15 = vsel %vm1315_vm8, %v4352_v6, 0.0  ;;  %v1820_v14 = vsel %vm1315_vm8, %v4357_v24, 0.0  ;;  %v4374_v57 = vpack.i.bf16 %v1821_v21, %v1817_v9  ;;  %v2153_v24 = vld [vmem:[%s6581_s10 + $0x78] sm:$0xff] }
 0x6d5   : > { %4068 = vmatprep.subr.msk.bf16.mxu0 %vm5084_vm10, %v3817_v2  ;;  %v4359_v49 = vpack.i.bf16 %v1818_v15, %v1814_v22  ;;  %v4364_v45 = vpack.i.bf16 %v1820_v14, %v1816_v10 }
 0x6d6   : > { %4370 = vrot.lane.b32.xlu1 %v4369_v56, %s6597_s20  ;;  %4069 = vmatpush3.bf16.msk.msra.mxu0 %vm5084_vm10, %v3817_v2 }
 0x6d7   : > { %4360 = vrot.lane.b32.xlu0 %v4359_v49, %s6597_s20  ;;  %4070 = vmatprep.subr.msk.bf16.mxu0 %vm5084_vm10, %v3822_v0 }
 0x6da   : > { %4375 = vrot.lane.b32.xlu1 %v4374_v57, %s6597_s20  ;;  %4071 = vmatpush3.bf16.msk.msra.mxu0 %vm5084_vm10, %v3822_v0 }
 0x6db   : > { %4365 = vrot.lane.b32.xlu0 %v4364_v45, %s6597_s20 }
 0x6de   : > { %4390 = vrot.lane.b32.xlu1 %v4369_v56, %s6622_s26 }
 0x6df   : > { %4380 = vrot.lane.b32.xlu0 %v4359_v49, %s6622_s26 }
 0x6e2   : > { %4395 = vrot.lane.b32.xlu1 %v4374_v57, %s6622_s26 }
 0x6e3   : > { %4385 = vrot.lane.b32.xlu0 %v4364_v45, %s6622_s26 }
 0x6e6   : > { %1907 = vperm.xlu1 %4267, %v1893_v52  }
 0x6e7   : > { %1902 = vperm.xlu0 %4268, %v1892_v28  }
 0x6ea   : > { %1917 = vperm.xlu1 %4267, %v1895_v16  }
 0x6eb   : > { %1912 = vperm.xlu0 %4268, %v1894_v61  }
 0x6ee   : > { %1927 = vperm.xlu1 %4267, %v1897_v41  }
 0x6ef   : > { %1922 = vperm.xlu0 %4268, %v1896_v50  }
 0x6f2   : > { %1937 = vperm.xlu1 %4267, %v1899_v58  }
 0x6f3   : > { %1932 = vperm.xlu0 %4268, %v1898_v27  }
 0x6f6   : > { %2161 = vperm.xlu1 %4267, %v2139_v32  }
 0x6f7   : > { %2156 = vperm.xlu0 %4268, %v2138_v7  }
 0x6fa   : > { %2171 = vperm.xlu1 %4267, %v2141_v34  }
 0x6fb   : > { %2166 = vperm.xlu0 %4268, %v2140_v35  }
 0x6fe   : > { %2181 = vperm.xlu1 %4267, %v2143_v59  }
 0x6ff   : > { %2176 = vperm.xlu0 %4268, %v2142_v62  }
 0x702   : > { %2191 = vperm.xlu1 %4267, %v2145_v3  }
 0x703   : > { %2186 = vperm.xlu0 %4268, %v2144_v38  }
 0x706   : > { %2201 = vperm.xlu1 %4267, %v2147_v23  }
 0x707   : > { %2196 = vperm.xlu0 %4268, %v2146_v5  }
 0x70a   : > { %2211 = vperm.xlu1 %4267, %v2149_v1  }
 0x70b   : > { %2206 = vperm.xlu0 %4268, %v2148_v42  }
 0x70e   : > { %2221 = vperm.xlu1 %4267, %v2151_v47  }
 0x70f   : > { %2216 = vperm.xlu0 %4268, %v2150_v44  }
 0x712   : > { %2231 = vperm.xlu1 %4267, %v2153_v24  }
 0x713   : > { %2226 = vperm.xlu0 %4268, %v2152_v33  }
 0x743   : > { %v5590_v6 = vpop.f32.mrb[12].mxu1 }
 0x744   : > { %v5592_v2 = vpop.f32.mrb[13].mxu1 }
 0x745   : > { %v5594_v12 = vpop.f32.mrb[14].mxu1 }
 0x746   : > { %v5596_v4 = vpop.f32.mrb[15].mxu1 }
 0x748   : > { %v4371_v22 = vpop.permute.xlu1 %4370 }
 0x749   : > { %v4373_v56 = vunpack.i.h.bf16 %v4371_v22  ;;  %v4372_v15 = vunpack.i.l.bf16 %v4371_v22  ;;  %v4361_v49 = vpop.permute.xlu0 %4360 }
 0x74a   : > { %v4363_v0 = vunpack.i.h.bf16 %v4361_v49  ;;  %v4362_v9 = vunpack.i.l.bf16 %v4361_v49 }
 0x74b   : > { %v1847_v21 = vsel %vm619_vm5, %v4372_v15, %v4373_v56  ;;  %v5599_v10 = vpop.f32.mrb[16].mxu1 }
 0x74c   : > { %v4376_v14 = vpop.permute.xlu1 %4375  ;;  %v1846_v57 = vsel %vm619_vm5, %v4362_v9, %v4363_v0  ;;  %v5602_v45 = vpop.f32.mrb[17].mxu1 }
 0x74d   : > { %v4378_v25 = vunpack.i.h.bf16 %v4376_v14  ;;  %v4377_v52 = vunpack.i.l.bf16 %v4376_v14  ;;  %v4366_v28 = vpop.permute.xlu0 %4365  ;;  %v1888_v16 = vpack.c.bf16 %v1847_v21, %v1846_v57  ;;  %v5604_v61 = vpop.f32.mrb[18].mxu1  ;;  %v4526_v57 = vld [vmem:[%s6578_s7 + $0x8] sm:$0xff]  }
 0x74e   : > { %v4368_v41 = vunpack.i.h.bf16 %v4366_v28  ;;  %v4367_v50 = vunpack.i.l.bf16 %v4366_v28  ;;  %v5606_v58 = vpop.f32.mrb[19].mxu1 }
 0x74f   : > { %4072 = vmatprep.subr.bf16.mxu0 %v1888_v16  ;;  %v1849_v27 = vsel %vm619_vm5, %v4377_v52, %v4378_v25  ;;  %v4527_v52 = vld [vmem:[%s6578_s7 + $0x10] sm:$0xff]  }
 0x750   : > { %4073 = vmatpush3.bf16.msra.mxu0 %v1888_v16  ;;  %v4391_v32 = vpop.permute.xlu1 %4390  ;;  %v1848_v7 = vsel %vm619_vm5, %v4367_v50, %v4368_v41  ;;  %v6623_v41 = vmov 0  }
 0x751   : > { %v4393_v34 = vunpack.i.h.bf16 %v4391_v32  ;;  %v4392_v35 = vunpack.i.l.bf16 %v4391_v32  ;;  %v4381_v59 = vpop.permute.xlu0 %4380  ;;  %v1889_v62 = vpack.c.bf16 %v1849_v27, %v1848_v7  ;;  %v4528_v27 = vld [vmem:[%s6578_s7 + $0x18] sm:$0xff]  }
 0x752   : > { %v4383_v3 = vunpack.i.h.bf16 %v4381_v59  ;;  %v4382_v38 = vunpack.i.l.bf16 %v4381_v59 }
 0x753   : > { %4074 = vmatprep.subr.bf16.mxu0 %v1889_v62  ;;  %v1871_v23 = vsel %vm632_vm6, %v4392_v35, %v4393_v34  ;;  %v5611_v5 = vpop.f32.mrb[20].mxu1 }
 0x754   : > { %4075 = vmatpush3.bf16.msra.mxu0 %v1889_v62  ;;  %v4396_v1 = vpop.permute.xlu1 %4395  ;;  %v1870_v42 = vsel %vm632_vm6, %v4382_v38, %v4383_v3  ;;  %v5614_v47 = vpop.f32.mrb[21].mxu1 }
 0x755   : > { %v4398_v44 = vunpack.i.h.bf16 %v4396_v1  ;;  %v4397_v24 = vunpack.i.l.bf16 %v4396_v1  ;;  %v4386_v33 = vpop.permute.xlu0 %4385  ;;  %v1890_v22 = vpack.c.bf16 %v1871_v23, %v1870_v42  ;;  %v5616_v56 = vpop.f32.mrb[22].mxu1 }
 0x756   : > { %v4388_v15 = vunpack.i.h.bf16 %v4386_v33  ;;  %v4387_v49 = vunpack.i.l.bf16 %v4386_v33  ;;  %v5618_v0 = vpop.f32.mrb[23].mxu1 }
 0x757   : > { %4076 = vmatprep.subr.bf16.mxu0 %v1890_v22  ;;  %v1873_v9 = vsel %vm632_vm6, %v4397_v24, %v4398_v44 }
 0x758   : > { %4077 = vmatpush3.bf16.msra.mxu0 %v1890_v22  ;;  %v1872_v21 = vsel %vm632_vm6, %v4387_v49, %v4388_v15 }
 0x759   : > { %v1891_v14 = vpack.c.bf16 %v1873_v9, %v1872_v21 }
 0x75b   : > { %4078 = vmatprep.subr.bf16.mxu0 %v1891_v14  ;;  %v5625_v25 = vpop.f32.mrb[24].mxu1 }
 0x75c   : > { %4079 = vmatpush3.bf16.msra.mxu0 %v1891_v14  ;;  %v5630_v28 = vpop.f32.mrb[25].mxu1 }
 0x75d   : > { %v5632_v16 = vpop.f32.mrb[26].mxu1  ;;  %2832 = vmatprep.subr.bf16.mxu0 %v6623_v41 }
 0x75e   : > { %v5635_v50 = vpop.f32.mrb[27].mxu1 }
 0x75f   : > { %4081 = vmatmul.mubr.msk.bf16.vlgmr.msra.gmra.mrb[24].mxu0 %vm1960_vm12, %v4526_v57 }
 0x760   : > { %4084 = vmatprep.mubr.msk.bf16.mxu0 %vm1960_vm12, %v4527_v52 }
 0x765   : > { %v5642_v32 = vpop.permute.xlu1 %1907 }
 0x766   : > { %v5644_v7 = vpop.permute.xlu0 %1902 }
 0x767   : > { %4085 = vmatmul.mubr.msk.bf16.gmra.mrb[28].mxu0 %vm1960_vm12, %v4528_v27 }
 0x769   : > { %v5647_v34 = vpop.permute.xlu1 %1917 }
 0x76a   : > { %v5649_v35 = vpop.permute.xlu0 %1912 }
 0x76d   : > { %v5651_v59 = vpop.permute.xlu1 %1927 }
 0x76e   : > { %v5653_v62 = vpop.permute.xlu0 %1922 }
 0x771   : > { %v5655_v3 = vpop.permute.xlu1 %1937 }
 0x772   : > { %v5657_v38 = vpop.permute.xlu0 %1932 }
 0x775   : > { %v2162_v23 = vpop.permute.xlu1 %2161 }
 0x776   : > { %v2157_v1 = vpop.permute.xlu0 %2156  ;;  %v5660_v42 = vadd.f32 %v5596_v4, %v2162_v23 }
 0x777   : > { %v5663_v44 = vadd.f32 %v5592_v2, %v2157_v1 }
 0x778   : > { %v2397_v24 = vmul.f32 %v5660_v42, %v5660_v42 }
 0x779   : > { %v2396_v33 = vmul.f32 %v5663_v44, %v5663_v44  ;;  %v2172_v22 = vpop.permute.xlu1 %2171 }
 0x77a   : > { %v2413_v15 = vmul.f32 %v2397_v24, %v5660_v42  ;;  %v5671_v49 = vadd.f32 %v5594_v12, %v2172_v22  ;;  %v2167_v9 = vpop.permute.xlu0 %2166 }
 0x77b   : > { %v2412_v21 = vmul.f32 %v2396_v33, %v5663_v44  ;;  %v5675_v4 = vadd.f32 %v5590_v6, %v2167_v9 }
 0x77c   : > { %v2429_v2 = vmul.f32 0.044715, %v2413_v15  ;;  %v2399_v14 = vmul.f32 %v5671_v49, %v5671_v49 }
 0x77d   : > { %v2428_v57 = vmul.f32 0.044715, %v2412_v21  ;;  %v2398_v52 = vmul.f32 %v5675_v4, %v5675_v4  ;;  %v2182_v27 = vpop.permute.xlu1 %2181 }
 0x77e   : > { %v2445_v23 = vadd.f32 %v2429_v2, %v5660_v42  ;;  %v2415_v12 = vmul.f32 %v2399_v14, %v5671_v49  ;;  %v2177_v1 = vpop.permute.xlu0 %2176  ;;  %v5684_v24 = vadd.f32 %v5606_v58, %v2182_v27 }
 0x77f   : > { %v2444_v6 = vadd.f32 %v2428_v57, %v5663_v44  ;;  %v2414_v33 = vmul.f32 %v2398_v52, %v5675_v4  ;;  %v5689_v22 = vadd.f32 %v5602_v45, %v2177_v1 }
 0x780   : > { %v2461_v15 = vmul.f32 0.7978846, %v2445_v23  ;;  %v2431_v9 = vmul.f32 0.044715, %v2415_v12  ;;  %v2401_v21 = vmul.f32 %v5684_v24, %v5684_v24 }
 0x781   : > { %v2460_v41 = vmul.f32 0.7978846, %v2444_v6  ;;  %v2430_v2 = vmul.f32 0.044715, %v2414_v33  ;;  %v2400_v14 = vmul.f32 %v5689_v22, %v5689_v22  ;;  %v2192_v46 = vpop.permute.xlu1 %2191 }
 0x782   : > { %4633 = vtanh.f32 %v2461_v15  ;;  %v2447_v58 = vadd.f32 %v2431_v9, %v5671_v49  ;;  %v2417_v57 = vmul.f32 %v2401_v21, %v5684_v24  ;;  %v5698_v52 = vadd.f32 %v5604_v61, %v2192_v46  ;;  %v2187_v45 = vpop.permute.xlu0 %2186 }
 0x783   : > { %4635 = vtanh.f32 %v2460_v41  ;;  %v2446_v27 = vadd.f32 %v2430_v2, %v5675_v4  ;;  %v2416_v23 = vmul.f32 %v2400_v14, %v5689_v22  ;;  %v5703_v12 = vadd.f32 %v5599_v10, %v2187_v45 }
 0x784   : > { %v2463_v1 = vmul.f32 0.7978846, %v2447_v58  ;;  %v2433_v6 = vmul.f32 0.044715, %v2417_v57  ;;  %v2403_v33 = vmul.f32 %v5698_v52, %v5698_v52 }
 0x785   : > { %v2462_v15 = vmul.f32 0.7978846, %v2446_v27  ;;  %v2432_v9 = vmul.f32 0.044715, %v2416_v23  ;;  %v2402_v46 = vmul.f32 %v5703_v12, %v5703_v12  ;;  %v2202_v61 = vpop.permute.xlu1 %2201 }
 0x786   : > { %4637 = vtanh.f32 %v2463_v1  ;;  %v2449_v41 = vadd.f32 %v2433_v6, %v5684_v24  ;;  %v2419_v21 = vmul.f32 %v2403_v33, %v5698_v52  ;;  %v2197_v2 = vpop.permute.xlu0 %2196  ;;  %v5712_v10 = vadd.f32 %v5618_v0, %v2202_v61 }
 0x787   : > { %4639 = vtanh.f32 %v2462_v15  ;;  %v2448_v14 = vadd.f32 %v2432_v9, %v5689_v22  ;;  %v2418_v58 = vmul.f32 %v2402_v46, %v5703_v12  ;;  %v5717_v57 = vadd.f32 %v5614_v47, %v2197_v2 }
 0x788   : > { %v2465_v45 = vmul.f32 0.7978846, %v2449_v41  ;;  %v2435_v27 = vmul.f32 0.044715, %v2419_v21  ;;  %v2405_v23 = vmul.f32 %v5712_v10, %v5712_v10 }
 0x789   : > { %v2464_v1 = vmul.f32 0.7978846, %v2448_v14  ;;  %v2434_v6 = vmul.f32 0.044715, %v2418_v58  ;;  %v2404_v33 = vmul.f32 %v5717_v57, %v5717_v57  ;;  %v2212_v0 = vpop.permute.xlu1 %2211 }
 0x78a   : > { %4641 = vtanh.f32 %v2465_v45  ;;  %v2451_v15 = vadd.f32 %v2435_v27, %v5698_v52  ;;  %v2421_v9 = vmul.f32 %v2405_v23, %v5712_v10  ;;  %v5726_v46 = vadd.f32 %v5616_v56, %v2212_v0  ;;  %v2207_v47 = vpop.permute.xlu0 %2206 }
 0x78b   : > { %4643 = vtanh.f32 %v2464_v1  ;;  %v2450_v61 = vadd.f32 %v2434_v6, %v5703_v12  ;;  %v2420_v41 = vmul.f32 %v2404_v33, %v5717_v57  ;;  %v5731_v21 = vadd.f32 %v5611_v5, %v2207_v47 }
 0x78c   : > { %v4634_v2 = vpop.eup %4633  ;;  %v2467_v14 = vmul.f32 0.7978846, %v2451_v15  ;;  %v2437_v58 = vmul.f32 0.044715, %v2421_v9  ;;  %v2407_v45 = vmul.f32 %v5726_v46, %v5726_v46 }
 0x78d   : > { %v4636_v27 = vpop.eup %4635  ;;  %v2493_v23 = vadd.f32 1.0, %v4634_v2  ;;  %v2466_v55 = vmul.f32 0.7978846, %v2450_v61  ;;  %v2436_v56 = vmul.f32 0.044715, %v2420_v41  ;;  %v2406_v1 = vmul.f32 %v5731_v21, %v5731_v21  ;;  %v2222_v0 = vpop.permute.xlu1 %2221 }
 0x78e   : > { %v2492_v6 = vadd.f32 1.0, %v4636_v27  ;;  %4645 = vtanh.f32 %v2467_v14  ;;  %v2453_v33 = vadd.f32 %v2437_v58, %v5712_v10  ;;  %v2423_v5 = vmul.f32 %v2407_v45, %v5726_v46  ;;  %v2217_v47 = vpop.permute.xlu0 %2216 }
 0x78f   : > { %v2509_v15 = vmul.f32 0.5, %v2493_v23  ;;  %4647 = vtanh.f32 %v2466_v55  ;;  %v2452_v9 = vadd.f32 %v2436_v56, %v5717_v57  ;;  %v2422_v54 = vmul.f32 %v2406_v1, %v5731_v21 }
 0x790   : > { %v4638_v2 = vpop.eup %4637  ;;  %v2508_v61 = vmul.f32 0.5, %v2492_v6  ;;  %v2469_v41 = vmul.f32 0.7978846, %v2453_v33  ;;  %v2439_v53 = vmul.f32 0.044715, %v2423_v5  ;;  %v5742_v40 = vadd.f32 %v5630_v28, %v2217_v47 }
 0x791   : > { %v4640_v27 = vpop.eup %4639  ;;  %v2525_v14 = vmul.f32 %v2509_v15, %v5660_v42  ;;  %v2495_v58 = vadd.f32 1.0, %v4638_v2  ;;  %v2468_v39 = vmul.f32 0.7978846, %v2452_v9  ;;  %v2438_v45 = vmul.f32 0.044715, %v2422_v54  ;;  %v2232_v37 = vpop.permute.xlu1 %2231 }
 0x792   : > { %v2524_v55 = vmul.f32 %v2508_v61, %v5663_v44  ;;  %v2494_v23 = vadd.f32 1.0, %v4640_v27  ;;  %4649 = vtanh.f32 %v2469_v41  ;;  %v2455_v56 = vadd.f32 %v2439_v53, %v5726_v46  ;;  %v2227_v2 = vpop.permute.xlu0 %2226 }
 0x793   : > { %v2511_v1 = vmul.f32 0.5, %v2495_v58  ;;  %4651 = vtanh.f32 %v2468_v39  ;;  %v2454_v6 = vadd.f32 %v2438_v45, %v5731_v21  ;;  %v2408_v28 = vmul.f32 %v5742_v40, %v5742_v40 }
 0x794   : > { %v4642_v33 = vpop.eup %4641  ;;  %v2510_v5 = vmul.f32 0.5, %v2494_v23  ;;  %v2471_v42 = vmul.f32 0.7978846, %v2455_v56  ;;  %v5751_v47 = vadd.f32 %v5635_v50, %v2222_v0  ;;  %v5754_v54 = vadd.f32 %v5632_v16, %v2232_v37 }
 0x795   : > { %v4644_v44 = vpop.eup %4643  ;;  %v2527_v15 = vmul.f32 %v2511_v1, %v5671_v49  ;;  %v2497_v53 = vadd.f32 1.0, %v4642_v33  ;;  %v2470_v9 = vmul.f32 0.7978846, %v2454_v6  ;;  %v2424_v39 = vmul.f32 %v2408_v28, %v5742_v40 }
 0x796   : > { %v2526_v61 = vmul.f32 %v2510_v5, %v5675_v4  ;;  %v2496_v41 = vadd.f32 1.0, %v4644_v44  ;;  %4653 = vtanh.f32 %v2471_v42  ;;  %v2409_v27 = vmul.f32 %v5751_v47, %v5751_v47 }
 0x797   : > { %v2513_v50 = vmul.f32 0.5, %v2497_v53  ;;  %4655 = vtanh.f32 %v2470_v9  ;;  %v2440_v0 = vmul.f32 0.044715, %v2424_v39  ;;  %v2411_v37 = vmul.f32 %v5754_v54, %v5754_v54 }
 0x798   : > { %v4646_v16 = vpop.eup %4645  ;;  %v2512_v49 = vmul.f32 0.5, %v2496_v41  ;;  %v2425_v58 = vmul.f32 %v2409_v27, %v5751_v47  ;;  %v5765_v45 = vadd.f32 %v5625_v25, %v2227_v2  ;;  %v2540_v4 = vadd.f32 %v2524_v55, %v5286_v30 }
 0x799   : > { %v4648_v23 = vpop.eup %4647  ;;  %v2529_v56 = vmul.f32 %v2513_v50, %v5684_v24  ;;  %v2499_v1 = vadd.f32 1.0, %v4646_v16  ;;  %v2456_v6 = vadd.f32 %v2440_v0, %v5742_v40  ;;  %v2427_v28 = vmul.f32 %v2411_v37, %v5754_v54 }
 0x79a   : > { %v2528_v33 = vmul.f32 %v2512_v49, %v5689_v22  ;;  %v2498_v5 = vadd.f32 1.0, %v4648_v23  ;;  %v2441_v42 = vmul.f32 0.044715, %v2425_v58  ;;  %v2410_v44 = vmul.f32 %v5765_v45, %v5765_v45 }
 0x79b   : > { %v2515_v53 = vmul.f32 0.5, %v2499_v1  ;;  %v2472_v25 = vmul.f32 0.7978846, %v2456_v6  ;;  %v2443_v9 = vmul.f32 0.044715, %v2427_v28  ;;  %v2541_v30 = vadd.f32 %v2525_v14, %v5281_v51 }
 0x79c   : > { %v4650_v55 = vpop.eup %4649  ;;  %v2514_v39 = vmul.f32 0.5, %v2498_v5  ;;  %v2457_v24 = vadd.f32 %v2441_v42, %v5751_v47  ;;  %v2426_v2 = vmul.f32 %v2410_v44, %v5765_v45  ;;  %v2542_v41 = vadd.f32 %v2526_v61, %v5298_v17 }
 0x79d   : > { %v4652_v27 = vpop.eup %4651  ;;  %v2531_v22 = vmul.f32 %v2515_v53, %v5698_v52  ;;  %v2501_v50 = vadd.f32 1.0, %v4650_v55  ;;  %4657 = vtanh.f32 %v2472_v25  ;;  %v2459_v0 = vadd.f32 %v2443_v9, %v5754_v54 }
 0x79e   : > { %v2530_v37 = vmul.f32 %v2514_v39, %v5703_v12  ;;  %v2500_v16 = vadd.f32 1.0, %v4652_v27  ;;  %v2473_v49 = vmul.f32 0.7978846, %v2457_v24  ;;  %v2442_v51 = vmul.f32 0.044715, %v2426_v2 }
 0x79f   : > { %v2517_v14 = vmul.f32 0.5, %v2501_v50  ;;  %v2475_v58 = vmul.f32 0.7978846, %v2459_v0  ;;  %v5781_v23 = vpack.c.bf16 %v2541_v30, %v2540_v4  ;;  %v2543_v1 = vadd.f32 %v2527_v15, %v5302_v29 }
 0x7a0   : > { %v4654_v6 = vpop.eup %4653  ;;  %v2516_v17 = vmul.f32 0.5, %v2500_v16  ;;  %4659 = vtanh.f32 %v2473_v49  ;;  %v2458_v52 = vadd.f32 %v2442_v51, %v5765_v45  ;;  %v2544_v61 = vadd.f32 %v2528_v33, %v5316_v20 }
 0x7a1   : > { %v4656_v28 = vpop.eup %4655  ;;  %v2533_v5 = vmul.f32 %v2517_v14, %v5712_v10  ;;  %v2503_v12 = vadd.f32 1.0, %v4654_v6  ;;  %4661 = vtanh.f32 %v2475_v58  ;;  %4160 = vmatprep.subr.bf16.mxu1 %v5781_v23  ;;  %v5788_v42 = vpack.c.bf16 %v2543_v1, %v2542_v41  ;;  %v4534_v1 = vld [vmem:[%s6584_s13 + $0x38] sm:$0xff]   ;;  %v4535_v6 = vld [vmem:[%s6584_s13 + $0x40] sm:$0xff]  }
 0x7a2   : > { %v2532_v4 = vmul.f32 %v2516_v17, %v5717_v57  ;;  %v2502_v44 = vadd.f32 1.0, %v4656_v28  ;;  %v2474_v29 = vmul.f32 0.7978846, %v2458_v52  ;;  %4168 = vmatpush3.bf16.msra.mxu1 %v5781_v23  ;;  %v2545_v15 = vadd.f32 %v2529_v56, %v5311_v31  ;;  %v4536_v17 = vld [vmem:[%s6584_s13 + $0x48] sm:$0xff]   ;;  %v4537_v52 = vld [vmem:[%s6584_s13 + $0x50] sm:$0xff]  }
 0x7a3   : > { %v2519_v53 = vmul.f32 0.5, %v2503_v12  ;;  %4161 = vmatprep.subr.bf16.mxu1 %v5788_v42  ;;  %v2546_v20 = vadd.f32 %v2530_v37, %v5321_v63  ;;  %v2547_v10 = vadd.f32 %v2531_v22, %v5324_v11  ;;  %v2549_v33 = vadd.f32 %v2533_v5, %v5330_v18 }
 0x7a4   : > { %v2518_v25 = vmul.f32 0.5, %v2502_v44  ;;  %4663 = vtanh.f32 %v2474_v29  ;;  %v5797_v9 = vpack.c.bf16 %v2545_v15, %v2544_v61  ;;  %v2548_v57 = vadd.f32 %v2532_v4, %v5327_v13  ;;  %v4538_v61 = vld [vmem:[%s6584_s13 + $0x58] sm:$0xff]  }
 0x7a5   : > { %v2535_v30 = vmul.f32 %v2519_v53, %v5726_v46  ;;  %v5801_v55 = vpack.c.bf16 %v2547_v10, %v2546_v20 }
 0x7a6   : > { %v2534_v31 = vmul.f32 %v2518_v25, %v5731_v21  ;;  %4169 = vmatpush3.bf16.msra.mxu1 %v5788_v42  ;;  %v5805_v56 = vpack.c.bf16 %v2549_v33, %v2548_v57 }
 0x7a7   : > { %v4658_v63 = vpop.eup %4657  ;;  %4162 = vmatprep.subr.bf16.mxu1 %v5797_v9  ;;  %v2551_v11 = vadd.f32 %v2535_v30, %v5340_v19 }
 0x7a8   : > { %v2504_v18 = vadd.f32 1.0, %v4658_v63  ;;  %v2550_v39 = vadd.f32 %v2534_v31, %v5337_v60 }
 0x7aa   : > { %v4660_v24 = vpop.eup %4659  ;;  %v2520_v13 = vmul.f32 0.5, %v2504_v18  ;;  %4170 = vmatpush3.bf16.msra.mxu1 %v5797_v9  ;;  %v5811_v46 = vpack.c.bf16 %v2551_v11, %v2550_v39 }
 0x7ab   : > { %v4662_v2 = vpop.eup %4661  ;;  %v2505_v21 = vadd.f32 1.0, %v4660_v24  ;;  %4163 = vmatprep.subr.bf16.mxu1 %v5801_v55 }
 0x7ac   : > { %v2536_v41 = vmul.f32 %v2520_v13, %v5742_v40  ;;  %v2507_v27 = vadd.f32 1.0, %v4662_v2 }
 0x7ad   : > { %v2521_v22 = vmul.f32 0.5, %v2505_v21 }
 0x7ae   : > { %v4664_v50 = vpop.eup %4663  ;;  %v2523_v0 = vmul.f32 0.5, %v2507_v27  ;;  %4171 = vmatpush3.bf16.msra.mxu1 %v5801_v55  ;;  %v2552_v37 = vadd.f32 %v2536_v41, %v5345_v8 }
 0x7af   : > { %v2537_v60 = vmul.f32 %v2521_v22, %v5751_v47  ;;  %v2506_v19 = vadd.f32 1.0, %v4664_v50  ;;  %4164 = vmatprep.subr.bf16.mxu1 %v5805_v56 }
 0x7b0   : > { %v2539_v16 = vmul.f32 %v2523_v0, %v5754_v54  ;;  %v4532_v54 = vld [vmem:[%s6584_s13 + $0x28] sm:$0xff]  }
 0x7b1   : > { %v2522_v49 = vmul.f32 0.5, %v2506_v19  ;;  %v2553_v51 = vadd.f32 %v2537_v60, %v5348_v26  ;;  %v4529_v26 = vld [vmem:[%s6584_s13 + $0x10] sm:$0xff]  }
 0x7b2   : > { %4172 = vmatpush3.bf16.msra.mxu1 %v5805_v56  ;;  %v2555_v47 = vadd.f32 %v2539_v16, %v5356_v48  ;;  %v4531_v48 = vld [vmem:[%s6584_s13 + $0x20] sm:$0xff]   ;;  %4132 = vmatprep.mubr.bf16.mxu1 %v4529_v26 }
 0x7b3   : > { %v2538_v40 = vmul.f32 %v2522_v49, %v5765_v45  ;;  %4165 = vmatprep.subr.bf16.mxu1 %v5811_v46  ;;  %v5824_v14 = vpack.c.bf16 %v2553_v51, %v2552_v37  ;;  %v4533_v45 = vld [vmem:[%s6584_s13 + $0x30] sm:$0xff]  }
 0x7b5   : > { %v2554_v58 = vadd.f32 %v2538_v40, %v5353_v43  ;;  %v4530_v43 = vld [vmem:[%s6584_s13 + $0x18] sm:$0xff]  }
 0x7b6   : > { %4173 = vmatpush3.bf16.msra.mxu1 %v5811_v46 }
 0x7b7   : > { %4166 = vmatprep.subr.bf16.mxu1 %v5824_v14  ;;  %v5830_v8 = vpack.c.bf16 %v2555_v47, %v2554_v58 }
 0x7ba   : > { %4174 = vmatpush3.bf16.msra.mxu1 %v5824_v14 }
 0x7bb   : > { %4167 = vmatprep.subr.bf16.mxu1 %v5830_v8 }
 0x7be   : > { %4175 = vmatpush3.bf16.msra.mxu1 %v5830_v8 }
 0x7c1   : > { %4133 = vmatmul.mubr.bf16.vlgmr.msra.gmra.mrb[28].mxu1 %v4530_v43 }
 0x7c2   : > { %4136 = vmatprep.mubr.bf16.mxu1 %v4531_v48 }
 0x7c9   : > { %4137 = vmatmul.mubr.bf16.gmra.mrb[32].mxu1 %v4532_v54 }
 0x7ca   : > { %4140 = vmatprep.mubr.bf16.mxu1 %v4533_v45 }
 0x7d1   : > { %4141 = vmatmul.mubr.bf16.gmra.mrb[36].mxu1 %v4534_v1 }
 0x7d2   : > { %4144 = vmatprep.mubr.bf16.mxu1 %v4535_v6 }
 0x7d9   : > { %4145 = vmatmul.mubr.bf16.gmra.mrb[40].mxu1 %v4536_v17 }
 0x7da   : > { %4148 = vmatprep.mubr.bf16.mxu1 %v4537_v52 }
 0x7e1   : > { %4149 = vmatmul.mubr.bf16.gmra.mrb[44].mxu1 %v4538_v61 }
 0x832   : > { %v4082_v28 = vpop.f32.mrb[24].mxu0 }
 0x833   : > { %v5866_v5 = vadd.f32 %v4082_v28, %v5649_v35  ;;  %v2007_v12 = vpop.f32.mrb[25].mxu0 }
 0x834   : > { %v5869_v4 = vadd.f32 %v2007_v12, %v5644_v7  ;;  %v4083_v44 = vpop.f32.mrb[26].mxu0 }
 0x835   : > { %v2040_v29 = vmul.f32 %v5866_v5, %v5866_v5  ;;  %v5874_v15 = vadd.f32 %v4083_v44, %v5647_v34  ;;  %v2010_v53 = vpop.f32.mrb[27].mxu0 }
 0x836   : > { %v2038_v20 = vmul.f32 %v5869_v4, %v5869_v4  ;;  %v5879_v10 = vadd.f32 %v2010_v53, %v5642_v32 }
 0x837   : > { %v2048_v35 = vmul.f32 %v2040_v29, %v5866_v5  ;;  %v2041_v7 = vmul.f32 %v5874_v15, %v5874_v15 }
 0x838   : > { %v2046_v33 = vmul.f32 %v2038_v20, %v5869_v4  ;;  %v2039_v25 = vmul.f32 %v5879_v10, %v5879_v10 }
 0x839   : > { %v2056_v57 = vmul.f32 0.044715, %v2048_v35  ;;  %v2049_v34 = vmul.f32 %v2041_v7, %v5874_v15 }
 0x83a   : > { %v2054_v30 = vmul.f32 0.044715, %v2046_v33  ;;  %v2047_v31 = vmul.f32 %v2039_v25, %v5879_v10  ;;  %v4086_v63 = vpop.f32.mrb[28].mxu0 }
 0x83b   : > { %v2064_v32 = vadd.f32 %v2056_v57, %v5866_v5  ;;  %v2057_v11 = vmul.f32 0.044715, %v2049_v34  ;;  %v5891_v18 = vadd.f32 %v4086_v63, %v5657_v38  ;;  %v2023_v39 = vpop.f32.mrb[29].mxu0  ;;  %v4539_v34 = vld [vmem:[%s6584_s13 + $0x60] sm:$0xff]  }
 0x83c   : > { %v2062_v24 = vadd.f32 %v2054_v30, %v5869_v4  ;;  %v2055_v13 = vmul.f32 0.044715, %v2047_v31  ;;  %v5895_v2 = vadd.f32 %v2023_v39, %v5653_v62  ;;  %v4087_v21 = vpop.f32.mrb[30].mxu0  ;;  %4152 = vmatprep.mubr.bf16.mxu1 %v4539_v34 }
 0x83d   : > { %v2072_v41 = vmul.f32 0.7978846, %v2064_v32  ;;  %v2065_v27 = vadd.f32 %v2057_v11, %v5874_v15  ;;  %v2044_v22 = vmul.f32 %v5891_v18, %v5891_v18  ;;  %v5901_v50 = vadd.f32 %v4087_v21, %v5655_v3  ;;  %v2026_v0 = vpop.f32.mrb[31].mxu0  ;;  %v4540_v11 = vld [vmem:[%s6584_s13 + $0x68] sm:$0xff]  }
 0x83e   : > { %v2070_v38 = vmul.f32 0.7978846, %v2062_v24  ;;  %v2063_v60 = vadd.f32 %v2055_v13, %v5879_v10  ;;  %v2042_v19 = vmul.f32 %v5895_v2, %v5895_v2  ;;  %v5907_v62 = vadd.f32 %v2026_v0, %v5651_v59  ;;  %4153 = vmatmul.mubr.bf16.gmra.mrb[48].mxu1 %v4540_v11 }
 0x83f   : > { %4665 = vtanh.f32 %v2072_v41  ;;  %v2073_v37 = vmul.f32 0.7978846, %v2065_v27  ;;  %v2052_v16 = vmul.f32 %v2044_v22, %v5891_v18  ;;  %v2045_v49 = vmul.f32 %v5901_v50, %v5901_v50 }
 0x840   : > { %4667 = vtanh.f32 %v2070_v38  ;;  %v2071_v3 = vmul.f32 0.7978846, %v2063_v60  ;;  %v2050_v51 = vmul.f32 %v2042_v19, %v5895_v2  ;;  %v2043_v40 = vmul.f32 %v5907_v62, %v5907_v62  ;;  %v6626_v19 = vld [vmem:[#allocation5_spill] sm:$0xff] }
 0x841   : > { %4669 = vtanh.f32 %v2073_v37  ;;  %v2060_v47 = vmul.f32 0.044715, %v2052_v16  ;;  %v2053_v58 = vmul.f32 %v2045_v49, %v5901_v50 }
 0x842   : > { %4671 = vtanh.f32 %v2071_v3  ;;  %v2058_v59 = vmul.f32 0.044715, %v2050_v51  ;;  %v2051_v26 = vmul.f32 %v2043_v40, %v5907_v62 }
 0x843   : > { %v2068_v43 = vadd.f32 %v2060_v47, %v5891_v18  ;;  %v2061_v48 = vmul.f32 0.044715, %v2053_v58 }
 0x844   : > { %v2066_v54 = vadd.f32 %v2058_v59, %v5895_v2  ;;  %v2059_v45 = vmul.f32 0.044715, %v2051_v26  ;;  %v4541_v26 = vld [vmem:[%s6584_s13 + $0x70] sm:$0xff]  }
 0x845   : > { %v2076_v1 = vmul.f32 0.7978846, %v2068_v43  ;;  %v2069_v6 = vadd.f32 %v2061_v48, %v5901_v50  ;;  %v4542_v48 = vld [vmem:[%s6584_s13 + $0x78] sm:$0xff]   ;;  %4156 = vmatprep.mubr.bf16.mxu1 %v4541_v26  ;;  %v4545_v26 = vld [vmem:[%s6582_s11 + $0x4] ss:$8 sps:$4 sm:$0xff]  }
 0x846   : > { %v2074_v17 = vmul.f32 0.7978846, %v2066_v54  ;;  %v2067_v52 = vadd.f32 %v2059_v45, %v5907_v62  ;;  %v6627_v54 = vld [vmem:[#allocation6_spill] sm:$0xff]  ;;  %4157 = vmatmul.mubr.bf16.gmra.mrb[52].mxu1 %v4542_v48  ;;  %3872 = vmatprep.mubr.msk.bf16.mxu0 %vm2274_vm11, %v4545_v26 }
 0x847   : > { %4673 = vtanh.f32 %v2076_v1  ;;  %v2077_v61 = vmul.f32 0.7978846, %v2069_v6  ;;  %v6628_v1 = vld [vmem:[#allocation7_spill] sm:$0xff]  ;;  %v6629_v6 = vld [vmem:[#allocation8_spill] sm:$0xff]  ;;  %v2736_v48 = vld [vmem:[%s6583_s12] sm:$0xff] }
 0x848   : > { %4675 = vtanh.f32 %v2074_v17  ;;  %v2075_v28 = vmul.f32 0.7978846, %v2067_v52  ;;  %v6630_v52 = vld [vmem:[#allocation9_spill] sm:$0xff]  ;;  %v2965_v26 = vld [vmem:[%s6585_s14 + $0xe0] sm:$0xff] }
 0x849   : > { %v4666_v12 = vpop.eup %4665  ;;  %4677 = vtanh.f32 %v2077_v61 }
 0x84a   : > { %v4668_v44 = vpop.eup %4667  ;;  %v2088_v29 = vadd.f32 1.0, %v4666_v12  ;;  %4679 = vtanh.f32 %v2075_v28 }
 0x84b   : > { %v4670_v53 = vpop.eup %4669  ;;  %v2086_v20 = vadd.f32 1.0, %v4668_v44 }
 0x84c   : > { %v4672_v35 = vpop.eup %4671  ;;  %v2096_v7 = vmul.f32 0.5, %v2088_v29  ;;  %v2089_v33 = vadd.f32 1.0, %v4670_v53 }
 0x84d   : > { %v2087_v25 = vadd.f32 1.0, %v4672_v35  ;;  %v2094_v57 = vmul.f32 0.5, %v2086_v20 }
 0x84e   : > { %v2104_v30 = vmul.f32 %v2096_v7, %v5866_v5  ;;  %v2097_v31 = vmul.f32 0.5, %v2089_v33  ;;  %v6624_v5 = vld [vmem:[#allocation3_spill] sm:$0xff] }
 0x84f   : > { %v2095_v63 = vmul.f32 0.5, %v2087_v25  ;;  %v2102_v32 = vmul.f32 %v2094_v57, %v5869_v4  ;;  %v6625_v4 = vld [vmem:[#allocation4_spill] sm:$0xff] }
 0x850   : > { %v2105_v39 = vmul.f32 %v2097_v31, %v5874_v15  ;;  %v2112_v27 = vadd.f32 %v2104_v30, %v4962_v36 }
 0x851   : > { %v4674_v24 = vpop.eup %4673  ;;  %v2103_v13 = vmul.f32 %v2095_v63, %v5879_v10  ;;  %v2110_v60 = vadd.f32 %v2102_v32, %v6625_v4 }
 0x852   : > { %v4676_v21 = vpop.eup %4675  ;;  %v2092_v41 = vadd.f32 1.0, %v4674_v24  ;;  %v2113_v22 = vadd.f32 %v2105_v39, %v6624_v5  ;;  %v2953_v39 = vld [vmem:[%s6585_s14 + $0x80] sm:$0xff] }
 0x853   : > { %v4678_v0 = vpop.eup %4677  ;;  %v2090_v38 = vadd.f32 1.0, %v4676_v21  ;;  %v2111_v37 = vadd.f32 %v2103_v13, %v6626_v19  ;;  %v6633_v13 = vmov 0  }
 0x854   : > { %v4680_v16 = vpop.eup %4679  ;;  %v2100_v49 = vmul.f32 0.5, %v2092_v41  ;;  %v2093_v3 = vadd.f32 1.0, %v4678_v0  ;;  %v4404_v15 = vpack.i.bf16 %v2113_v22, %v2112_v27 }
 0x855   : > { %v2098_v51 = vmul.f32 0.5, %v2090_v38  ;;  %v2091_v40 = vadd.f32 1.0, %v4680_v16  ;;  %v4399_v10 = vpack.i.bf16 %v2111_v37, %v2110_v60 }
 0x856   : > { %v2108_v47 = vmul.f32 %v2100_v49, %v5891_v18  ;;  %v2101_v58 = vmul.f32 0.5, %v2093_v3  ;;  %4405 = vrot.lane.b32.xlu1 %v4404_v15, %s4694_s25 }
 0x857   : > { %v2106_v36 = vmul.f32 %v2098_v51, %v5895_v2  ;;  %v2099_v59 = vmul.f32 0.5, %v2091_v40  ;;  %4400 = vrot.lane.b32.xlu0 %v4399_v10, %s4694_s25 }
 0x858   : > { %v2109_v43 = vmul.f32 %v2101_v58, %v5901_v50  ;;  %v2116_v45 = vadd.f32 %v2108_v47, %v6627_v54  ;;  %v2738_v54 = vld [vmem:[%s6583_s12 + $0x10] sm:$0xff] }
 0x859   : > { %v2107_v18 = vmul.f32 %v2099_v59, %v5907_v62  ;;  %v2114_v17 = vadd.f32 %v2106_v36, %v6629_v6  ;;  %v2742_v6 = vld [vmem:[%s6583_s12 + $0x30] sm:$0xff] }
 0x85a   : > { %v2117_v2 = vadd.f32 %v2109_v43, %v6628_v1  ;;  %v2737_v43 = vld [vmem:[%s6583_s12 + $0x8] sm:$0xff]  ;;  %v2740_v1 = vld [vmem:[%s6583_s12 + $0x20] sm:$0xff] }
 0x85b   : > { %v2115_v61 = vadd.f32 %v2107_v18, %v6630_v52  ;;  %v2739_v18 = vld [vmem:[%s6583_s12 + $0x18] sm:$0xff]  ;;  %v2937_v52 = vld [vmem:[%s6585_s14] sm:$0xff] }
 0x85c   : > { %v4414_v28 = vpack.i.bf16 %v2117_v2, %v2116_v45  ;;  %v2741_v45 = vld [vmem:[%s6583_s12 + $0x28] sm:$0xff]  ;;  %v2743_v2 = vld [vmem:[%s6583_s12 + $0x38] sm:$0xff] }
 0x85d   : > { %v4409_v12 = vpack.i.bf16 %v2115_v61, %v2114_v17  ;;  %v2938_v17 = vld [vmem:[%s6585_s14 + $0x8] sm:$0xff] }
 0x85e   : > { %4415 = vrot.lane.b32.xlu1 %v4414_v28, %s4694_s25 }
 0x85f   : > { %4410 = vrot.lane.b32.xlu0 %v4409_v12, %s4694_s25  ;;  %v2945_v12 = vld [vmem:[%s6585_s14 + $0x40] sm:$0xff] }
 0x894   : > { %v6031_v61 = vpop.f32.mrb[28].mxu1 }
 0x895   : > { %v6033_v28 = vpop.f32.mrb[29].mxu1 }
 0x8c8   : > { %v4406_v50 = vpop.permute.xlu1 %4405 }
 0x8c9   : > { %v4401_v44 = vpop.permute.xlu0 %4400  ;;  %v4408_v29 = vunpack.i.h.bf16 %v4406_v50  ;;  %v4407_v20 = vunpack.i.l.bf16 %v4406_v50  ;;  %v6038_v50 = vpop.f32.mrb[30].mxu1 }
 0x8ca   : > { %v4403_v62 = vunpack.i.h.bf16 %v4401_v44  ;;  %v4402_v53 = vunpack.i.l.bf16 %v4401_v44  ;;  %v2939_v44 = vld [vmem:[%s6585_s14 + $0x10] sm:$0xff] }
 0x8cb   : > { %v2591_v30 = vsel %vm1315_vm8, 0.0, %v4408_v29  ;;  %v2599_v31 = vsel %vm1315_vm8, %v4408_v29, 0.0  ;;  %v2590_v32 = vsel %vm1315_vm8, 0.0, %v4407_v20  ;;  %v2598_v11 = vsel %vm1315_vm8, %v4407_v20, 0.0 }
 0x8cc   : > { %v2589_v35 = vsel %vm1315_vm8, 0.0, %v4403_v62  ;;  %v2597_v7 = vsel %vm1315_vm8, %v4403_v62, 0.0  ;;  %v2588_v33 = vsel %vm1315_vm8, 0.0, %v4402_v53  ;;  %v2596_v25 = vsel %vm1315_vm8, %v4402_v53, 0.0 }
 0x8cd   : > { %v3855_v57 = vpack.c.bf16 %v4403_v62, %v4402_v53  ;;  %v4429_v34 = vpack.i.bf16 %v2597_v7, %v2589_v35  ;;  %v4419_v63 = vpack.i.bf16 %v2596_v25, %v2588_v33  ;;  %v3860_v21 = vpack.c.bf16 %v4408_v29, %v4407_v20  ;;  %v6043_v29 = vpop.f32.mrb[31].mxu1  ;;  %v2947_v20 = vld [vmem:[%s6585_s14 + $0x50] sm:$0xff]  ;;  %v2946_v7 = vld [vmem:[%s6585_s14 + $0x48] sm:$0xff]  ;;  %v2949_v25 = vld [vmem:[%s6585_s14 + $0x60] sm:$0xff] }
 0x8ce   : > { %v4434_v27 = vpack.i.bf16 %v2599_v31, %v2591_v30  ;;  %v4424_v0 = vpack.i.bf16 %v2598_v11, %v2590_v32  ;;  %v6045_v62 = vpop.f32.mrb[32].mxu1  ;;  %v2951_v30 = vld [vmem:[%s6585_s14 + $0x70] sm:$0xff] }
 0x8cf   : > { %3856 = vmatpush1.bf16.msk.msra.mxu0 %vm5084_vm10, %v3855_v57  ;;  %4430 = vrot.lane.b32.xlu1 %v4429_v34, %s6632_s29  ;;  %v6047_v53 = vpop.f32.mrb[33].mxu1 }
 0x8d0   : > { %4420 = vrot.lane.b32.xlu0 %v4419_v63, %s6632_s29  ;;  %v4416_v24 = vpop.permute.xlu1 %4415  ;;  %2834 = vmatprep.subr.bf16.mxu0 %v6633_v13  ;;  %v6052_v35 = vpop.f32.mrb[34].mxu1 }
 0x8d1   : > { %v4411_v41 = vpop.permute.xlu0 %4410  ;;  %v4418_v38 = vunpack.i.h.bf16 %v4416_v24  ;;  %v4417_v4 = vunpack.i.l.bf16 %v4416_v24  ;;  %v6057_v33 = vpop.f32.mrb[35].mxu1 }
 0x8d2   : > { %v4413_v5 = vunpack.i.h.bf16 %v4411_v41  ;;  %v4412_v22 = vunpack.i.l.bf16 %v4411_v41  ;;  %v6062_v57 = vpop.f32.mrb[36].mxu1  ;;  %v2955_v41 = vld [vmem:[%s6585_s14 + $0x90] sm:$0xff] }
 0x8d3   : > { %3861 = vmatpush1.bf16.msk.msra.mxu0 %vm5084_vm10, %v3860_v21  ;;  %4435 = vrot.lane.b32.xlu1 %v4434_v27, %s6632_s29  ;;  %v2595_v15 = vsel %vm1315_vm8, 0.0, %v4418_v38  ;;  %v2603_v51 = vsel %vm1315_vm8, %v4418_v38, 0.0  ;;  %v2594_v10 = vsel %vm1315_vm8, 0.0, %v4417_v4  ;;  %v2602_v47 = vsel %vm1315_vm8, %v4417_v4, 0.0  ;;  %v6070_v31 = vpop.f32.mrb[37].mxu1  ;;  %v2952_v21 = vld [vmem:[%s6585_s14 + $0x78] sm:$0xff] }
 0x8d4   : > { %4425 = vrot.lane.b32.xlu0 %v4424_v0, %s6632_s29  ;;  %v2593_v60 = vsel %vm1315_vm8, 0.0, %v4413_v5  ;;  %v2601_v19 = vsel %vm1315_vm8, %v4413_v5, 0.0  ;;  %v2592_v37 = vsel %vm1315_vm8, 0.0, %v4412_v22  ;;  %2836 = vmatprep.subr.bf16.mxu0 %v6633_v13  ;;  %v2600_v49 = vsel %vm1315_vm8, %v4412_v22, 0.0  ;;  %v6075_v32 = vpop.f32.mrb[38].mxu1 }
 0x8d5   : > { %v4449_v16 = vpack.i.bf16 %v2601_v19, %v2593_v60  ;;  %v3865_v3 = vpack.c.bf16 %v4413_v5, %v4412_v22  ;;  %v4439_v40 = vpack.i.bf16 %v2600_v49, %v2592_v37  ;;  %v4454_v58 = vpack.i.bf16 %v2603_v51, %v2595_v15  ;;  %v6077_v11 = vpop.f32.mrb[39].mxu1  ;;  %v2954_v5 = vld [vmem:[%s6585_s14 + $0x88] sm:$0xff]  ;;  %v2956_v60 = vld [vmem:[%s6585_s14 + $0x98] sm:$0xff]  ;;  %v2959_v19 = vld [vmem:[%s6585_s14 + $0xb0] sm:$0xff] }
 0x8d6   : > { %v3870_v36 = vpack.c.bf16 %v4418_v38, %v4417_v4  ;;  %v4444_v59 = vpack.i.bf16 %v2602_v47, %v2594_v10  ;;  %v6082_v24 = vpop.f32.mrb[40].mxu1  ;;  %v2957_v38 = vld [vmem:[%s6585_s14 + $0xa0] sm:$0xff]  ;;  %v2960_v51 = vld [vmem:[%s6585_s14 + $0xb8] sm:$0xff]  ;;  %v2963_v10 = vld [vmem:[%s6585_s14 + $0xd0] sm:$0xff] }
 0x8d7   : > { %3866 = vmatpush1.bf16.msk.msra.mxu0 %vm5084_vm10, %v3865_v3  ;;  %4450 = vrot.lane.b32.xlu1 %v4449_v16, %s6632_s29  ;;  %v2961_v15 = vld [vmem:[%s6585_s14 + $0xc0] sm:$0xff] }
 0x8d8   : > { %4440 = vrot.lane.b32.xlu0 %v4439_v40, %s6632_s29  ;;  %2838 = vmatprep.subr.bf16.mxu0 %v6633_v13 }
 0x8db   : > { %3871 = vmatpush1.bf16.msk.msra.mxu0 %vm5084_vm10, %v3870_v36  ;;  %4455 = vrot.lane.b32.xlu1 %v4454_v58, %s6632_s29 }
 0x8dc   : > { %4445 = vrot.lane.b32.xlu0 %v4444_v59, %s6632_s29  ;;  %2840 = vmatprep.subr.bf16.mxu0 %v6633_v13 }
 0x8df   : > { %4465 = vrot.lane.b32.xlu1 %v4429_v34, %s6622_s26  ;;  %v2948_v34 = vld [vmem:[%s6585_s14 + $0x58] sm:$0xff] }
 0x8e0   : > { %4460 = vrot.lane.b32.xlu0 %v4419_v63, %s6622_s26  ;;  %v2950_v63 = vld [vmem:[%s6585_s14 + $0x68] sm:$0xff] }
 0x8e3   : > { %4475 = vrot.lane.b32.xlu1 %v4434_v27, %s6622_s26  ;;  %v6090_v27 = vpop.f32.mrb[41].mxu1 }
 0x8e4   : > { %4470 = vrot.lane.b32.xlu0 %v4424_v0, %s6622_s26  ;;  %v6095_v22 = vpop.f32.mrb[42].mxu1 }
 0x8e5   : > { %v6097_v0 = vpop.f32.mrb[43].mxu1 }
 0x8e6   : > { %v6102_v4 = vpop.f32.mrb[44].mxu1 }
 0x8e7   : > { %4490 = vrot.lane.b32.xlu1 %v4449_v16, %s6622_s26  ;;  %v6110_v37 = vpop.f32.mrb[45].mxu1  ;;  %v2958_v16 = vld [vmem:[%s6585_s14 + $0xa8] sm:$0xff] }
 0x8e8   : > { %4480 = vrot.lane.b32.xlu0 %v4439_v40, %s6622_s26  ;;  %v6115_v49 = vpop.f32.mrb[46].mxu1 }
 0x8e9   : > { %v6117_v3 = vpop.f32.mrb[47].mxu1 }
 0x8eb   : > { %4495 = vrot.lane.b32.xlu1 %v4454_v58, %s6622_s26  ;;  %v2962_v58 = vld [vmem:[%s6585_s14 + $0xc8] sm:$0xff] }
 0x8ec   : > { %4485 = vrot.lane.b32.xlu0 %v4444_v59, %s6622_s26 }
 0x8ef   : > { %2751 = vperm.xlu1 %4267, %v2737_v43   ;;  %v2964_v43 = vld [vmem:[%s6585_s14 + $0xd8] sm:$0xff] }
 0x8f0   : > { %2746 = vperm.xlu0 %4268, %v2736_v48   ;;  %v2967_v48 = vld [vmem:[%s6585_s14 + $0xf0] sm:$0xff] }
 0x8f3   : > { %2761 = vperm.xlu1 %4267, %v2739_v18  }
 0x8f4   : > { %2756 = vperm.xlu0 %4268, %v2738_v54   ;;  %v2966_v54 = vld [vmem:[%s6585_s14 + $0xe8] sm:$0xff] }
 0x8f7   : > { %2771 = vperm.xlu1 %4267, %v2741_v45  }
 0x8f8   : > { %2766 = vperm.xlu0 %4268, %v2740_v1  }
 0x8fb   : > { %2781 = vperm.xlu1 %4267, %v2743_v2  }
 0x8fc   : > { %2776 = vperm.xlu0 %4268, %v2742_v6   ;;  %v2940_v6 = vld [vmem:[%s6585_s14 + $0x18] sm:$0xff] }
 0x8ff   : > { %2976 = vperm.xlu1 %4267, %v2938_v17   ;;  %v2968_v17 = vld [vmem:[%s6585_s14 + $0xf8] sm:$0xff] }
 0x900   : > { %2971 = vperm.xlu0 %4268, %v2937_v52   ;;  %v2942_v52 = vld [vmem:[%s6585_s14 + $0x28] sm:$0xff] }
 0x903   : > { %3011 = vperm.xlu1 %4267, %v2945_v12   ;;  %v2941_v12 = vld [vmem:[%s6585_s14 + $0x20] sm:$0xff] }
 0x904   : > { %2981 = vperm.xlu0 %4268, %v2939_v44   ;;  %v2944_v44 = vld [vmem:[%s6585_s14 + $0x38] sm:$0xff] }
 0x907   : > { %3021 = vperm.xlu1 %4267, %v2947_v20   ;;  %v2943_v20 = vld [vmem:[%s6585_s14 + $0x30] sm:$0xff] }
 0x908   : > { %3016 = vperm.xlu0 %4268, %v2946_v7  }
 0x90b   : > { %3031 = vperm.xlu1 %4267, %v2949_v25  }
 0x90c   : > { %3026 = vperm.xlu0 %4268, %v2948_v34  }
 0x90f   : > { %3041 = vperm.xlu1 %4267, %v2951_v30  }
 0x910   : > { %3036 = vperm.xlu0 %4268, %v2950_v63  }
 0x911   : > { %v6125_v40 = vpop.f32.mrb[48].mxu1 }
 0x912   : > { %v6130_v47 = vpop.f32.mrb[49].mxu1 }
 0x913   : > { %3051 = vperm.xlu1 %4267, %v2953_v39   ;;  %v6135_v36 = vpop.f32.mrb[50].mxu1 }
 0x914   : > { %3046 = vperm.xlu0 %4268, %v2952_v21   ;;  %v6137_v59 = vpop.f32.mrb[51].mxu1 }
 0x917   : > { %3061 = vperm.xlu1 %4267, %v2955_v41  }
 0x918   : > { %3056 = vperm.xlu0 %4268, %v2954_v5  }
 0x919   : > { %v6148_v18 = vpop.f32.mrb[52].mxu1 }
 0x91a   : > { %v6153_v45 = vpop.f32.mrb[53].mxu1 }
 0x91b   : > { %3071 = vperm.xlu1 %4267, %v2957_v38   ;;  %v6155_v1 = vpop.f32.mrb[54].mxu1 }
 0x91c   : > { %3066 = vperm.xlu0 %4268, %v2956_v60   ;;  %v6157_v2 = vpop.f32.mrb[55].mxu1 }
 0x91f   : > { %3081 = vperm.xlu1 %4267, %v2959_v19  }
 0x920   : > { %3076 = vperm.xlu0 %4268, %v2958_v16  }
 0x923   : > { %3091 = vperm.xlu1 %4267, %v2961_v15  }
 0x924   : > { %3086 = vperm.xlu0 %4268, %v2960_v51  }
 0x927   : > { %3101 = vperm.xlu1 %4267, %v2963_v10  }
 0x928   : > { %3096 = vperm.xlu0 %4268, %v2962_v58  }
 0x92b   : > { %3111 = vperm.xlu1 %4267, %v2965_v26  }
 0x92c   : > { %3106 = vperm.xlu0 %4268, %v2964_v43  }
 0x92f   : > { %3121 = vperm.xlu1 %4267, %v2967_v48  }
 0x930   : > { %3116 = vperm.xlu0 %4268, %v2966_v54  }
 0x933   : > { %2986 = vperm.xlu1 %4267, %v2940_v6  }
 0x934   : > { %3126 = vperm.xlu0 %4268, %v2968_v17  }
 0x937   : > { %2996 = vperm.xlu1 %4267, %v2942_v52  }
 0x938   : > { %2991 = vperm.xlu0 %4268, %v2941_v12  }
 0x93b   : > { %3006 = vperm.xlu1 %4267, %v2944_v44  }
 0x93c   : > { %3001 = vperm.xlu0 %4268, %v2943_v20  }
 0x941   : > { %v4431_v7 = vpop.permute.xlu1 %4430 }
 0x942   : > { %v4433_v25 = vunpack.i.h.bf16 %v4431_v7  ;;  %v4432_v34 = vunpack.i.l.bf16 %v4431_v7  ;;  %v4421_v30 = vpop.permute.xlu0 %4420 }
 0x943   : > { %v4423_v63 = vunpack.i.h.bf16 %v4421_v30  ;;  %v4422_v39 = vunpack.i.l.bf16 %v4421_v30 }
 0x944   : > { %v2653_v21 = vsel %vm619_vm5, %v4432_v34, %v4433_v25 }
 0x945   : > { %v2652_v41 = vsel %vm619_vm5, %v4422_v39, %v4423_v63  ;;  %v4436_v5 = vpop.permute.xlu1 %4435 }
 0x946   : > { %v2728_v38 = vpack.c.bf16 %v2653_v21, %v2652_v41  ;;  %v4438_v60 = vunpack.i.h.bf16 %v4436_v5  ;;  %v4437_v19 = vunpack.i.l.bf16 %v4436_v5  ;;  %v4426_v16 = vpop.permute.xlu0 %4425 }
 0x947   : > { %v4428_v15 = vunpack.i.h.bf16 %v4426_v16  ;;  %v4427_v51 = vunpack.i.l.bf16 %v4426_v16 }
 0x948   : > { %v2655_v10 = vsel %vm619_vm5, %v4437_v19, %v4438_v60  ;;  %2841 = vmatpush1.bf16.msra.mxu0 %v2728_v38 }
 0x949   : > { %v2654_v58 = vsel %vm619_vm5, %v4427_v51, %v4428_v15  ;;  %2842 = vmatprep.subr.bf16.mxu0 %v6633_v13  ;;  %v4451_v43 = vpop.permute.xlu1 %4450 }
 0x94a   : > { %v2729_v26 = vpack.c.bf16 %v2655_v10, %v2654_v58  ;;  %v4453_v48 = vunpack.i.h.bf16 %v4451_v43  ;;  %v4452_v54 = vunpack.i.l.bf16 %v4451_v43  ;;  %v4441_v6 = vpop.permute.xlu0 %4440 }
 0x94b   : > { %v4443_v17 = vunpack.i.h.bf16 %v4441_v6  ;;  %v4442_v52 = vunpack.i.l.bf16 %v4441_v6 }
 0x94c   : > { %2843 = vmatpush1.bf16.msra.mxu0 %v2729_v26  ;;  %v2657_v12 = vsel %vm619_vm5, %v4452_v54, %v4453_v48 }
 0x94d   : > { %2844 = vmatprep.subr.bf16.mxu0 %v6633_v13  ;;  %v2656_v44 = vsel %vm619_vm5, %v4442_v52, %v4443_v17  ;;  %v4456_v20 = vpop.permute.xlu1 %4455 }
 0x94e   : > { %v2730_v7 = vpack.c.bf16 %v2657_v12, %v2656_v44  ;;  %v4458_v25 = vunpack.i.h.bf16 %v4456_v20  ;;  %v4457_v34 = vunpack.i.l.bf16 %v4456_v20  ;;  %v4446_v30 = vpop.permute.xlu0 %4445 }
 0x94f   : > { %v4448_v63 = vunpack.i.h.bf16 %v4446_v30  ;;  %v4447_v39 = vunpack.i.l.bf16 %v4446_v30 }
 0x950   : > { %v2659_v21 = vsel %vm619_vm5, %v4457_v34, %v4458_v25  ;;  %2845 = vmatpush1.bf16.msra.mxu0 %v2730_v7 }
 0x951   : > { %v2658_v41 = vsel %vm619_vm5, %v4447_v39, %v4448_v63  ;;  %v4466_v5 = vpop.permute.xlu1 %4465  ;;  %2846 = vmatprep.subr.bf16.mxu0 %v6633_v13 }
 0x952   : > { %v2731_v38 = vpack.c.bf16 %v2659_v21, %v2658_v41  ;;  %v4468_v60 = vunpack.i.h.bf16 %v4466_v5  ;;  %v4467_v19 = vunpack.i.l.bf16 %v4466_v5  ;;  %v4461_v16 = vpop.permute.xlu0 %4460 }
 0x953   : > { %v4463_v15 = vunpack.i.h.bf16 %v4461_v16  ;;  %v4462_v51 = vunpack.i.l.bf16 %v4461_v16 }
 0x954   : > { %v2701_v10 = vsel %vm632_vm6, %v4467_v19, %v4468_v60  ;;  %2847 = vmatpush1.bf16.msra.mxu0 %v2731_v38 }
 0x955   : > { %v2700_v58 = vsel %vm632_vm6, %v4462_v51, %v4463_v15  ;;  %v4476_v26 = vpop.permute.xlu1 %4475  ;;  %2848 = vmatprep.subr.bf16.mxu0 %v6633_v13 }
 0x956   : > { %v2732_v43 = vpack.c.bf16 %v2701_v10, %v2700_v58  ;;  %v4478_v48 = vunpack.i.h.bf16 %v4476_v26  ;;  %v4477_v54 = vunpack.i.l.bf16 %v4476_v26  ;;  %v4471_v6 = vpop.permute.xlu0 %4470 }
 0x957   : > { %v4473_v17 = vunpack.i.h.bf16 %v4471_v6  ;;  %v4472_v52 = vunpack.i.l.bf16 %v4471_v6 }
 0x958   : > { %v2703_v12 = vsel %vm632_vm6, %v4477_v54, %v4478_v48  ;;  %2849 = vmatpush1.bf16.msra.mxu0 %v2732_v43  ;;  %v4543_v43 = vld [vmem:[%s6582_s11] ss:$8 sps:$4 sm:$0xff]   ;;  %v4546_v48 = vld [vmem:[%s6582_s11 + $0x14] ss:$8 sps:$4 sm:$0xff]   ;;  %v4549_v54 = vld [vmem:[%s6582_s11 + $0x24] ss:$8 sps:$4 sm:$0xff]  }
 0x959   : > { %v2702_v44 = vsel %vm632_vm6, %v4472_v52, %v4473_v17  ;;  %v4491_v20 = vpop.permute.xlu1 %4490  ;;  %2850 = vmatprep.subr.bf16.mxu0 %v6633_v13  ;;  %v4551_v52 = vld [vmem:[%s6582_s11 + $0x20] ss:$8 sps:$4 sm:$0xff]  }
 0x95a   : > { %v2733_v7 = vpack.c.bf16 %v2703_v12, %v2702_v44  ;;  %v4493_v25 = vunpack.i.h.bf16 %v4491_v20  ;;  %v4492_v34 = vunpack.i.l.bf16 %v4491_v20  ;;  %v4481_v30 = vpop.permute.xlu0 %4480  ;;  %v4552_v12 = vld [vmem:[%s6582_s11 + $0x34] ss:$8 sps:$4 sm:$0xff]  }
 0x95b   : > { %v4483_v63 = vunpack.i.h.bf16 %v4481_v30  ;;  %v4482_v39 = vunpack.i.l.bf16 %v4481_v30 }
 0x95c   : > { %v2705_v21 = vsel %vm632_vm6, %v4492_v34, %v4493_v25  ;;  %2851 = vmatpush1.bf16.msra.mxu0 %v2733_v7  ;;  %v4554_v7 = vld [vmem:[%s6582_s11 + $0x30] ss:$8 sps:$4 sm:$0xff]   ;;  %v4555_v25 = vld [vmem:[%s6584_s13] sm:$0xff]  }
 0x95d   : > { %v2704_v41 = vsel %vm632_vm6, %v4482_v39, %v4483_v63  ;;  %v4496_v5 = vpop.permute.xlu1 %4495  ;;  %2852 = vmatprep.subr.bf16.mxu0 %v6633_v13  ;;  %v4556_v39 = vld [vmem:[%s6584_s13 + $0x8] sm:$0xff]  }
 0x95e   : > { %v2734_v38 = vpack.c.bf16 %v2705_v21, %v2704_v41  ;;  %v4498_v60 = vunpack.i.h.bf16 %v4496_v5  ;;  %v4497_v19 = vunpack.i.l.bf16 %v4496_v5  ;;  %v4486_v16 = vpop.permute.xlu0 %4485 }
 0x95f   : > { %v4488_v15 = vunpack.i.h.bf16 %v4486_v16  ;;  %v4487_v51 = vunpack.i.l.bf16 %v4486_v16 }
 0x960   : > { %v2707_v10 = vsel %vm632_vm6, %v4497_v19, %v4498_v60  ;;  %2853 = vmatpush1.bf16.msra.mxu0 %v2734_v38 }
 0x961   : > { %v2706_v58 = vsel %vm632_vm6, %v4487_v51, %v4488_v15  ;;  %2854 = vmatprep.subr.bf16.mxu0 %v6633_v13  ;;  %v4548_v13 = vld [vmem:[%s6582_s11 + $0x10] ss:$8 sps:$4 sm:$0xff]  }
 0x962   : > { %v2735_v26 = vpack.c.bf16 %v2707_v10, %v2706_v58 }
 0x964   : > { %2855 = vmatpush1.bf16.msra.mxu0 %v2735_v26 }
 0x965   : > { %4112 = vmatprep.subr.bf16.mxu0 %v5781_v23 }
 0x967   : > { %2865 = vmatmul.mubr.bf16.vlgmr.msra.gmra.mrb[32].mxu0 %v4543_v43 }
 0x968   : > { %4113 = vmatpush3.bf16.msra.mxu0 %v5781_v23  ;;  %3873 = vmatprep.mubr.msk.bf16.mxu0 %vm2274_vm11, %v4546_v48 }
 0x969   : > { %4114 = vmatprep.subr.bf16.mxu0 %v5788_v42 }
 0x96c   : > { %4115 = vmatpush3.bf16.msra.mxu0 %v5788_v42 }
 0x96d   : > { %4116 = vmatprep.subr.bf16.mxu0 %v5797_v9 }
 0x96e   : > { %v6218_v6 = vpop.permute.xlu1 %2751 }
 0x96f   : > { %v6220_v17 = vpop.permute.xlu0 %2746  ;;  %2873 = vmatmul.mubr.bf16.gmra.mrb[36].mxu0 %v4548_v13 }
 0x970   : > { %4117 = vmatpush3.bf16.msra.mxu0 %v5797_v9  ;;  %3874 = vmatprep.mubr.msk.bf16.mxu0 %vm2274_vm11, %v4549_v54 }
 0x971   : > { %4118 = vmatprep.subr.bf16.mxu0 %v5801_v55 }
 0x972   : > { %v6225_v23 = vpop.permute.xlu1 %2761 }
 0x973   : > { %v6227_v42 = vpop.permute.xlu0 %2756 }
 0x974   : > { %4119 = vmatpush3.bf16.msra.mxu0 %v5801_v55 }
 0x975   : > { %4120 = vmatprep.subr.bf16.mxu0 %v5805_v56 }
 0x976   : > { %v6237_v9 = vpop.permute.xlu1 %2771 }
 0x977   : > { %v6239_v44 = vpop.permute.xlu0 %2766  ;;  %2881 = vmatmul.mubr.bf16.gmra.mrb[40].mxu0 %v4551_v52 }
 0x978   : > { %4121 = vmatpush3.bf16.msra.mxu0 %v5805_v56  ;;  %3875 = vmatprep.mubr.msk.bf16.mxu0 %vm2274_vm11, %v4552_v12 }
 0x979   : > { %4122 = vmatprep.subr.bf16.mxu0 %v5811_v46 }
 0x97a   : > { %v6244_v20 = vpop.permute.xlu1 %2781 }
 0x97b   : > { %v6246_v55 = vpop.permute.xlu0 %2776 }
 0x97c   : > { %4123 = vmatpush3.bf16.msra.mxu0 %v5811_v46 }
 0x97d   : > { %4124 = vmatprep.subr.bf16.mxu0 %v5824_v14 }
 0x97e   : > { %v6256_v56 = vpop.permute.xlu1 %2976 }
 0x97f   : > { %v6258_v34 = vpop.permute.xlu0 %2971  ;;  %2889 = vmatmul.mubr.bf16.gmra.mrb[44].mxu0 %v4554_v7 }
 0x980   : > { %4125 = vmatpush3.bf16.msra.mxu0 %v5824_v14  ;;  %4128 = vmatprep.mubr.bf16.mxu0 %v4555_v25 }
 0x981   : > { %4126 = vmatprep.subr.bf16.mxu0 %v5830_v8 }
 0x982   : > { %v3012_v30 = vpop.permute.xlu1 %3011 }
 0x983   : > { %v6262_v63 = vpop.permute.xlu0 %2981  ;;  %v3292_v46 = vadd.f32 %v6047_v53, %v3012_v30 }
 0x984   : > { %4127 = vmatpush3.bf16.msra.mxu0 %v5830_v8 }
 0x985   : > { %3394 = vrot.lane.b32.xlu0 %v3292_v46, %s4694_s25 }
 0x986   : > { %v3022_v21 = vpop.permute.xlu1 %3021 }
 0x987   : > { %v3300_v41 = vadd.f32 %v6045_v62, %v3022_v21  ;;  %v3017_v14 = vpop.permute.xlu0 %3016  ;;  %4129 = vmatmul.mubr.bf16.vlgmr.msra.gmra.mrb[48].mxu0 %v4556_v39 }
 0x988   : > { %v3295_v5 = vadd.f32 %v6057_v33, %v3017_v14 }
 0x989   : > { %3398 = vrot.lane.b32.xlu0 %v3300_v41, %s4694_s25 }
 0x98a   : > { %3396 = vrot.lane.b32.xlu1 %v3295_v5, %s4694_s25  ;;  %v3032_v53 = vpop.permute.xlu1 %3031 }
 0x98b   : > { %v3027_v38 = vpop.permute.xlu0 %3026  ;;  %v3308_v60 = vadd.f32 %v6070_v31, %v3032_v53 }
 0x98c   : > { %v3303_v19 = vadd.f32 %v6052_v35, %v3027_v38 }
 0x98d   : > { %3402 = vrot.lane.b32.xlu0 %v3308_v60, %s4694_s25 }
 0x98e   : > { %3400 = vrot.lane.b32.xlu1 %v3303_v19, %s4694_s25  ;;  %v3042_v8 = vpop.permute.xlu1 %3041 }
 0x98f   : > { %v3316_v62 = vadd.f32 %v6062_v57, %v3042_v8  ;;  %v3037_v16 = vpop.permute.xlu0 %3036 }
 0x990   : > { %v3311_v33 = vadd.f32 %v6077_v11, %v3037_v16 }
 0x991   : > { %3406 = vrot.lane.b32.xlu0 %v3316_v62, %s4694_s25 }
 0x992   : > { %3404 = vrot.lane.b32.xlu1 %v3311_v33, %s4694_s25  ;;  %v3052_v15 = vpop.permute.xlu1 %3051 }
 0x993   : > { %v3047_v51 = vpop.permute.xlu0 %3046  ;;  %v3324_v31 = vadd.f32 %v6090_v27, %v3052_v15 }
 0x994   : > { %v3319_v35 = vadd.f32 %v6075_v32, %v3047_v51 }
 0x995   : > { %3458 = vrot.lane.b32.xlu0 %v3324_v31, %s6634_s23 }
 0x996   : > { %3408 = vrot.lane.b32.xlu1 %v3319_v35, %s4694_s25  ;;  %v3062_v10 = vpop.permute.xlu1 %3061  ;;  %s4695_s25 = smov 3  }
 0x997   : > { %v3332_v57 = vadd.f32 %v6082_v24, %v3062_v10  ;;  %v3057_v58 = vpop.permute.xlu0 %3056 }
 0x998   : > { %v3327_v11 = vadd.f32 %v6097_v0, %v3057_v58 }
 0x999   : > { %3462 = vrot.lane.b32.xlu0 %v3332_v57, %s6634_s23 }
 0x99a   : > { %3460 = vrot.lane.b32.xlu1 %v3327_v11, %s6634_s23  ;;  %v3072_v26 = vpop.permute.xlu1 %3071 }
 0x99b   : > { %v3067_v43 = vpop.permute.xlu0 %3066  ;;  %v3340_v27 = vadd.f32 %v6110_v37, %v3072_v26 }
 0x99c   : > { %v3335_v32 = vadd.f32 %v6095_v22, %v3067_v43 }
 0x99d   : > { %3466 = vrot.lane.b32.xlu0 %v3340_v27, %s6634_s23 }
 0x99e   : > { %3464 = vrot.lane.b32.xlu1 %v3335_v32, %s6634_s23  ;;  %v3082_v48 = vpop.permute.xlu1 %3081 }
 0x99f   : > { %v3348_v24 = vadd.f32 %v6102_v4, %v3082_v48  ;;  %v3077_v13 = vpop.permute.xlu0 %3076 }
 0x9a0   : > { %v3343_v0 = vadd.f32 %v6117_v3, %v3077_v13 }
 0x9a1   : > { %3470 = vrot.lane.b32.xlu0 %v3348_v24, %s6634_s23 }
 0x9a2   : > { %3468 = vrot.lane.b32.xlu1 %v3343_v0, %s6634_s23  ;;  %v3092_v54 = vpop.permute.xlu1 %3091 }
 0x9a3   : > { %v3087_v52 = vpop.permute.xlu0 %3086  ;;  %v3356_v37 = vadd.f32 %v6130_v47, %v3092_v54 }
 0x9a4   : > { %v3351_v22 = vadd.f32 %v6115_v49, %v3087_v52 }
 0x9a5   : > { %3522 = vrot.lane.b32.xlu0 %v3356_v37, %s4695_s25 }
 0x9a6   : > { %3472 = vrot.lane.b32.xlu1 %v3351_v22, %s6634_s23  ;;  %v3102_v12 = vpop.permute.xlu1 %3101 }
 0x9a7   : > { %v3364_v4 = vadd.f32 %v6125_v40, %v3102_v12  ;;  %v3097_v7 = vpop.permute.xlu0 %3096  ;;  %v3584_v12 = vld [vmem:[%s6586_s15 + $0x28] sm:$0xff] }
 0x9a8   : > { %v3359_v3 = vadd.f32 %v6137_v59, %v3097_v7 }
 0x9a9   : > { %3526 = vrot.lane.b32.xlu0 %v3364_v4, %s4695_s25 }
 0x9aa   : > { %3524 = vrot.lane.b32.xlu1 %v3359_v3, %s4695_s25  ;;  %v3112_v25 = vpop.permute.xlu1 %3111 }
 0x9ab   : > { %v3107_v30 = vpop.permute.xlu0 %3106  ;;  %v3372_v46 = vadd.f32 %v6153_v45, %v3112_v25 }
 0x9ac   : > { %v3367_v47 = vadd.f32 %v6135_v36, %v3107_v30 }
 0x9ad   : > { %3530 = vrot.lane.b32.xlu0 %v3372_v46, %s4695_s25 }
 0x9ae   : > { %3528 = vrot.lane.b32.xlu1 %v3367_v47, %s4695_s25  ;;  %v3122_v49 = vpop.permute.xlu1 %3121 }
 0x9af   : > { %v3380_v39 = vadd.f32 %v6148_v18, %v3122_v49  ;;  %v3117_v21 = vpop.permute.xlu0 %3116 }
 0x9b0   : > { %v3375_v41 = vadd.f32 %v6157_v2, %v3117_v21 }
 0x9b1   : > { %3534 = vrot.lane.b32.xlu0 %v3380_v39, %s4695_s25 }
 0x9b2   : > { %3532 = vrot.lane.b32.xlu1 %v3375_v41, %s4695_s25  ;;  %v6308_v14 = vpop.permute.xlu1 %2986 }
 0x9b3   : > { %v3127_v40 = vpop.permute.xlu0 %3126 }
 0x9b4   : > { %v3383_v59 = vadd.f32 %v6155_v1, %v3127_v40 }
 0x9b6   : > { %3536 = vrot.lane.b32.xlu1 %v3383_v59, %s4695_s25  ;;  %v2997_v45 = vpop.permute.xlu1 %2996  ;;  %s3895_s25 = sshll.u32 %s6637_s22, 6 }
 0x9b7   : > { %v2992_v5 = vpop.permute.xlu0 %2991  ;;  %s6531_s0 = scalar_lea.vmem %s6587_s16, %s3895_s25 }
 0x9b8   : > { %v3276_v59 = vadd.f32 %v6033_v28, %v2992_v5  ;;  %v3279_v28 = vadd.f32 %v6043_v29, %v2997_v45  ;;  %v3586_v29 = vld [vmem:[%s6586_s15 + $0x38] sm:$0xff] }
 0x9ba   : > { %v3007_v38 = vpop.permute.xlu1 %3006 }
 0x9bb   : > { %v3002_v53 = vpop.permute.xlu0 %3001  ;;  %v3287_v16 = vadd.f32 %v6038_v50, %v3007_v38 }
 0x9bc   : > { %v3284_v49 = vadd.f32 %v6031_v61, %v3002_v53 }
 0x9f7   : > { %v6310_v36 = vpop.permute.xlu0 %3394 }
 0x9f8   : > { %v3426_v52 = vsel %vm1315_vm8, %v6310_v36, 0.0 }
 0x9fb   : > { %v6312_v60 = vpop.permute.xlu0 %3398 }
 0x9fc   : > { %v6314_v18 = vpop.permute.xlu1 %3396  ;;  %v3428_v48 = vsel %vm1315_vm8, %v6312_v60, 0.0 }
 0x9ff   : > { %v6316_v19 = vpop.permute.xlu0 %3402 }
 0xa00   : > { %v6318_v2 = vpop.permute.xlu1 %3400  ;;  %v3422_v39 = vsel %vm1315_vm8, 0.0, %v6316_v19 }
 0xa01   : > { %v3429_v38 = vsel %vm1315_vm8, %v6318_v2, 0.0  ;;  %v3442_v5 = vadd.f32 %v3422_v39, %v3276_v59 }
 0xa03   : > { %v6320_v8 = vpop.permute.xlu0 %3406 }
 0xa04   : > { %v6322_v1 = vpop.permute.xlu1 %3404  ;;  %v3424_v46 = vsel %vm1315_vm8, 0.0, %v6320_v8 }
 0xa07   : > { %v6324_v62 = vpop.permute.xlu0 %3458 }
 0xa08   : > { %v6327_v33 = vpop.permute.xlu1 %3408  ;;  %v3490_v24 = vsel %vm598_vm2, %v6324_v62, 0.0 }
 0xa09   : > { %v3425_v15 = vsel %vm1315_vm8, 0.0, %v6327_v33  ;;  %v3499_v3 = vadd.f32 %v3490_v24, %v3426_v52  ;;  %v3423_v24 = vsel %vm1315_vm8, 0.0, %v6322_v1 }
 0xa0a   : > { %v3448_v51 = vadd.f32 %v3425_v15, %v3287_v16  ;;  %v3580_v15 = vld [vmem:[%s6586_s15 + $0x8] sm:$0xff] }
 0xa0b   : > { %v6331_v31 = vpop.permute.xlu0 %3462 }
 0xa0c   : > { %v6333_v35 = vpop.permute.xlu1 %3460  ;;  %v3492_v50 = vsel %vm598_vm2, %v6331_v31, 0.0 }
 0xa0d   : > { %v3503_v0 = vadd.f32 %v3492_v50, %v3428_v48 }
 0xa0f   : > { %v6335_v10 = vpop.permute.xlu0 %3466 }
 0xa10   : > { %v6337_v57 = vpop.permute.xlu1 %3464  ;;  %v3486_v48 = vsel %vm598_vm2, 0.0, %v6335_v10 }
 0xa11   : > { %v3493_v47 = vsel %vm598_vm2, %v6337_v57, 0.0 }
 0xa12   : > { %v3505_v61 = vadd.f32 %v3493_v47, %v3429_v38 }
 0xa13   : > { %v3471_v58 = vpop.permute.xlu0 %3470 }
 0xa14   : > { %v6339_v11 = vpop.permute.xlu1 %3468  ;;  %v3488_v16 = vsel %vm598_vm2, 0.0, %v3471_v58 }
 0xa17   : > { %v3523_v26 = vpop.permute.xlu0 %3522 }
 0xa18   : > { %v6343_v43 = vpop.permute.xlu1 %3472  ;;  %v6346_v27 = vsel %vm3546_vm13, 0.0, %v3523_v26  ;;  %v3555_v37 = vsel %vm3546_vm13, %v3523_v26, 0.0  ;;  %v3446_v26 = vadd.f32 %v3424_v46, %v3284_v49  ;;  %v3506_v49 = vadd.f32 %v3486_v48, %v3442_v5 }
 0xa19   : > { %v3489_v32 = vsel %vm598_vm2, 0.0, %v6343_v43  ;;  %v3564_v21 = vadd.f32 %v3555_v37, %v3499_v3 }
 0xa1a   : > { %v6354_v13 = vadd.f32 %v3489_v32, %v3448_v51  ;;  %v3491_v32 = vsel %vm598_vm2, %v6333_v35, 0.0 }
 0xa1b   : > { %v3527_v54 = vpop.permute.xlu0 %3526 }
 0xa1c   : > { %v3525_v22 = vpop.permute.xlu1 %3524  ;;  %v6363_v4 = vsel %vm3546_vm13, 0.0, %v3527_v54  ;;  %v3557_v7 = vsel %vm3546_vm13, %v3527_v54, 0.0  ;;  %v3596_v54 = vmul.f32 %v3580_v15, %v3564_v21  ;;  %v3444_v21 = vadd.f32 %v3423_v24, %v3279_v28 }
 0xa1d   : > { %v6367_v25 = vsel %vm3546_vm13, 0.0, %v3525_v22  ;;  %v3568_v30 = vadd.f32 %v3557_v7, %v3503_v0  ;;  %v3510_v0 = vadd.f32 %v3488_v16, %v3446_v26  ;;  %v3556_v7 = vsel %vm3546_vm13, %v3525_v22, 0.0  ;;  %v3582_v26 = vld [vmem:[%s6586_s15 + $0x18] sm:$0xff] }
 0xa1e   : > { %v3487_v22 = vsel %vm598_vm2, 0.0, %v6339_v11 }
 0xa1f   : > { %v3600_v41 = vmul.f32 %v3584_v12, %v3568_v30  ;;  %v3531_v40 = vpop.permute.xlu0 %3530  ;;  %v3427_v12 = vsel %vm1315_vm8, %v6314_v18, 0.0  ;;  %v3591_v30 = vld [vmem:[%s6586_s15 + $0x60] sm:$0xff]  ;;  %v3508_v5 = vadd.f32 %v3487_v22, %v3444_v21 }
 0xa20   : > { %v3529_v51 = vpop.permute.xlu1 %3528  ;;  %v3551_v45 = vsel %vm3546_vm13, 0.0, %v3531_v40  ;;  %v3501_v47 = vadd.f32 %v3491_v32, %v3427_v12 }
 0xa21   : > { %v6384_v53 = vsel %vm3546_vm13, 0.0, %v3529_v51  ;;  %v3558_v50 = vsel %vm3546_vm13, %v3529_v51, 0.0  ;;  %3637 = vrot.lane.b32.xlu1 %v3600_v41, %s6622_s26  ;;  %v3496_v41 = vsel %vm598_vm2, %v3471_v58, 0.0  ;;  %v3571_v16 = vadd.f32 %v3551_v45, %v3506_v49 }
 0xa22   : > { %v3570_v52 = vadd.f32 %v3558_v50, %v3505_v61  ;;  %v3566_v59 = vadd.f32 %v3556_v7, %v3501_v47  ;;  %v3432_v51 = vsel %vm1315_vm8, %v6320_v8, 0.0  ;;  %v3587_v61 = vld [vmem:[%s6586_s15 + $0x40] sm:$0xff]  ;;  %v3494_v8 = vsel %vm598_vm2, %v6335_v10, 0.0  ;;  %v3592_v10 = vld [vmem:[%s6586_s15 + $0x68] sm:$0xff] }
 0xa23   : > { %v3535_v37 = vpop.permute.xlu0 %3534  ;;  %v3511_v32 = vadd.f32 %v3496_v41, %v3432_v51  ;;  %v3559_v7 = vsel %vm3546_vm13, %v3531_v40, 0.0  ;;  %v3431_v40 = vsel %vm1315_vm8, %v6322_v1, 0.0  ;;  %v3588_v47 = vld [vmem:[%s6586_s15 + $0x48] sm:$0xff]  ;;  %v3433_v41 = vsel %vm1315_vm8, %v6327_v33, 0.0  ;;  %v3590_v1 = vld [vmem:[%s6586_s15 + $0x58] sm:$0xff] }
 0xa24   : > { %v3533_v3 = vpop.permute.xlu1 %3532  ;;  %v3553_v46 = vsel %vm3546_vm13, 0.0, %v3535_v37  ;;  %v3602_v38 = vmul.f32 %v3586_v29, %v3570_v52  ;;  %v3561_v28 = vsel %vm3546_vm13, %v3535_v37, 0.0  ;;  %v3430_v37 = vsel %vm1315_vm8, %v6316_v19, 0.0  ;;  %v3589_v29 = vld [vmem:[%s6586_s15 + $0x50] sm:$0xff] }
 0xa25   : > { %v3575_v39 = vadd.f32 %v3553_v46, %v3510_v0  ;;  %3629 = vrot.lane.b32.xlu1 %v3596_v54, %s6622_s26  ;;  %v3552_v50 = vsel %vm3546_vm13, 0.0, %v3533_v3  ;;  %v3598_v0 = vmul.f32 %v3582_v26, %v3566_v59  ;;  %v3603_v54 = vmul.f32 %v3587_v61, %v3571_v16 }
 0xa26   : > { %v3573_v52 = vadd.f32 %v3552_v50, %v3508_v5  ;;  %v3576_v12 = vadd.f32 %v3561_v28, %v3511_v32  ;;  %v3507_v45 = vadd.f32 %v3494_v8, %v3430_v37  ;;  %v3560_v49 = vsel %vm3546_vm13, %v3533_v3, 0.0 }
 0xa27   : > { %v3607_v15 = vmul.f32 %v3591_v30, %v3575_v39 }
 0xa28   : > { %v3537_v58 = vpop.permute.xlu1 %3536  ;;  %v3572_v30 = vadd.f32 %v3559_v7, %v3507_v45  ;;  %v3605_v19 = vmul.f32 %v3589_v29, %v3573_v52  ;;  %v3608_v46 = vmul.f32 %v3592_v10, %v3576_v12  ;;  %v3420_v45 = vsel %vm1315_vm8, 0.0, %v6312_v60 }
 0xa29   : > { %v3554_v48 = vsel %vm3546_vm13, 0.0, %v3537_v58  ;;  %3641 = vrot.lane.b32.xlu1 %v3602_v38, %s6622_s26  ;;  %3651 = vrot.lane.b32.xlu0 %v3607_v15, %s6622_s26  ;;  %v3562_v59 = vsel %vm3546_vm13, %v3537_v58, 0.0  ;;  %v3482_v60 = vsel %vm598_vm2, 0.0, %v6324_v62 }
 0xa2a   : > { %v6426_v24 = vadd.f32 %v3554_v48, %v6354_v13  ;;  %v3495_v13 = vsel %vm598_vm2, %v6339_v11, 0.0  ;;  %v3497_v11 = vsel %vm598_vm2, %v6343_v43, 0.0  ;;  %v3604_v21 = vmul.f32 %v3588_v47, %v3572_v30  ;;  %v3594_v43 = vld [vmem:[%s6586_s15 + $0x78] sm:$0xff] }
 0xa2b   : > { %v3509_v39 = vadd.f32 %v3495_v13, %v3431_v40  ;;  %v3513_v3 = vadd.f32 %v3497_v11, %v3433_v41 }
 0xa2d   : > { %3633 = vrot.lane.b32.xlu1 %v3598_v0, %s6622_s26  ;;  %3643 = vrot.lane.b32.xlu0 %v3603_v54, %s6622_s26  ;;  %v3574_v22 = vadd.f32 %v3560_v49, %v3509_v39  ;;  %v3578_v16 = vadd.f32 %v3562_v59, %v3513_v3  ;;  %v3421_v49 = vsel %vm1315_vm8, 0.0, %v6318_v2  ;;  %v3583_v2 = vld [vmem:[%s6586_s15 + $0x20] sm:$0xff] }
 0xa2f   : > { %v3606_v38 = vmul.f32 %v3590_v1, %v3574_v22  ;;  %v3610_v33 = vmul.f32 %v3594_v43, %v3578_v16 }
 0xa31   : > { %3653 = vrot.lane.b32.xlu1 %v3608_v46, %s6622_s26  ;;  %3647 = vrot.lane.b32.xlu0 %v3605_v19, %s6622_s26  ;;  %v3418_v19 = vsel %vm1315_vm8, 0.0, %v6310_v36 }
 0xa35   : > { %3645 = vrot.lane.b32.xlu1 %v3604_v21, %s6622_s26 }
 0xa39   : > { %3649 = vrot.lane.b32.xlu1 %v3606_v38, %s6622_s26  ;;  %v3579_v38 = vld [vmem:[%s6586_s15] sm:$0xff] }
 0xa3a   : > { %v6462_v15 = vpop.f32.mrb[32].mxu0 }
 0xa3b   : > { %v2868_v51 = vpop.f32.mrb[33].mxu0 }
 0xa3c   : > { %v6464_v26 = vpop.f32.mrb[34].mxu0 }
 0xa3d   : > { %3657 = vrot.lane.b32.xlu1 %v3610_v33, %s6622_s26  ;;  %v2871_v61 = vpop.f32.mrb[35].mxu0 }
 0xa42   : > { %v6467_v50 = vpop.f32.mrb[36].mxu0 }
 0xa43   : > { %v2876_v28 = vpop.f32.mrb[37].mxu0 }
 0xa44   : > { %v6469_v58 = vpop.f32.mrb[38].mxu0 }
 0xa45   : > { %v2879_v5 = vpop.f32.mrb[39].mxu0 }
 0xa4a   : > { %v6471_v32 = vpop.f32.mrb[40].mxu0 }
 0xa4b   : > { %v2884_v48 = vpop.f32.mrb[41].mxu0 }
 0xa4c   : > { %v6473_v8 = vpop.f32.mrb[42].mxu0 }
 0xa4d   : > { %v2887_v0 = vpop.f32.mrb[43].mxu0 }
 0xa52   : > { %v2890_v54 = vpop.f32.mrb[44].mxu0 }
 0xa53   : > { %v2892_v52 = vpop.f32.mrb[45].mxu0  ;;  %v2891_v48 = vadd.f32 %v2890_v54, %v6246_v55  ;;  %v6635_v54 = vld [vmem:[#allocation2_spill] sm:$0xff] }
 0xa54   : > { %v6475_v12 = vpop.f32.mrb[46].mxu0 }
 0xa55   : > { %v2895_v37 = vpop.f32.mrb[47].mxu0 }
 0xa5a   : > { %v4130_v7 = vpop.f32.mrb[48].mxu0 }
 0xa5b   : > { %v3268_v29 = vadd.f32 %v4130_v7, %v6262_v63  ;;  %v3259_v10 = vpop.f32.mrb[49].mxu0  ;;  %v3484_v63 = vsel %vm598_vm2, 0.0, %v6331_v31 }
 0xa5c   : > { %v3260_v13 = vadd.f32 %v3259_v10, %v6258_v34  ;;  %v4131_v30 = vpop.f32.mrb[50].mxu0  ;;  %v3419_v34 = vsel %vm1315_vm8, 0.0, %v6314_v18  ;;  %v2883_v10 = vadd.f32 %v6471_v32, %v6239_v44 }
 0xa5d   : > { %v3438_v46 = vadd.f32 %v3420_v45, %v3268_v29  ;;  %v3271_v40 = vadd.f32 %v4131_v30, %v6308_v14  ;;  %v3262_v47 = vpop.f32.mrb[51].mxu0  ;;  %v3485_v14 = vsel %vm598_vm2, 0.0, %v6337_v57  ;;  %v3683_v29 = vstv %s4801_s17 }
 0xa5e   : > { %v3434_v39 = vadd.f32 %v3418_v19, %v3260_v13  ;;  %v3263_v11 = vadd.f32 %v3262_v47, %v6256_v56  ;;  %v3483_v56 = vsel %vm598_vm2, 0.0, %v6333_v35  ;;  %v3585_v35 = vld [vmem:[%s6586_s15 + $0x30] sm:$0xff]  ;;  %v2886_v19 = vadd.f32 %v6473_v8, %v6237_v9 }
 0xa5f   : > { %v3502_v36 = vadd.f32 %v3484_v63, %v3438_v46  ;;  %v3440_v21 = vadd.f32 %v3421_v49, %v3271_v40 }
 0xa60   : > { %v3498_v22 = vadd.f32 %v3482_v60, %v3434_v39  ;;  %v3436_v41 = vadd.f32 %v3419_v34, %v3263_v11  ;;  %v2875_v11 = vadd.f32 %v6467_v50, %v6227_v42  ;;  %v2867_v60 = vadd.f32 %v6462_v15, %v6220_v17 }
 0xa61   : > { %v3567_v31 = vadd.f32 %v6363_v4, %v3502_v36  ;;  %v3504_v18 = vadd.f32 %v3485_v14, %v3440_v21  ;;  %v3581_v4 = vld [vmem:[%s6586_s15 + $0x10] sm:$0xff]  ;;  %v2870_v17 = vadd.f32 %v6464_v26, %v6218_v6 }
 0xa62   : > { %v3563_v1 = vadd.f32 %v6346_v27, %v3498_v22  ;;  %v3500_v62 = vadd.f32 %v3483_v56, %v3436_v41 }
 0xa63   : > { %v3569_v59 = vadd.f32 %v6384_v53, %v3504_v18  ;;  %v3599_v3 = vmul.f32 %v3583_v2, %v3567_v31  ;;  %v3593_v53 = vld [vmem:[%s6586_s15 + $0x70] sm:$0xff]  ;;  %v2878_v2 = vadd.f32 %v6469_v58, %v6225_v23 }
 0xa64   : > { %v3565_v57 = vadd.f32 %v6367_v25, %v3500_v62  ;;  %v3595_v16 = vmul.f32 %v3579_v38, %v3563_v1  ;;  %v3609_v43 = vmul.f32 %v3593_v53, %v6426_v24 }
 0xa65   : > { %3635 = vrot.lane.b32.xlu0 %v3599_v3, %s6622_s26  ;;  %v3601_v27 = vmul.f32 %v3585_v35, %v3569_v59  ;;  %v2894_v59 = vadd.f32 %v6475_v12, %v6244_v20 }
 0xa66   : > { %v3597_v25 = vmul.f32 %v3581_v4, %v3565_v57 }
 0xa69   : > { %3627 = vrot.lane.b32.xlu0 %v3595_v16, %s6622_s26 }
 0xa6d   : > { %3639 = vrot.lane.b32.xlu0 %v3601_v27, %s6622_s26 }
 0xa71   : > { %3631 = vrot.lane.b32.xlu0 %v3597_v25, %s6622_s26 }
 0xa75   : > { %3655 = vrot.lane.b32.xlu0 %v3609_v43, %s6622_s26 }
 0xa93   : > { %v3638_v33 = vpop.permute.xlu1 %3637 }
 0xa97   : > { %v3630_v51 = vpop.permute.xlu1 %3629 }
 0xa9b   : > { %v3642_v61 = vpop.permute.xlu1 %3641  ;;  %v3652_v28 = vpop.permute.xlu0 %3651 }
 0xa9f   : > { %v3634_v5 = vpop.permute.xlu1 %3633  ;;  %v3644_v37 = vpop.permute.xlu0 %3643 }
 0xaa3   : > { %v3654_v0 = vpop.permute.xlu1 %3653  ;;  %v3648_v44 = vpop.permute.xlu0 %3647 }
 0xaa4   : > { %v3665_v52 = vsel %vm632_vm6, %v3652_v28, %v3654_v0 }
 0xaa5   : > { %v3681_v7 = vadd.f32 %v3665_v52, %v2891_v48 }
 0xaa7   : > { %v3690_v24 = vmul.f32 %v3683_v29, %v3681_v7  ;;  %v3646_v45 = vpop.permute.xlu1 %3645 }
 0xaa8   : > { %v3663_v55 = vsel %vm632_vm6, %v3644_v37, %v3646_v45 }
 0xaa9   : > { %v3698_v13 = vadd.f32 %v3690_v24, %v6635_v54  ;;  %v3679_v30 = vadd.f32 %v3663_v55, %v2883_v10 }
 0xaab   : > { %3706 = vst [vmem:[%s6531_s0 + $0x30] sm:$0xff] %v3698_v13  ;;  %v3688_v32 = vmul.f32 %v3683_v29, %v3679_v30  ;;  %v3650_v46 = vpop.permute.xlu1 %3649 }
 0xaac   : > { %v3664_v40 = vsel %vm632_vm6, %v3648_v44, %v3650_v46 }
 0xaad   : > { %v3696_v47 = vadd.f32 %v3688_v32, %v6635_v54  ;;  %v3680_v49 = vadd.f32 %v3664_v40, %v2886_v19 }
 0xaaf   : > { %3704 = vst [vmem:[%s6531_s0 + $0x20] sm:$0xff] %v3696_v47  ;;  %v3689_v63 = vmul.f32 %v3683_v29, %v3680_v49  ;;  %v3658_v3 = vpop.permute.xlu1 %3657 }
 0xab1   : > { %v3697_v39 = vadd.f32 %v3689_v63, %v6635_v54 }
 0xab3   : > { %3705 = vst [vmem:[%s6531_s0 + $0x28] sm:$0xff] %v3697_v39 }
 0xad7   : > { %v3636_v34 = vpop.permute.xlu0 %3635 }
 0xad8   : > { %v3661_v9 = vsel %vm632_vm6, %v3636_v34, %v3638_v33 }
 0xad9   : > { %v3677_v8 = vadd.f32 %v3661_v9, %v2875_v11 }
 0xadb   : > { %v3686_v36 = vmul.f32 %v3683_v29, %v3677_v8  ;;  %v3628_v21 = vpop.permute.xlu0 %3627 }
 0xadc   : > { %v3659_v14 = vsel %vm632_vm6, %v3628_v21, %v3630_v51 }
 0xadd   : > { %v3694_v22 = vadd.f32 %v3686_v36, %v6635_v54  ;;  %v3675_v41 = vadd.f32 %v3659_v14, %v2867_v60 }
 0xadf   : > { %3702 = vst [vmem:[%s6531_s0 + $0x10] sm:$0xff] %v3694_v22  ;;  %v3684_v42 = vmul.f32 %v3683_v29, %v3675_v41  ;;  %v3640_v50 = vpop.permute.xlu0 %3639 }
 0xae0   : > { %v3662_v56 = vsel %vm632_vm6, %v3640_v50, %v3642_v61 }
 0xae1   : > { %v3692_v31 = vadd.f32 %v3684_v42, %v6635_v54  ;;  %v3678_v18 = vadd.f32 %v3662_v56, %v2878_v2 }
 0xae3   : > { %3700 = vst [vmem:[%s6531_s0] sm:$0xff] %v3692_v31  ;;  %v3687_v15 = vmul.f32 %v3683_v29, %v3678_v18  ;;  %v3632_v1 = vpop.permute.xlu0 %3631 }
 0xae4   : > { %v3660_v62 = vsel %vm632_vm6, %v3632_v1, %v3634_v5 }
 0xae5   : > { %v3695_v23 = vadd.f32 %v3687_v15, %v6635_v54  ;;  %v3676_v58 = vadd.f32 %v3660_v62, %v2870_v17 }
 0xae7   : > { %3703 = vst [vmem:[%s6531_s0 + $0x18] sm:$0xff] %v3695_v23  ;;  %v3685_v57 = vmul.f32 %v3683_v29, %v3676_v58  ;;  %v3656_v38 = vpop.permute.xlu0 %3655 }
 0xae8   : > { %v3666_v16 = vsel %vm632_vm6, %v3656_v38, %v3658_v3 }
 0xae9   : > { %v3693_v6 = vadd.f32 %v3685_v57, %v6635_v54  ;;  %v3682_v26 = vadd.f32 %v3666_v16, %v2894_v59 }
 0xaeb   : > { %3701 = vst [vmem:[%s6531_s0 + $0x8] sm:$0xff] %v3693_v6  ;;  %v3691_v35 = vmul.f32 %v3683_v29, %v3682_v26 }
 0xaed   : > { %v3699_v27 = vadd.f32 %v3691_v35, %v6635_v54 }
 0xaef   : > { %3707 = vst [vmem:[%s6531_s0 + $0x38] sm:$0xff] %v3699_v27 }
 0xaf0 PF: > { %s26_s21 = sadd.s32 1, %s4687_s21  }
 0xaf1   : > { %p23_p4 = scmp.ge.s32.totalorder %s26_s21, 4  }
 0xaf3   :  { %25 = sbr.rel (!%p23_p4) target bundleno = 2 (0x2), region = 114 }

</bundles_post_ra>
